<compile_context>
chip_gen: v6e
topology: v6e:2x2x1
jax: 0.10.0
libtpu: 0.0.40
codegen_flags: <defaults>
</compile_context>

<pallas_src>
import functools

import jax
import jax.numpy as jnp
from jax.experimental import pallas as pl
from jax.experimental.pallas import tpu as pltpu

BN_EPS = 1e-5


def _sigmoid(x):
    # EUP tanh instead of a full-precision divide on the VALU path.
    return 0.5 * (jnp.tanh(0.5 * x) + 1.0)


def fused_kernel(x1_ref, x2_ref, p_ref, out_ref,
                 v3_ref, sum_ref, sq_ref, m_ref, a1_ref, a2_ref,
                 *, n_total, nb, hout, wout):
    phase = pl.program_id(0)   # 0 = conv + BN-stats accumulation, 1 = fused elementwise tail
    n = pl.program_id(1)       # batch-block index

    @pl.when(phase == 0)
    def _stats():
        x1b = x1_ref[...]                      # (Nb, 3, H, W)
        x2b = x2_ref[...]                      # (Nb, 1, H, W)
        H, W = x1b.shape[-2], x1b.shape[-1]

        def wcol(c):                           # per-output-channel scalar -> (1, Cout, 1, 1)
            return p_ref[:, c:c + 1][None, :, :, None]

        # Pointwise conv on the FULL HxW (border handled by masked stats / final crop).
        # Tree-balanced 4-term accumulation: 2-deep dependency chain on the VPU.
        t0 = wcol(3) * x2b + wcol(0) * x1b[:, 0:1]
        t1 = wcol(1) * x1b[:, 1:2] + wcol(2) * x1b[:, 2:3]
        v3 = t0 + t1                           # (Nb, Cout, H, W)

        # Persist v3 for phase 1 (inputs are not re-read, conv is not recomputed).
        off = pl.multiple_of(n * nb, nb)
        v3_ref[pl.ds(off, nb)] = v3

        @pl.when(n == 0)
        def _init():
            sum_ref[...] = jnp.zeros_like(sum_ref)
            sq_ref[...] = jnp.zeros_like(sq_ref)

        # 1-px border mask (interior pixels only feed the BatchNorm statistics).
        row = jax.lax.broadcasted_iota(jnp.int32, (H, W), 0)
        col = jax.lax.broadcasted_iota(jnp.int32, (H, W), 1)
        interior = (row >= 1) & (row < H - 1) & (col >= 1) & (col < W - 1)
        vm = jnp.where(interior[None, None, :, :], v3, 0.0)

        # Per-lane partial sums: defer the cross-lane (XLU) reduction to phase 1.
        sum_ref[...] += jnp.sum(jnp.sum(vm, axis=0), axis=1)        # (Cout, W)
        sq_ref[...] += jnp.sum(jnp.sum(vm * v3, axis=0), axis=1)    # (Cout, W)

    @pl.when(phase == 1)
    def _apply():
        @pl.when(n == 0)
        def _finalize_stats():
            # One deferred lane reduction + one EUP rsqrt chain for the whole kernel.
            inv_cnt = 1.0 / float(n_total * hout * wout)
            s1 = jnp.sum(sum_ref[...], axis=-1, keepdims=True)      # (Cout, 1)
            s2 = jnp.sum(sq_ref[...], axis=-1, keepdims=True)
            m1 = s1 * inv_cnt
            var1 = jnp.maximum(s2 * inv_cnt - m1 * m1, 0.0)         # biased batch var

            g1 = p_ref[:, 4:5]
            g2 = p_ref[:, 6:7]
            r1 = jax.lax.rsqrt(var1 + BN_EPS)
            a1 = g1 * r1                                            # BN1 scale
            # Closed-form BN2 stats: mean2 = be1 (exact), var2 = g1^2 * var1 / (var1 + eps)
            var2 = (g1 * g1) * var1 * (r1 * r1)
            a2 = a1 * g2 * jax.lax.rsqrt(var2 + BN_EPS)             # fused BN1+BN2 scale

            m_ref[...] = m1
            a1_ref[...] = a1
            a2_ref[...] = a2

        off = pl.multiple_of(n * nb, nb)
        v3blk = v3_ref[pl.ds(off, nb)]                              # (Nb, Cout, H, W)
        H, W = v3blk.shape[-2], v3blk.shape[-1]
        v3i = v3blk[:, :, 1:H - 1, 1:W - 1]                         # the ONE unaligned slice

        m1 = m_ref[...][None, :, :, None]                           # (1, Cout, 1, 1)
        a1 = a1_ref[...][None, :, :, None]
        a2 = a2_ref[...][None, :, :, None]
        be1 = p_ref[:, 5:6][None, :, :, None]
        be2 = p_ref[:, 7:8][None, :, :, None]

        t = v3i - m1
        v4 = a1 * t + be1
        v5 = a2 * t + be2
        v6 = v4 * v5
        v7 = v6 * _sigmoid(v6)
        out_ref[...] = v7 * _sigmoid(v7)


def _pick_nb(N, C1, C2, Cout, H, W, budget_bytes=24 * 1024 * 1024):
    """Largest divisor of N whose double-buffered blocks + v3 scratch fit a portable budget."""
    scratch = N * Cout * H * W * 4
    for nb in range(N, 0, -1):
        if N % nb != 0:
            continue
        blk = 2 * nb * (C1 + C2) * H * W * 4 + 2 * nb * Cout * (H - 2) * (W - 2) * 4
        if blk + scratch <= budget_bytes:
            return nb
    return 1


def model_forward(x1, x2, params):
    """x1: (N, 3, H, W) f32, x2: (N, 1, H, W) f32 (NCHW, like PyTorch)."""
    w1, b1, w2, b2, g1, be1, g2, be2 = params
    del b1, b2  # dead: exactly cancelled by BN1's batch-mean subtraction
    N, C1, H, W = x1.shape
    C2 = x2.shape[1]
    Hout, Wout = H - 2, W - 2
    Cout = w1.shape[0]

    # Single tiny packed-parameter block: [w1 | w2 | g1 | be1 | g2 | be2] -> (8, 8), resident.
    pcat = jnp.concatenate(
        [w1, w2, g1[:, None], be1[:, None], g2[:, None], be2[:, None]], axis=1
    ).astype(jnp.float32)

    Nb = _pick_nb(N, C1, C2, Cout, H, W)
    NB = N // Nb

    kernel = functools.partial(fused_kernel, n_total=N, nb=Nb, hout=Hout, wout=Wout)

    # Phase 0: walk the batch blocks.  Phase 1: park the input window on the already-resident
    # last block -> zero input DMAs during phase 1 (v3 is read from the VMEM scratch instead).
    def in_map(p, n):
        return ((1 - p) * n + p * (NB - 1), 0, 0, 0)

    return pl.pallas_call(
        kernel,
        out_shape=jax.ShapeDtypeStruct((N, Cout, Hout, Wout), jnp.float32),
        grid=(2, NB),   # (phase, batch-block)
        in_specs=[
            pl.BlockSpec((Nb, C1, H, W), in_map),
            pl.BlockSpec((Nb, C2, H, W), in_map),
            pl.BlockSpec((Cout, 8), lambda p, n: (0, 0)),     # resident packed params
        ],
        # phase 0 parks on block 0 (never flushed); phase 1 writes each block exactly once.
        out_specs=pl.BlockSpec((Nb, Cout, Hout, Wout), lambda p, n: (p * n, 0, 0, 0)),
        scratch_shapes=[
            pltpu.VMEM((N, Cout, H, W), jnp.float32),   # persisted v3 (all batches)
            pltpu.VMEM((Cout, W), jnp.float32),         # per-lane partial sum(v3)
            pltpu.VMEM((Cout, W), jnp.float32),         # per-lane partial sum(v3^2)
            pltpu.VMEM((Cout, 1), jnp.float32),         # mean1
            pltpu.VMEM((Cout, 1), jnp.float32),         # fused BN1 scale a1
            pltpu.VMEM((Cout, 1), jnp.float32),         # fused BN1+BN2 scale a2
        ],
        compiler_params=pltpu.CompilerParams(
            # Both axes are serial: phase 1 depends on phase 0's scratch accumulation.
            dimension_semantics=("arbitrary", "arbitrary"),
            # <= 48 MiB keeps the budget valid on v7x (64 MiB physical) as well as v5e/v6e.
            vmem_limit_bytes=48 * 1024 * 1024,
        ),
    )(x1, x2, pcat)


def reference_forward(x1, x2, params):
    """Pure-JAX reference mirroring the PyTorch semantics (biases + explicit double BN)."""
    w1, b1, w2, b2, g1, be1, g2, be2 = params
    x1c = x1[:, :, 1:-1, 1:-1]
    x2c = x2[:, :, 1:-1, 1:-1]
    v1 = jnp.einsum('oc,nchw->nohw', w1, x1c) + b1.reshape(1, -1, 1, 1)
    v2 = jnp.einsum('oc,nchw->nohw', w2, x2c) + b2.reshape(1, -1, 1, 1)
    v3 = v1 + v2

    def bn(x, g, b):
        m = jnp.mean(x, axis=(0, 2, 3), keepdims=True)
        v = jnp.mean((x - m) ** 2, axis=(0, 2, 3), keepdims=True)
        return (x - m) * jax.lax.rsqrt(v + BN_EPS) * g.reshape(1, -1, 1, 1) + b.reshape(1, -1, 1, 1)

    v4 = bn(v3, g1, be1)
    v5 = bn(v4, g2, be2)
    v6 = v4 * v5
    v7 = v6 * jax.nn.sigmoid(v6)
    return v7 * jax.nn.sigmoid(v7)


def init_params(key, c1=3, c2=1, cout=8):
    k = jax.random.split(key, 8)
    # PyTorch ConvTranspose2d stores (Cin, Cout, 1, 1); here weights are kept as (Cout, Cin).
    w1 = 0.1 * jax.random.normal(k[0], (cout, c1), jnp.float32)
    b1 = 0.1 * jax.random.normal(k[1], (cout,), jnp.float32)
    w2 = 0.1 * jax.random.normal(k[2], (cout, c2), jnp.float32)
    b2 = 0.1 * jax.random.normal(k[3], (cout,), jnp.float32)
    # Perturbed BN affine params (defaults are 1/0) to exercise the full affine path.
    g1 = 1.0 + 0.1 * jax.random.normal(k[4], (cout,), jnp.float32)
    be1 = 0.1 * jax.random.normal(k[5], (cout,), jnp.float32)
    g2 = 1.0 + 0.1 * jax.random.normal(k[6], (cout,), jnp.float32)
    be2 = 0.1 * jax.random.normal(k[7], (cout,), jnp.float32)
    return (w1, b1, w2, b2, g1, be1, g2, be2)


if __name__ == "__main__":
    key = jax.random.PRNGKey(0)
    kx1, kx2, kp = jax.random.split(key, 3)

    # Small shapes consistent with the module (original: 1x3x128x128 / 1x1x128x128).
    x1 = jax.random.normal(kx1, (2, 3, 18, 18), jnp.float32)
    x2 = jax.random.normal(kx2, (2, 1, 18, 18), jnp.float32)
    params = init_params(kp)

    out = jax.jit(model_forward)(x1, x2, params)
    out = jax.block_until_ready(out)

    assert out.shape == (2, 8, 16, 16), out.shape
    ref = reference_forward(x1, x2, params)
    max_err = float(jnp.max(jnp.abs(out - ref)))
    assert jnp.allclose(out, ref, atol=5e-4, rtol=5e-4), max_err

    print("KERNEL_OK")
</pallas_src>

<mosaic_0001>
module attributes {stable_mosaic.version = 11 : i64} {
  func.func @fused_kernel(%arg0: i32, %arg1: i32, %arg2: memref<2x3x18x18xf32, #tpu.memory_space<vmem>>, %arg3: memref<2x1x18x18xf32, #tpu.memory_space<vmem>>, %arg4: memref<8x8xf32, #tpu.memory_space<vmem>>, %arg5: memref<2x8x16x16xf32, #tpu.memory_space<vmem>>, %arg6: memref<2x8x18x18xf32, #tpu.memory_space<vmem>>, %arg7: memref<8x18xf32, #tpu.memory_space<vmem>>, %arg8: memref<8x18xf32, #tpu.memory_space<vmem>>, %arg9: memref<8x1xf32, #tpu.memory_space<vmem>>, %arg10: memref<8x1xf32, #tpu.memory_space<vmem>>, %arg11: memref<8x1xf32, #tpu.memory_space<vmem>>) attributes {dimension_semantics = [#tpu.dimension_semantics<arbitrary>, #tpu.dimension_semantics<arbitrary>], iteration_bounds = array<i64: 2, 1>, scalar_prefetch = 0 : i64, scratch_operands = 6 : i64, tpu.core_type = #tpu.core_type<tc>, window_params = [{transform_indices = @transform_0, window_bounds = array<i64: 2, 3, 18, 18>}, {transform_indices = @transform_1, window_bounds = array<i64: 2, 1, 18, 18>}, {pipeline_mode = #tpu.pipeline_mode<synchronous>, transform_indices = @transform_2, window_bounds = array<i64: 8, 8>}, {transform_indices = @transform_3, window_bounds = array<i64: 2, 8, 16, 16>}]} {
    %c0_i32 = arith.constant 0 : i32
    %0 = arith.cmpi eq, %arg0, %c0_i32 : i32
    %1 = arith.extui %0 : i1 to i32
    %c0_i32_0 = arith.constant 0 : i32
    %2 = arith.cmpi ne, %1, %c0_i32_0 : i32
    scf.if %2 {
      %c0 = arith.constant 0 : index
      %c0_2 = arith.constant 0 : index
      %c0_3 = arith.constant 0 : index
      %c0_4 = arith.constant 0 : index
      %6 = vector.load %arg2[%c0, %c0_2, %c0_3, %c0_4] : memref<2x3x18x18xf32, #tpu.memory_space<vmem>>, vector<2x3x18x18xf32>
      %c0_5 = arith.constant 0 : index
      %c0_6 = arith.constant 0 : index
      %c0_7 = arith.constant 0 : index
      %c0_8 = arith.constant 0 : index
      %7 = vector.load %arg3[%c0_5, %c0_6, %c0_7, %c0_8] : memref<2x1x18x18xf32, #tpu.memory_space<vmem>>, vector<2x1x18x18xf32>
      %c0_9 = arith.constant 0 : index
      %c3 = arith.constant 3 : index
      %8 = vector.load %arg4[%c0_9, %c3] : memref<8x8xf32, #tpu.memory_space<vmem>>, vector<8x1xf32>
      %9 = vector.shape_cast %8 : vector<8x1xf32> to vector<1x8x1x1xf32>
      %10 = vector.broadcast %9 : vector<1x8x1x1xf32> to vector<2x8x18x18xf32>
      %11 = vector.broadcast %7 : vector<2x1x18x18xf32> to vector<2x8x18x18xf32>
      %12 = arith.mulf %10, %11 : vector<2x8x18x18xf32>
      %c0_10 = arith.constant 0 : index
      %c0_11 = arith.constant 0 : index
      %13 = vector.load %arg4[%c0_10, %c0_11] : memref<8x8xf32, #tpu.memory_space<vmem>>, vector<8x1xf32>
      %14 = vector.shape_cast %13 : vector<8x1xf32> to vector<1x8x1x1xf32>
      %15 = vector.extract_strided_slice %6 {offsets = [0, 0, 0, 0], sizes = [2, 1, 18, 18], strides = [1, 1, 1, 1]} : vector<2x3x18x18xf32> to vector<2x1x18x18xf32>
      %16 = vector.broadcast %14 : vector<1x8x1x1xf32> to vector<2x8x18x18xf32>
      %17 = vector.broadcast %15 : vector<2x1x18x18xf32> to vector<2x8x18x18xf32>
      %18 = arith.mulf %16, %17 : vector<2x8x18x18xf32>
      %19 = arith.addf %12, %18 : vector<2x8x18x18xf32>
      %c0_12 = arith.constant 0 : index
      %c1 = arith.constant 1 : index
      %20 = vector.load %arg4[%c0_12, %c1] : memref<8x8xf32, #tpu.memory_space<vmem>>, vector<8x1xf32>
      %21 = vector.shape_cast %20 : vector<8x1xf32> to vector<1x8x1x1xf32>
      %22 = vector.extract_strided_slice %6 {offsets = [0, 1, 0, 0], sizes = [2, 1, 18, 18], strides = [1, 1, 1, 1]} : vector<2x3x18x18xf32> to vector<2x1x18x18xf32>
      %23 = vector.broadcast %21 : vector<1x8x1x1xf32> to vector<2x8x18x18xf32>
      %24 = vector.broadcast %22 : vector<2x1x18x18xf32> to vector<2x8x18x18xf32>
      %25 = arith.mulf %23, %24 : vector<2x8x18x18xf32>
      %c0_13 = arith.constant 0 : index
      %c2 = arith.constant 2 : index
      %26 = vector.load %arg4[%c0_13, %c2] : memref<8x8xf32, #tpu.memory_space<vmem>>, vector<8x1xf32>
      %27 = vector.shape_cast %26 : vector<8x1xf32> to vector<1x8x1x1xf32>
      %28 = vector.extract_strided_slice %6 {offsets = [0, 2, 0, 0], sizes = [2, 1, 18, 18], strides = [1, 1, 1, 1]} : vector<2x3x18x18xf32> to vector<2x1x18x18xf32>
      %29 = vector.broadcast %27 : vector<1x8x1x1xf32> to vector<2x8x18x18xf32>
      %30 = vector.broadcast %28 : vector<2x1x18x18xf32> to vector<2x8x18x18xf32>
      %31 = arith.mulf %29, %30 : vector<2x8x18x18xf32>
      %32 = arith.addf %25, %31 : vector<2x8x18x18xf32>
      %33 = arith.addf %19, %32 : vector<2x8x18x18xf32>
      %c2_i32 = arith.constant 2 : i32
      %34 = arith.muli %arg1, %c2_i32 : i32
      %35 = tpu.assume_multiple %34, 2 : i32
      %36 = arith.index_cast %35 : i32 to index
      %c0_14 = arith.constant 0 : index
      %c0_15 = arith.constant 0 : index
      %c0_16 = arith.constant 0 : index
      %37 = vector.load %arg6[%36, %c0_14, %c0_15, %c0_16] : memref<2x8x18x18xf32, #tpu.memory_space<vmem>>, vector<2x8x18x18xf32>
      tpu.vector_store %arg6[%36, %c0_14, %c0_15, %c0_16], %33 {strides = array<i32>} : memref<2x8x18x18xf32, #tpu.memory_space<vmem>>, vector<2x8x18x18xf32>,
      %c0_i32_17 = arith.constant 0 : i32
      %38 = arith.cmpi eq, %arg1, %c0_i32_17 : i32
      %39 = arith.extui %38 : i1 to i32
      %c0_i32_18 = arith.constant 0 : i32
      %40 = arith.cmpi ne, %39, %c0_i32_18 : i32
      scf.if %40 {
        %cst_34 = arith.constant 0.000000e+00 : f32
        %70 = vector.broadcast %cst_34 : f32 to vector<8x18xf32>
        %c0_35 = arith.constant 0 : index
        %c0_36 = arith.constant 0 : index
        %71 = vector.load %arg7[%c0_35, %c0_36] : memref<8x18xf32, #tpu.memory_space<vmem>>, vector<8x18xf32>
        tpu.vector_store %arg7[%c0_35, %c0_36], %70 {strides = array<i32>} : memref<8x18xf32, #tpu.memory_space<vmem>>, vector<8x18xf32>,
        %cst_37 = arith.constant 0.000000e+00 : f32
        %72 = vector.broadcast %cst_37 : f32 to vector<8x18xf32>
        %c0_38 = arith.constant 0 : index
        %c0_39 = arith.constant 0 : index
        %73 = vector.load %arg8[%c0_38, %c0_39] : memref<8x18xf32, #tpu.memory_space<vmem>>, vector<8x18xf32>
        tpu.vector_store %arg8[%c0_38, %c0_39], %72 {strides = array<i32>} : memref<8x18xf32, #tpu.memory_space<vmem>>, vector<8x18xf32>,
      } else {
      }
      %41 = tpu.iota {dimensions = array<i32: 0>} : vector<18x18xi32>
      %42 = tpu.iota {dimensions = array<i32: 1>} : vector<18x18xi32>
      %c1_i32_19 = arith.constant 1 : i32
      %43 = vector.broadcast %c1_i32_19 : i32 to vector<18x18xi32>
      %44 = arith.cmpi sge, %41, %43 : vector<18x18xi32>
      %c17_i32 = arith.constant 17 : i32
      %45 = vector.broadcast %c17_i32 : i32 to vector<18x18xi32>
      %46 = arith.cmpi slt, %41, %45 : vector<18x18xi32>
      %47 = arith.andi %44, %46 : vector<18x18xi1>
      %c1_i32_20 = arith.constant 1 : i32
      %48 = vector.broadcast %c1_i32_20 : i32 to vector<18x18xi32>
      %49 = arith.cmpi sge, %42, %48 : vector<18x18xi32>
      %50 = arith.andi %47, %49 : vector<18x18xi1>
      %c17_i32_21 = arith.constant 17 : i32
      %51 = vector.broadcast %c17_i32_21 : i32 to vector<18x18xi32>
      %52 = arith.cmpi slt, %42, %51 : vector<18x18xi32>
      %53 = arith.andi %50, %52 : vector<18x18xi1>
      %54 = vector.shape_cast %53 : vector<18x18xi1> to vector<1x1x18x18xi1>
      %cst = arith.constant 0.000000e+00 : f32
      %55 = vector.shape_cast %54 : vector<1x1x18x18xi1> to vector<1x1x18x18xi1>
      %56 = vector.broadcast %55 : vector<1x1x18x18xi1> to vector<2x8x18x18xi1>
      %57 = vector.broadcast %cst : f32 to vector<2x8x18x18xf32>
      %58 = arith.select %56, %33, %57 : vector<2x8x18x18xi1>, vector<2x8x18x18xf32>
      %c0_22 = arith.constant 0 : index
      %c0_23 = arith.constant 0 : index
      %59 = vector.load %arg7[%c0_22, %c0_23] : memref<8x18xf32, #tpu.memory_space<vmem>>, vector<8x18xf32>
      %cst_24 = arith.constant dense<0.000000e+00> : vector<8x18x18xf32>
      %60 = vector.multi_reduction <add>, %58, %cst_24 [0] : vector<2x8x18x18xf32> to vector<8x18x18xf32>
      %cst_25 = arith.constant dense<0.000000e+00> : vector<8x18xf32>
      %61 = vector.multi_reduction <add>, %60, %cst_25 [1] : vector<8x18x18xf32> to vector<8x18xf32>
      %62 = arith.addf %59, %61 : vector<8x18xf32>
      %c0_26 = arith.constant 0 : index
      %c0_27 = arith.constant 0 : index
      %63 = vector.load %arg7[%c0_26, %c0_27] : memref<8x18xf32, #tpu.memory_space<vmem>>, vector<8x18xf32>
      tpu.vector_store %arg7[%c0_26, %c0_27], %62 {strides = array<i32>} : memref<8x18xf32, #tpu.memory_space<vmem>>, vector<8x18xf32>,
      %c0_28 = arith.constant 0 : index
      %c0_29 = arith.constant 0 : index
      %64 = vector.load %arg8[%c0_28, %c0_29] : memref<8x18xf32, #tpu.memory_space<vmem>>, vector<8x18xf32>
      %65 = arith.mulf %58, %33 : vector<2x8x18x18xf32>
      %cst_30 = arith.constant dense<0.000000e+00> : vector<8x18x18xf32>
      %66 = vector.multi_reduction <add>, %65, %cst_30 [0] : vector<2x8x18x18xf32> to vector<8x18x18xf32>
      %cst_31 = arith.constant dense<0.000000e+00> : vector<8x18xf32>
      %67 = vector.multi_reduction <add>, %66, %cst_31 [1] : vector<8x18x18xf32> to vector<8x18xf32>
      %68 = arith.addf %64, %67 : vector<8x18xf32>
      %c0_32 = arith.constant 0 : index
      %c0_33 = arith.constant 0 : index
      %69 = vector.load %arg8[%c0_32, %c0_33] : memref<8x18xf32, #tpu.memory_space<vmem>>, vector<8x18xf32>
      tpu.vector_store %arg8[%c0_32, %c0_33], %68 {strides = array<i32>} : memref<8x18xf32, #tpu.memory_space<vmem>>, vector<8x18xf32>,
    } else {
    }
    %c1_i32 = arith.constant 1 : i32
    %3 = arith.cmpi eq, %arg0, %c1_i32 : i32
    %4 = arith.extui %3 : i1 to i32
    %c0_i32_1 = arith.constant 0 : i32
    %5 = arith.cmpi ne, %4, %c0_i32_1 : i32
    scf.if %5 {
      %c0_i32_2 = arith.constant 0 : i32
      %6 = arith.cmpi eq, %arg1, %c0_i32_2 : i32
      %7 = arith.extui %6 : i1 to i32
      %c0_i32_3 = arith.constant 0 : i32
      %8 = arith.cmpi ne, %7, %c0_i32_3 : i32
      scf.if %8 {
        %c0_23 = arith.constant 0 : index
        %c0_24 = arith.constant 0 : index
        %52 = vector.load %arg7[%c0_23, %c0_24] : memref<8x18xf32, #tpu.memory_space<vmem>>, vector<8x18xf32>
        %cst_25 = arith.constant dense<0.000000e+00> : vector<8xf32>
        %53 = vector.multi_reduction <add>, %52, %cst_25 [1] : vector<8x18xf32> to vector<8xf32>
        %54 = vector.shape_cast %53 : vector<8xf32> to vector<8x1xf32>
        %c0_26 = arith.constant 0 : index
        %c0_27 = arith.constant 0 : index
        %55 = vector.load %arg8[%c0_26, %c0_27] : memref<8x18xf32, #tpu.memory_space<vmem>>, vector<8x18xf32>
        %cst_28 = arith.constant dense<0.000000e+00> : vector<8xf32>
        %56 = vector.multi_reduction <add>, %55, %cst_28 [1] : vector<8x18xf32> to vector<8xf32>
        %57 = vector.shape_cast %56 : vector<8xf32> to vector<8x1xf32>
        %cst_29 = arith.constant 0.001953125 : f32
        %58 = vector.broadcast %cst_29 : f32 to vector<8x1xf32>
        %59 = arith.mulf %54, %58 : vector<8x1xf32>
        %cst_30 = arith.constant 0.001953125 : f32
        %60 = vector.broadcast %cst_30 : f32 to vector<8x1xf32>
        %61 = arith.mulf %57, %60 : vector<8x1xf32>
        %62 = arith.mulf %59, %59 : vector<8x1xf32>
        %63 = arith.subf %61, %62 : vector<8x1xf32>
        %cst_31 = arith.constant 0.000000e+00 : f32
        %64 = vector.broadcast %cst_31 : f32 to vector<8x1xf32>
        %65 = arith.maximumf %63, %64 : vector<8x1xf32>
        %c0_32 = arith.constant 0 : index
        %c4 = arith.constant 4 : index
        %66 = vector.load %arg4[%c0_32, %c4] : memref<8x8xf32, #tpu.memory_space<vmem>>, vector<8x1xf32>
        %c0_33 = arith.constant 0 : index
        %c6 = arith.constant 6 : index
        %67 = vector.load %arg4[%c0_33, %c6] : memref<8x8xf32, #tpu.memory_space<vmem>>, vector<8x1xf32>
        %cst_34 = arith.constant 9.99999974E-6 : f32
        %68 = vector.broadcast %cst_34 : f32 to vector<8x1xf32>
        %69 = arith.addf %65, %68 : vector<8x1xf32>
        %70 = math.rsqrt %69 : vector<8x1xf32>
        %71 = arith.mulf %66, %70 : vector<8x1xf32>
        %72 = arith.mulf %66, %66 : vector<8x1xf32>
        %73 = arith.mulf %72, %65 : vector<8x1xf32>
        %74 = arith.mulf %70, %70 : vector<8x1xf32>
        %75 = arith.mulf %73, %74 : vector<8x1xf32>
        %76 = arith.mulf %71, %67 : vector<8x1xf32>
        %cst_35 = arith.constant 9.99999974E-6 : f32
        %77 = vector.broadcast %cst_35 : f32 to vector<8x1xf32>
        %78 = arith.addf %75, %77 : vector<8x1xf32>
        %79 = math.rsqrt %78 : vector<8x1xf32>
        %80 = arith.mulf %76, %79 : vector<8x1xf32>
        %c0_36 = arith.constant 0 : index
        %c0_37 = arith.constant 0 : index
        %81 = vector.load %arg9[%c0_36, %c0_37] : memref<8x1xf32, #tpu.memory_space<vmem>>, vector<8x1xf32>
        tpu.vector_store %arg9[%c0_36, %c0_37], %59 {strides = array<i32>} : memref<8x1xf32, #tpu.memory_space<vmem>>, vector<8x1xf32>,
        %c0_38 = arith.constant 0 : index
        %c0_39 = arith.constant 0 : index
        %82 = vector.load %arg10[%c0_38, %c0_39] : memref<8x1xf32, #tpu.memory_space<vmem>>, vector<8x1xf32>
        tpu.vector_store %arg10[%c0_38, %c0_39], %71 {strides = array<i32>} : memref<8x1xf32, #tpu.memory_space<vmem>>, vector<8x1xf32>,
        %c0_40 = arith.constant 0 : index
        %c0_41 = arith.constant 0 : index
        %83 = vector.load %arg11[%c0_40, %c0_41] : memref<8x1xf32, #tpu.memory_space<vmem>>, vector<8x1xf32>
        tpu.vector_store %arg11[%c0_40, %c0_41], %80 {strides = array<i32>} : memref<8x1xf32, #tpu.memory_space<vmem>>, vector<8x1xf32>,
      } else {
      }
      %c2_i32 = arith.constant 2 : i32
      %9 = arith.muli %arg1, %c2_i32 : i32
      %10 = tpu.assume_multiple %9, 2 : i32
      %11 = arith.index_cast %10 : i32 to index
      %c0 = arith.constant 0 : index
      %c0_4 = arith.constant 0 : index
      %c0_5 = arith.constant 0 : index
      %12 = vector.load %arg6[%11, %c0, %c0_4, %c0_5] : memref<2x8x18x18xf32, #tpu.memory_space<vmem>>, vector<2x8x18x18xf32>
      %13 = vector.extract_strided_slice %12 {offsets = [0, 0, 1, 1], sizes = [2, 8, 16, 16], strides = [1, 1, 1, 1]} : vector<2x8x18x18xf32> to vector<2x8x16x16xf32>
      %c0_6 = arith.constant 0 : index
      %c0_7 = arith.constant 0 : index
      %14 = vector.load %arg9[%c0_6, %c0_7] : memref<8x1xf32, #tpu.memory_space<vmem>>, vector<8x1xf32>
      %15 = vector.shape_cast %14 : vector<8x1xf32> to vector<1x8x1x1xf32>
      %c0_8 = arith.constant 0 : index
      %c0_9 = arith.constant 0 : index
      %16 = vector.load %arg10[%c0_8, %c0_9] : memref<8x1xf32, #tpu.memory_space<vmem>>, vector<8x1xf32>
      %17 = vector.shape_cast %16 : vector<8x1xf32> to vector<1x8x1x1xf32>
      %c0_10 = arith.constant 0 : index
      %c0_11 = arith.constant 0 : index
      %18 = vector.load %arg11[%c0_10, %c0_11] : memref<8x1xf32, #tpu.memory_space<vmem>>, vector<8x1xf32>
      %19 = vector.shape_cast %18 : vector<8x1xf32> to vector<1x8x1x1xf32>
      %c0_12 = arith.constant 0 : index
      %c5 = arith.constant 5 : index
      %20 = vector.load %arg4[%c0_12, %c5] : memref<8x8xf32, #tpu.memory_space<vmem>>, vector<8x1xf32>
      %21 = vector.shape_cast %20 : vector<8x1xf32> to vector<1x8x1x1xf32>
      %c0_13 = arith.constant 0 : index
      %c7 = arith.constant 7 : index
      %22 = vector.load %arg4[%c0_13, %c7] : memref<8x8xf32, #tpu.memory_space<vmem>>, vector<8x1xf32>
      %23 = vector.shape_cast %22 : vector<8x1xf32> to vector<1x8x1x1xf32>
      %24 = vector.broadcast %15 : vector<1x8x1x1xf32> to vector<2x8x16x16xf32>
      %25 = arith.subf %13, %24 : vector<2x8x16x16xf32>
      %26 = vector.broadcast %17 : vector<1x8x1x1xf32> to vector<2x8x16x16xf32>
      %27 = arith.mulf %26, %25 : vector<2x8x16x16xf32>
      %28 = vector.broadcast %21 : vector<1x8x1x1xf32> to vector<2x8x16x16xf32>
      %29 = arith.addf %27, %28 : vector<2x8x16x16xf32>
      %30 = vector.broadcast %19 : vector<1x8x1x1xf32> to vector<2x8x16x16xf32>
      %31 = arith.mulf %30, %25 : vector<2x8x16x16xf32>
      %32 = vector.broadcast %23 : vector<1x8x1x1xf32> to vector<2x8x16x16xf32>
      %33 = arith.addf %31, %32 : vector<2x8x16x16xf32>
      %34 = arith.mulf %29, %33 : vector<2x8x16x16xf32>
      %cst = arith.constant 5.000000e-01 : f32
      %35 = vector.broadcast %cst : f32 to vector<2x8x16x16xf32>
      %36 = arith.mulf %35, %34 : vector<2x8x16x16xf32>
      %37 = math.tanh %36 : vector<2x8x16x16xf32>
      %cst_14 = arith.constant 1.000000e+00 : f32
      %38 = vector.broadcast %cst_14 : f32 to vector<2x8x16x16xf32>
      %39 = arith.addf %37, %38 : vector<2x8x16x16xf32>
      %cst_15 = arith.constant 5.000000e-01 : f32
      %40 = vector.broadcast %cst_15 : f32 to vector<2x8x16x16xf32>
      %41 = arith.mulf %40, %39 : vector<2x8x16x16xf32>
      %42 = arith.mulf %34, %41 : vector<2x8x16x16xf32>
      %cst_16 = arith.constant 5.000000e-01 : f32
      %43 = vector.broadcast %cst_16 : f32 to vector<2x8x16x16xf32>
      %44 = arith.mulf %43, %42 : vector<2x8x16x16xf32>
      %45 = math.tanh %44 : vector<2x8x16x16xf32>
      %cst_17 = arith.constant 1.000000e+00 : f32
      %46 = vector.broadcast %cst_17 : f32 to vector<2x8x16x16xf32>
      %47 = arith.addf %45, %46 : vector<2x8x16x16xf32>
      %cst_18 = arith.constant 5.000000e-01 : f32
      %48 = vector.broadcast %cst_18 : f32 to vector<2x8x16x16xf32>
      %49 = arith.mulf %48, %47 : vector<2x8x16x16xf32>
      %50 = arith.mulf %42, %49 : vector<2x8x16x16xf32>
      %c0_19 = arith.constant 0 : index
      %c0_20 = arith.constant 0 : index
      %c0_21 = arith.constant 0 : index
      %c0_22 = arith.constant 0 : index
      %51 = vector.load %arg5[%c0_19, %c0_20, %c0_21, %c0_22] : memref<2x8x16x16xf32, #tpu.memory_space<vmem>>, vector<2x8x16x16xf32>
      tpu.vector_store %arg5[%c0_19, %c0_20, %c0_21, %c0_22], %50 {strides = array<i32>} : memref<2x8x16x16xf32, #tpu.memory_space<vmem>>, vector<2x8x16x16xf32>,
    } else {
    }
    return
  }
  func.func @transform_0(%arg0: i32, %arg1: i32) -> (i32, i32, i32, i32) {
    %c1_i32 = arith.constant 1 : i32
    %0 = arith.subi %c1_i32, %arg0 : i32
    %1 = arith.muli %0, %arg1 : i32
    %c0_i32 = arith.constant 0 : i32
    %2 = arith.muli %arg0, %c0_i32 : i32
    %3 = arith.addi %1, %2 : i32
    %c0_i32_0 = arith.constant 0 : i32
    %c0_i32_1 = arith.constant 0 : i32
    %c0_i32_2 = arith.constant 0 : i32
    %c0_i32_3 = arith.constant 0 : i32
    return %3, %c0_i32_0, %c0_i32_1, %c0_i32_2 : i32, i32, i32, i32
  }
  func.func @transform_1(%arg0: i32, %arg1: i32) -> (i32, i32, i32, i32) {
    %c1_i32 = arith.constant 1 : i32
    %0 = arith.subi %c1_i32, %arg0 : i32
    %1 = arith.muli %0, %arg1 : i32
    %c0_i32 = arith.constant 0 : i32
    %2 = arith.muli %arg0, %c0_i32 : i32
    %3 = arith.addi %1, %2 : i32
    %c0_i32_0 = arith.constant 0 : i32
    %c0_i32_1 = arith.constant 0 : i32
    %c0_i32_2 = arith.constant 0 : i32
    %c0_i32_3 = arith.constant 0 : i32
    return %3, %c0_i32_0, %c0_i32_1, %c0_i32_2 : i32, i32, i32, i32
  }
  func.func @transform_2(%arg0: i32, %arg1: i32) -> (i32, i32) {
    %c0_i32 = arith.constant 0 : i32
    %c0_i32_0 = arith.constant 0 : i32
    %c0_i32_1 = arith.constant 0 : i32
    return %c0_i32, %c0_i32_0 : i32, i32
  }
  func.func @transform_3(%arg0: i32, %arg1: i32) -> (i32, i32, i32, i32) {
    %0 = arith.muli %arg0, %arg1 : i32
    %c0_i32 = arith.constant 0 : i32
    %c0_i32_0 = arith.constant 0 : i32
    %c0_i32_1 = arith.constant 0 : i32
    %c0_i32_2 = arith.constant 0 : i32
    return %0, %c0_i32, %c0_i32_0, %c0_i32_1 : i32, i32, i32, i32
  }
}

</mosaic_0001>

<bundles_post_ra>
// kernel: model_forward.1
= control target key start
LH: loop header
LB: loop body
LE: loop exit
PB: predicated region body
PF: predicated region fallthrough
CT: control target
= control target key end

     0   :  { %8 = vsyncpa [#allocation9], 0  ;;  %s6080_s0 = inlined_call_operand.vmem [shape: f32[2,3,18,18], index: 0, kind: input, shape index: {}]   ;;  %s6081_s1 = inlined_call_operand.vmem [shape: f32[2,1,18,18], index: 1, kind: input, shape index: {}]   ;;  %s6082_s2 = inlined_call_operand.vmem [shape: f32[8,8], index: 2, kind: input, shape index: {}]   ;;  %s6083_s3 = inlined_call_operand.hbm [shape: f32[2,8,16,16], index: 3, kind: output, shape index: {}]  }
   0x1   :  { %10 = vsyncpa [#allocation9 + $0x1], 0  ;;  %s3728_s12 = smov 0   ;;  %s3730_s13 = smov 0  }
   0x2   :  { %s3732_s14 = smov 0  }
   0x3 LB: > { %s3322_s15 = sadd.s32 4294967295, %s3690_s14   ;;  %s3323_s16 = sadd.s32 4294967294, %s3690_s14   ;;  %s3690_s14 = sphi %s3732_s14, %s16_s14   ;;  %s3686_s13 = sphi %s3730_s13, %s6400_s13   ;;  %s3682_s12 = sphi %s3728_s12, %s6399_s12  }
   0x4   : > { %s28_s17 = sadd.s32 1, %s3686_s13  ;;  %p3328_p0 = scmp.ge.s32.totalorder %s3690_s14, 1 }
   0x5   : > { %p30_p1 = scmp.ge.s32.totalorder %s28_s17, 2  ;;  %p184_p2 = scmp.lt.s32.totalorder %s3690_s14, 3 }
   0x7   : > { %s6402_s17 = smov (%p30_p1, %s28_s17), 0  ;;  %p185_p3 = pnand %p3328_p0, %p184_p2 }
   0x8   : > { %p3329_p4 = scmp.ne.s32.totalorder (!%p185_p3), %s3682_s12, 0 }
   0x9   : > { %188 = sbr.rel (%p185_p3) target bundleno = 1144 (0x478), region = 32 }
   0xe   : > { %246 = sbr.rel (%p3329_p4) target bundleno = 374 (0x176), region = 36 }
  0x13   : > { %v277_v0 = vlaneseq  ;;  %v3692_v1 = vmov 0   ;;  %v3693_v2 = vmov 3   ;;  %v3694_v3 = vmov 1966171168   ;;  %v434_v6 = vld [vmem:[%s6082_s2] sm:$0xff]  ;;  %v3807_v40 = vld [vmem:[%s6080_s0 + $0x8] sm:$0xff] }
  0x14   : > { %3387 = vset.pattern.permute.xlu1 %v3692_v1  ;;  %3386 = vset.pattern.permute.xlu0 %v3693_v2  ;;  %v275_v4 = vunpack.c.l.s4 %v3694_v3  ;;  %v436_v8 = vcombine.high %v434_v6, %v434_v6  ;;  %v3695_v21 = vmov 1   ;;  %v3696_v32 = vmov 2   ;;  %v3802_v39 = vld [vmem:[%s6080_s0] sm:$0xff]  ;;  %v3812_v41 = vld [vmem:[%s6080_s0 + $0x10] sm:$0x3]  ;;  %v3817_v42 = vld [vmem:[%s6080_s0 + $0x48] sm:$0xff] }
  0x15   : > { %v278_v5 = vshrl.u32 %v277_v0, 7  ;;  %v3768_v31 = vand.u32 127, %v277_v0  ;;  %v6127_v33 = vmov 0  ;;  %v6130_v34 = vmov 0  ;;  %v3822_v43 = vld [vmem:[%s6080_s0 + $0x50] sm:$0xff]  ;;  %v3827_v44 = vld [vmem:[%s6081_s1] sm:$0xff] }
  0x16   : > { %v276_v7 = vunpack.c.0.s8 %v275_v4  ;;  %v3832_v45 = vld [vmem:[%s6081_s1 + $0x8] sm:$0xff]  ;;  %v3837_v46 = vld [vmem:[%s6081_s1 + $0x10] sm:$0x3]  ;;  %v3842_v47 = vld [vmem:[%s6081_s1 + $0x18] sm:$0xff]  ;;  %vm1070_vm8 = vcmask 146432   ;;  %vm1073_vm9 = vcmask 140288  }
  0x17   : > { %v3756_v10 = vsub.s32 0, %v278_v5  ;;  %v1129_v30 = vadd.s32 16, %v278_v5  ;;  %vm1132_vm0 = vcmp.ge.s32.totalorder %v278_v5, 1  ;;  %vm1141_vm2 = vcmp.ge.s32.totalorder %v3768_v31, 1  ;;  %v3847_v49 = vld [vmem:[%s6080_s0 + $0x58] sm:$0x3] }
  0x18   : > { %v279_v9 = vsub.s32 %v276_v7, %v278_v5  ;;  %vm1145_vm3 = vcmp.lt.s32.totalorder %v3768_v31, 17  ;;  %vm1142_vm4 = vmand %vm1132_vm0, %vm1141_vm2  ;;  %v3852_v50 = vld [vmem:[%s6081_s1 + $0x20] sm:$0xff]  ;;  %v3857_v51 = vld [vmem:[%s6081_s1 + $0x28] sm:$0x3]  ;;  %vm1372_vm11 = vcmask 1041409   ;;  %vm1374_vm12 = vcmask 1042434  }
  0x19   : > { %vm1137_vm1 = vcmp.lt.s32.totalorder %v1129_v30, 17  ;;  %vm3779_vm6 = vmand %vm1142_vm4, %vm1145_vm3  ;;  %v3879_v3 = vld [vmem:[%s6080_s0 + $0x20] sm:$0xff]  ;;  %v3884_v4 = vld [vmem:[%s6080_s0 + $0x28] sm:$0x3]  ;;  %vm1376_vm13 = vcmask 1043459   ;;  %vm1378_vm14 = vcmask 1044484  }
  0x1a   : > { %v443_v11 = vrot.slane %v434_v6, %v279_v9  ;;  %v287_v12 = vrot.slane %v436_v8, %v279_v9  ;;  %vm1144_vm5 = vmand %vm1137_vm1, %vm1141_vm2  ;;  %v6128_v33 = vsel %vm3779_vm6, 4294967295, %v6127_v33  ;;  %6134 = vst [vmem:[#allocation14_spill] sm:$0xff] %v3879_v3  ;;  %v3889_v5 = vld [vmem:[%s6080_s0 + $0x60] sm:$0xff]  ;;  %v3894_v6 = vld [vmem:[%s6080_s0 + $0x68] sm:$0xff]  ;;  %vm1380_vm15 = vcmask 1045509  }
  0x1b   : > { %6129 = vst [vmem:[#allocation11_spill] sm:$0xff] %v6128_v33  ;;  %vm3785_vm7 = vmand %vm1144_vm5, %vm1145_vm3  ;;  %v3899_v7 = vld [vmem:[%s6080_s0 + $0x70] sm:$0x3]  ;;  %vm1382_vm0 = vcmask 1046534   ;;  %vm1384_vm1 = vcmask 1047559  }
  0x1c   : > { %v459_v13 = vrot.slane %v443_v11, %v279_v9  ;;  %v451_v14 = vcombine.high %v443_v11, %v443_v11  ;;  %v303_v15 = vrot.slane %v287_v12, %v279_v9  ;;  %v289_v20 = vcombine.high %v287_v12, %v287_v12  ;;  %6135 = vst [vmem:[#allocation15_spill] sm:$0xff] %v3884_v4  ;;  %vm4137_vm10 = vmand %vm1141_vm2, %vm1145_vm3 }
  0x1d   : > { %v6131_v34 = vsel %vm3785_vm7, 4294967295, %v6130_v34  ;;  %6136 = vst [vmem:[#allocation16_spill] sm:$0xff] %v3889_v5  ;;  %6137 = vst [vmem:[#allocation17_spill] sm:$0xff] %v3894_v6 }
  0x1e   : > { %v488_v16 = vrot.slane %v459_v13, %v3756_v10  ;;  %v341_v17 = vrot.slane %v303_v15, %v3756_v10  ;;  %v310_v18 = vrot.slane %v451_v14, %v279_v9  ;;  %v481_v19 = vcombine.high %v459_v13, %v459_v13  ;;  %6132 = vst [vmem:[#allocation12_spill] sm:$0xff] %v6131_v34 }
  0x1f   : > { %v319_v23 = vcombine.high %v303_v15, %v303_v15  ;;  %v317_v25 = vrot.slane %v289_v20, %v279_v9  ;;  %6138 = vst [vmem:[#allocation18_spill] sm:$0xff] %v3899_v7 }
  0x20   : > { %518 = vperm.xlu1 %3387, %v488_v16   ;;  %355 = vperm.xlu0 %3386, %v488_v16   ;;  %v329_v22 = vrot.slane %v310_v18, %v3756_v10  ;;  %v333_v24 = vrot.slane %v481_v19, %v3756_v10  ;;  %v320_v28 = vcombine.high %v310_v18, %v310_v18 }
  0x21   : > { %v349_v26 = vrot.slane %v319_v23, %v3756_v10  ;;  %v345_v27 = vrot.slane %v317_v25, %v3756_v10  ;;  %v484_v35 = vcombine.high %v317_v25, %v317_v25 }
  0x22   : > { %v337_v29 = vrot.slane %v320_v28, %v3756_v10 }
  0x23   : > { %v516_v36 = vrot.slane %v484_v35, %v3756_v10 }
  0x24   : > { %3388 = vset.pattern.permute.xlu1 %v3695_v21  ;;  %371 = vperm.xlu0 %3386, %v341_v17  }
  0x25   : > { %729 = vperm.xlu1 %3388, %v488_v16  }
  0x28   : > { %359 = vperm.xlu0 %3386, %v329_v22  }
  0x29   : > { %3389 = vset.pattern.permute.xlu1 %v3693_v2 }
  0x2a   : > { %363 = vperm.xlu1 %3389, %v333_v24  }
  0x2c   : > { %379 = vperm.xlu0 %3386, %v349_v26  }
  0x2e   : > { %375 = vperm.xlu1 %3389, %v345_v27  }
  0x30   : > { %3393 = vset.pattern.permute.xlu0 %v3695_v21 }
  0x31   : > { %737 = vperm.xlu0 %3393, %v333_v24  }
  0x32   : > { %367 = vperm.xlu1 %3389, %v337_v29  }
  0x35   : > { %741 = vperm.xlu0 %3393, %v337_v29  }
  0x36   : > { %3390 = vset.pattern.permute.xlu1 %v3695_v21 }
  0x37   : > { %733 = vperm.xlu1 %3390, %v329_v22  }
  0x39   : > { %3396 = vset.pattern.permute.xlu0 %v3696_v32 }
  0x3a   : > { %892 = vperm.xlu0 %3396, %v488_v16  }
  0x3b   : > { %3391 = vset.pattern.permute.xlu1 %v3696_v32 }
  0x3c   : > { %896 = vperm.xlu1 %3391, %v329_v22  }
  0x3e   : > { %912 = vperm.xlu0 %3396, %v345_v27  }
  0x40   : > { %3392 = vset.pattern.permute.xlu1 %v3692_v1 }
  0x41   : > { %526 = vperm.xlu1 %3392, %v333_v24  }
  0x42   : > { %916 = vperm.xlu0 %3396, %v349_v26  }
  0x45   : > { %3394 = vset.pattern.permute.xlu1 %v3696_v32 }
  0x46   : > { %3403 = vset.pattern.permute.xlu0 %v3692_v1  ;;  %900 = vperm.xlu1 %3394, %v333_v24  }
  0x47   : > { %522 = vperm.xlu0 %3403, %v329_v22  }
  0x4a   : > { %3395 = vset.pattern.permute.xlu1 %v3692_v1 }
  0x4b   : > { %534 = vperm.xlu0 %3403, %v341_v17   ;;  %530 = vperm.xlu1 %3395, %v337_v29  }
  0x4f   : > { %538 = vperm.xlu0 %3403, %v345_v27   ;;  %3397 = vset.pattern.permute.xlu1 %v3696_v32 }
  0x50   : > { %904 = vperm.xlu1 %3397, %v337_v29  }
  0x53   : > { %546 = vperm.xlu0 %3403, %v516_v36  }
  0x54   : > { %3398 = vset.pattern.permute.xlu1 %v3695_v21 }
  0x55   : > { %745 = vperm.xlu1 %3398, %v341_v17  }
  0x57   : > { %3407 = vset.pattern.permute.xlu0 %v3696_v32 }
  0x59   : > { %3399 = vset.pattern.permute.xlu1 %v3696_v32 }
  0x5a   : > { %908 = vperm.xlu1 %3399, %v341_v17  }
  0x5e   : > { %3400 = vset.pattern.permute.xlu1 %v3695_v21 }
  0x5f   : > { %749 = vperm.xlu1 %3400, %v345_v27  }
  0x63   : > { %3401 = vset.pattern.permute.xlu1 %v3692_v1 }
  0x64   : > { %542 = vperm.xlu1 %3401, %v349_v26  }
  0x68   : > { %3402 = vset.pattern.permute.xlu1 %v3695_v21 }
  0x69   : > { %753 = vperm.xlu1 %3402, %v349_v26  }
  0x6d   : > { %3404 = vset.pattern.permute.xlu1 %v3693_v2  ;;  %v3874_v2 = vld [vmem:[%s6080_s0 + $0x18] sm:$0xff] }
  0x6e   : > { %383 = vperm.xlu1 %3404, %v516_v36   ;;  %6133 = vst [vmem:[#allocation13_spill] sm:$0xff] %v3874_v2 }
  0x72   : > { %3405 = vset.pattern.permute.xlu1 %v3695_v21 }
  0x73   : > { %757 = vperm.xlu1 %3405, %v516_v36  }
  0x77   : > { %3406 = vset.pattern.permute.xlu1 %v3696_v32 }
  0x78   : > { %920 = vperm.xlu1 %3406, %v516_v36  }
  0x9b   : > { %v519_v37 = vpop.permute.xlu1 %518  ;;  %v356_v38 = vpop.permute.xlu0 %355 }
  0x9c   : > { %v549_v53 = vmul.f32 %v519_v37, %v3802_v39  ;;  %v550_v54 = vmul.f32 %v519_v37, %v3807_v40  ;;  %v551_v55 = vmul.f32 %v519_v37, %v3812_v41  ;;  %v573_v56 = vmul.f32 %v519_v37, %v3817_v42 }
  0x9d   : > { %v386_v57 = vmul.f32 %v356_v38, %v3827_v44  ;;  %v387_v58 = vmul.f32 %v356_v38, %v3832_v45  ;;  %v388_v59 = vmul.f32 %v356_v38, %v3837_v46  ;;  %v410_v60 = vmul.f32 %v356_v38, %v3842_v47 }
  0x9e   : > { %v574_v61 = vmul.f32 %v519_v37, %v3822_v43  ;;  %v575_v62 = vmul.f32 %v519_v37, %v3847_v49  ;;  %v411_v63 = vmul.f32 %v356_v38, %v3852_v50  ;;  %v412_v0 = vmul.f32 %v356_v38, %v3857_v51 }
  0x9f   : > { %v372_v48 = vpop.permute.xlu0 %371  ;;  %v3901_v9 = vadd.f32 %v549_v53, %v386_v57  ;;  %v3903_v10 = vadd.f32 %v550_v54, %v387_v58  ;;  %v3905_v11 = vadd.f32 %v551_v55, %v388_v59  ;;  %v3907_v12 = vadd.f32 %v573_v56, %v410_v60 }
  0xa0   : > { %v730_v52 = vpop.permute.xlu1 %729  ;;  %v3909_v13 = vadd.f32 %v574_v61, %v411_v63  ;;  %v3911_v14 = vadd.f32 %v575_v62, %v412_v0  ;;  %v3932_v22 = vmul.f32 %v372_v48, %v3827_v44  ;;  %v3935_v23 = vmul.f32 %v372_v48, %v3832_v45 }
  0xa1   : > { %v3914_v15 = vmul.f32 %v730_v52, %v3874_v2  ;;  %v3917_v16 = vmul.f32 %v730_v52, %v3879_v3  ;;  %v3920_v18 = vmul.f32 %v730_v52, %v3884_v4  ;;  %v3923_v19 = vmul.f32 %v730_v52, %v3889_v5 }
  0xa2   : > { %v3926_v20 = vmul.f32 %v730_v52, %v3894_v6  ;;  %v3929_v21 = vmul.f32 %v730_v52, %v3899_v7  ;;  %6139 = vst [vmem:[#allocation19_spill] sm:$0xff] %v3932_v22  ;;  %6140 = vst [vmem:[#allocation20_spill] sm:$0xff] %v3935_v23  ;;  %v3938_v24 = vmul.f32 %v372_v48, %v3837_v46 }
  0xa3   : > { %v360_v1 = vpop.permute.xlu0 %359  ;;  %v3941_v25 = vmul.f32 %v372_v48, %v3842_v47  ;;  %v3944_v27 = vmul.f32 %v372_v48, %v3852_v50  ;;  %v3947_v28 = vmul.f32 %v372_v48, %v3857_v51 }
  0xa4   : > { %6141 = vst [vmem:[#allocation21_spill] sm:$0xff] %v3938_v24  ;;  %v3950_v29 = vmul.f32 %v360_v1, %v3827_v44  ;;  %v3953_v30 = vmul.f32 %v360_v1, %v3832_v45  ;;  %v3956_v32 = vmul.f32 %v360_v1, %v3837_v46  ;;  %v3959_v35 = vmul.f32 %v360_v1, %v3842_v47 }
  0xa5   : > { %v364_v8 = vpop.permute.xlu1 %363  ;;  %6142 = vst [vmem:[#allocation22_spill] sm:$0xff] %v3941_v25  ;;  %6143 = vst [vmem:[#allocation23_spill] sm:$0xff] %v3944_v27  ;;  %v3962_v36 = vmul.f32 %v360_v1, %v3852_v50  ;;  %v3965_v37 = vmul.f32 %v360_v1, %v3857_v51 }
  0xa6   : > { %6144 = vst [vmem:[#allocation24_spill] sm:$0xff] %v3947_v28  ;;  %6145 = vst [vmem:[#allocation25_spill] sm:$0xff] %v3950_v29  ;;  %v3968_v38 = vmul.f32 %v364_v8, %v3827_v44  ;;  %v3971_v48 = vmul.f32 %v364_v8, %v3832_v45  ;;  %v3974_v52 = vmul.f32 %v364_v8, %v3837_v46 }
  0xa7   : > { %v380_v17 = vpop.permute.xlu0 %379  ;;  %6146 = vst [vmem:[#allocation26_spill] sm:$0xff] %v3953_v30  ;;  %6147 = vst [vmem:[#allocation27_spill] sm:$0xff] %v3956_v32  ;;  %v3977_v53 = vmul.f32 %v364_v8, %v3842_v47  ;;  %v3980_v55 = vmul.f32 %v364_v8, %v3852_v50  ;;  %v3983_v56 = vmul.f32 %v364_v8, %v3857_v51 }
  0xa8   : > { %6148 = vst [vmem:[#allocation28_spill] sm:$0xff] %v3959_v35  ;;  %6149 = vst [vmem:[#allocation29_spill] sm:$0xff] %v3962_v36  ;;  %v3986_v57 = vmul.f32 %v380_v17, %v3827_v44  ;;  %v3989_v58 = vmul.f32 %v380_v17, %v3832_v45  ;;  %v3992_v60 = vmul.f32 %v380_v17, %v3837_v46 }
  0xa9   : > { %v376_v26 = vpop.permute.xlu1 %375  ;;  %6150 = vst [vmem:[#allocation30_spill] sm:$0xff] %v3965_v37  ;;  %v3995_v61 = vmul.f32 %v380_v17, %v3842_v47  ;;  %v3998_v62 = vmul.f32 %v380_v17, %v3852_v50  ;;  %v4001_v63 = vmul.f32 %v380_v17, %v3857_v51 }
  0xaa   : > { %6151 = vst [vmem:[#allocation31_spill] sm:$0xff] %v3986_v57  ;;  %6152 = vst [vmem:[#allocation32_spill] sm:$0xff] %v3989_v58  ;;  %v4004_v0 = vmul.f32 %v376_v26, %v3827_v44  ;;  %v4007_v1 = vmul.f32 %v376_v26, %v3832_v45  ;;  %v4010_v8 = vmul.f32 %v376_v26, %v3837_v46 }
  0xab   : > { %6153 = vst [vmem:[#allocation33_spill] sm:$0xff] %v3992_v60  ;;  %6154 = vst [vmem:[#allocation34_spill] sm:$0xff] %v3995_v61  ;;  %v4013_v60 = vmul.f32 %v376_v26, %v3842_v47  ;;  %v4016_v61 = vmul.f32 %v376_v26, %v3852_v50 }
  0xac   : > { %v738_v54 = vpop.permute.xlu0 %737  ;;  %6155 = vst [vmem:[#allocation35_spill] sm:$0xff] %v3998_v62  ;;  %6156 = vst [vmem:[#allocation36_spill] sm:$0xff] %v4001_v63  ;;  %v4019_v62 = vmul.f32 %v376_v26, %v3857_v51 }
  0xad   : > { %v368_v59 = vpop.permute.xlu1 %367  ;;  %6157 = vst [vmem:[#allocation37_spill] sm:$0xff] %v4004_v0  ;;  %6158 = vst [vmem:[#allocation38_spill] sm:$0xff] %v4007_v1  ;;  %v4022_v17 = vmul.f32 %v738_v54, %v3874_v2  ;;  %v4025_v63 = vmul.f32 %v738_v54, %v3879_v3  ;;  %v4028_v57 = vmul.f32 %v738_v54, %v3884_v4 }
  0xae   : > { %6159 = vst [vmem:[#allocation39_spill] sm:$0xff] %v4010_v8  ;;  %6160 = vst [vmem:[#allocation40_spill] sm:$0xff] %v4013_v60  ;;  %v4031_v8 = vmul.f32 %v738_v54, %v3889_v5  ;;  %v4034_v60 = vmul.f32 %v738_v54, %v3894_v6  ;;  %v4040_v26 = vmul.f32 %v368_v59, %v3827_v44 }
  0xaf   : > { %6161 = vst [vmem:[#allocation41_spill] sm:$0xff] %v4016_v61  ;;  %6162 = vst [vmem:[#allocation42_spill] sm:$0xff] %v4019_v62  ;;  %v4037_v61 = vmul.f32 %v738_v54, %v3899_v7  ;;  %v4043_v62 = vmul.f32 %v368_v59, %v3832_v45  ;;  %v4046_v1 = vmul.f32 %v368_v59, %v3837_v46  ;;  %v4054_v54 = vld [vmem:[%s6080_s0 + $0x30] sm:$0xff] }
  0xb0   : > { %v742_v58 = vpop.permute.xlu0 %741  ;;  %6164 = vst [vmem:[#allocation44_spill] sm:$0xff] %v4040_v26  ;;  %v4049_v0 = vmul.f32 %v368_v59, %v3842_v47  ;;  %v4057_v27 = vmul.f32 %v368_v59, %v3852_v50  ;;  %v4060_v44 = vmul.f32 %v368_v59, %v3857_v51  ;;  %v4071_v47 = vld [vmem:[%s6080_s0 + $0x38] sm:$0xff] }
  0xb1   : > { %6163 = vst [vmem:[#allocation43_spill] sm:$0xff] %v4037_v61  ;;  %6165 = vst [vmem:[#allocation45_spill] sm:$0xff] %v4043_v62  ;;  %v4063_v45 = vmul.f32 %v742_v58, %v3874_v2  ;;  %v4066_v46 = vmul.f32 %v742_v58, %v3879_v3  ;;  %v4081_v50 = vld [vmem:[%s6080_s0 + $0x78] sm:$0xff]  ;;  %v4084_v51 = vmul.f32 %v742_v58, %v3884_v4 }
  0xb2   : > { %6166 = vst [vmem:[#allocation46_spill] sm:$0xff] %v4046_v1  ;;  %6167 = vst [vmem:[#allocation47_spill] sm:$0xff] %v4049_v0  ;;  %v734_v28 = vpop.permute.xlu1 %733  ;;  %v4076_v0 = vld [vmem:[%s6080_s0 + $0x40] sm:$0x3]  ;;  %v4087_v59 = vmul.f32 %v742_v58, %v3889_v5 }
  0xb3   : > { %6168 = vst [vmem:[#allocation48_spill] sm:$0xff] %v4057_v27  ;;  %6169 = vst [vmem:[#allocation49_spill] sm:$0xff] %v4060_v44  ;;  %v4098_v44 = vld [vmem:[%s6080_s0 + $0x80] sm:$0xff]  ;;  %v4103_v27 = vld [vmem:[%s6080_s0 + $0x88] sm:$0x3] }
  0xb4   : > { %6170 = vst [vmem:[#allocation50_spill] sm:$0xff] %v4063_v45  ;;  %6171 = vst [vmem:[#allocation51_spill] sm:$0xff] %v4066_v46  ;;  %v4090_v46 = vmul.f32 %v742_v58, %v3894_v6  ;;  %v4093_v45 = vmul.f32 %v742_v58, %v3899_v7  ;;  %v4115_v58 = vmul.f32 %v734_v28, %v3889_v5 }
  0xb5   : > { %6172 = vst [vmem:[#allocation52_spill] sm:$0xff] %v4084_v51  ;;  %6173 = vst [vmem:[#allocation53_spill] sm:$0xff] %v4087_v59  ;;  %v4106_v51 = vmul.f32 %v734_v28, %v3874_v2  ;;  %v4109_v59 = vmul.f32 %v734_v28, %v3879_v3  ;;  %v4122_v2 = vmul.f32 %v734_v28, %v3894_v6 }
  0xb6   : > { %6174 = vst [vmem:[#allocation54_spill] sm:$0xff] %v4090_v46  ;;  %6175 = vst [vmem:[#allocation55_spill] sm:$0xff] %v4093_v45  ;;  %v4112_v46 = vmul.f32 %v734_v28, %v3884_v4  ;;  %v893_v45 = vpop.permute.xlu0 %892  ;;  %v4125_v3 = vmul.f32 %v734_v28, %v3899_v7  ;;  %v6176_v28 = vmov 0 }
  0xb7   : > { %v923_v1 = vmul.f32 %v893_v45, %v4054_v54  ;;  %v924_v62 = vmul.f32 %v893_v45, %v4071_v47  ;;  %v925_v26 = vmul.f32 %v893_v45, %v4076_v0  ;;  %v947_v25 = vmul.f32 %v893_v45, %v4081_v50  ;;  %v897_v24 = vpop.permute.xlu1 %896 }
  0xb8   : > { %v948_v4 = vmul.f32 %v893_v45, %v4098_v44  ;;  %v949_v5 = vmul.f32 %v893_v45, %v4103_v27  ;;  %v6177_v28 = vsel %vm4137_vm10, 4294967295, %v6176_v28 }
  0xb9   : > { %v971_v23 = vadd.f32 %v923_v1, %v3914_v15  ;;  %v972_v22 = vadd.f32 %v924_v62, %v3917_v16  ;;  %v973_v37 = vadd.f32 %v925_v26, %v3920_v18  ;;  %v995_v36 = vadd.f32 %v947_v25, %v3923_v19  ;;  %6178 = vst [vmem:[#allocation56_spill] sm:$0xff] %v6177_v28 }
  0xba   : > { %v996_v7 = vadd.f32 %v948_v4, %v3926_v20  ;;  %v997_v45 = vadd.f32 %v949_v5, %v3929_v21  ;;  %v926_v15 = vmul.f32 %v897_v24, %v4054_v54  ;;  %v927_v16 = vmul.f32 %v897_v24, %v4071_v47 }
  0xbb   : > { %v1019_v18 = vadd.f32 %v971_v23, %v3901_v9  ;;  %v1020_v19 = vadd.f32 %v972_v22, %v3903_v10  ;;  %v1021_v25 = vadd.f32 %v973_v37, %v3905_v11  ;;  %v1043_v31 = vadd.f32 %v995_v36, %v3907_v12 }
  0xbc   : > { %v1044_v62 = vadd.f32 %v996_v7, %v3909_v13  ;;  %v1045_v1 = vadd.f32 %v997_v45, %v3911_v14  ;;  %v928_v4 = vmul.f32 %v897_v24, %v4076_v0  ;;  %v950_v5 = vmul.f32 %v897_v24, %v4081_v50 }
  0xbd   : > { %1071 = vst.msk [vmem:[#allocation2] sm:$0xff] %vm1070_vm8, %v1019_v18  ;;  %1072 = vst.msk [vmem:[#allocation2 + $0x8] sm:$0xff] %vm1070_vm8, %v1020_v19  ;;  %v1155_v9 = vsel %vm3779_vm6, %v1019_v18, 0.0  ;;  %v1156_v7 = vsel %vm4137_vm10, %v1020_v19, 0.0  ;;  %v1157_v10 = vsel %vm3785_vm7, %v1021_v25, 0.0  ;;  %v1179_v11 = vsel %vm3779_vm6, %v1043_v31, 0.0 }
  0xbe   : > { %1074 = vst.msk [vmem:[#allocation2 + $0x10] sm:$0x3] %vm1073_vm9, %v1021_v25  ;;  %1098 = vst.msk [vmem:[#allocation2 + $0xd0] sm:$0x3] %vm1073_vm9, %v1045_v1  ;;  %v1180_v12 = vsel %vm4137_vm10, %v1044_v62, 0.0  ;;  %v1181_v13 = vsel %vm3785_vm7, %v1045_v1, 0.0  ;;  %v1390_v45 = vmul.f32 %v1155_v9, %v1019_v18  ;;  %v1391_v6 = vmul.f32 %v1156_v7, %v1020_v19 }
  0xbf   : > { %1096 = vst.msk [vmem:[#allocation2 + $0xc0] sm:$0xff] %vm1070_vm8, %v1043_v31  ;;  %1097 = vst.msk [vmem:[#allocation2 + $0xc8] sm:$0xff] %vm1070_vm8, %v1044_v62  ;;  %v1204_v14 = vsel %vm1070_vm8, %v1155_v9, 0.0  ;;  %v1205_v20 = vsel %vm1070_vm8, %v1179_v11, 0.0  ;;  %v1207_v22 = vsel %vm1070_vm8, %v1156_v7, 0.0  ;;  %v1208_v23 = vsel %vm1070_vm8, %v1180_v12, 0.0 }
  0xc0   : > { %v1206_v21 = vadd.f32 %v1205_v20, %v1204_v14  ;;  %v1210_v36 = vsel %vm1073_vm9, %v1157_v10, 0.0  ;;  %v1209_v37 = vadd.f32 %v1208_v23, %v1207_v22  ;;  %v1211_v26 = vsel %vm1073_vm9, %v1181_v13, 0.0 }
  0xc1   : > { %v1212_v35 = vadd.f32 %v1211_v26, %v1210_v36  ;;  %v1392_v30 = vmul.f32 %v1157_v10, %v1021_v25  ;;  %v1414_v29 = vmul.f32 %v1179_v11, %v1043_v31  ;;  %v1415_v28 = vmul.f32 %v1180_v12, %v1044_v62  ;;  %v913_v31 = vpop.permute.xlu0 %912 }
  0xc2   : > { %v1276_v32 = vsel %vm1070_vm8, %v1206_v21, 0.0  ;;  %v1277_v34 = vsel %vm1070_vm8, %v1209_v37, 0.0  ;;  %v1416_v14 = vmul.f32 %v1181_v13, %v1045_v1  ;;  %v1438_v20 = vsel %vm1070_vm8, %v1390_v45, 0.0 }
  0xc3   : > { %v1278_v33 = vadd.f32 %v1277_v34, %v1276_v32  ;;  %v1279_v61 = vsel %vm1073_vm9, %v1212_v35, 0.0  ;;  %v1439_v22 = vsel %vm1070_vm8, %v1414_v29, 0.0  ;;  %v1441_v23 = vsel %vm1070_vm8, %v1391_v6, 0.0 }
  0xc4   : > { %v1440_v18 = vadd.f32 %v1439_v22, %v1438_v20  ;;  %v1442_v19 = vsel %vm1070_vm8, %v1415_v28, 0.0  ;;  %v1444_v9 = vsel %vm1073_vm9, %v1392_v30, 0.0  ;;  %v1445_v25 = vsel %vm1073_vm9, %v1416_v14, 0.0 }
  0xc5   : > { %v1280_v7 = vadd.f32 %v1279_v61, %v1278_v33  ;;  %v1443_v62 = vadd.f32 %v1442_v19, %v1441_v23  ;;  %v1446_v1 = vadd.f32 %v1445_v25, %v1444_v9  ;;  %v951_v10 = vmul.f32 %v897_v24, %v4098_v44 }
  0xc6   : > { %v1510_v34 = vsel %vm1070_vm8, %v1440_v18, 0.0  ;;  %v952_v32 = vmul.f32 %v897_v24, %v4103_v27  ;;  %v4190_v29 = vadd.f32 %v926_v15, %v4106_v51  ;;  %v4193_v6 = vadd.f32 %v927_v16, %v4109_v59  ;;  %v527_v59 = vpop.permute.xlu1 %526 }
  0xc7   : > { %v1281_v35 = vrot.slane %v1280_v7, 4  ;;  %v1511_v30 = vsel %vm1070_vm8, %v1443_v62, 0.0  ;;  %v1513_v28 = vsel %vm1073_vm9, %v1446_v1, 0.0  ;;  %v4198_v33 = vadd.f32 %v928_v4, %v4112_v46 }
  0xc8   : > { %v1512_v61 = vadd.f32 %v1511_v30, %v1510_v34  ;;  %v4201_v11 = vadd.f32 %v950_v5, %v4115_v58  ;;  %v4204_v24 = vadd.f32 %v951_v10, %v4122_v2  ;;  %v4207_v51 = vadd.f32 %v952_v32, %v4125_v3  ;;  %v917_v5 = vpop.permute.xlu0 %916 }
  0xc9   : > { %v1282_v15 = vadd.f32 %v1281_v35, %v1280_v7  ;;  %v4210_v16 = vmul.f32 %v913_v31, %v4054_v54  ;;  %v4213_v12 = vmul.f32 %v913_v31, %v4071_v47  ;;  %v4216_v46 = vmul.f32 %v913_v31, %v4076_v0 }
  0xca   : > { %v1514_v4 = vadd.f32 %v1513_v28, %v1512_v61  ;;  %v4219_v58 = vmul.f32 %v913_v31, %v4081_v50  ;;  %v4222_v2 = vmul.f32 %v913_v31, %v4098_v44  ;;  %v4225_v3 = vmul.f32 %v913_v31, %v4103_v27  ;;  %v901_v62 = vpop.permute.xlu1 %900 }
  0xcb   : > { %v1283_v13 = vrot.slane %v1282_v15, 2  ;;  %v555_v21 = vmul.f32 %v527_v59, %v3802_v39  ;;  %v556_v36 = vmul.f32 %v527_v59, %v3807_v40  ;;  %v557_v37 = vmul.f32 %v527_v59, %v3812_v41 }
  0xcc   : > { %6179 = vst [vmem:[#allocation57_spill] sm:$0xff] %v4225_v3  ;;  %v1515_v26 = vrot.slane %v1514_v4, 4  ;;  %v579_v45 = vmul.f32 %v527_v59, %v3817_v42  ;;  %v580_v14 = vmul.f32 %v527_v59, %v3822_v43  ;;  %v581_v20 = vmul.f32 %v527_v59, %v3847_v49 }
  0xcd   : > { %v1284_v22 = vadd.f32 %v1283_v13, %v1282_v15  ;;  %v603_v23 = vadd.f32 %v555_v21, %v3968_v38  ;;  %v604_v18 = vadd.f32 %v556_v36, %v3971_v48  ;;  %v605_v19 = vadd.f32 %v557_v37, %v3974_v52 }
  0xce   : > { %v1516_v9 = vadd.f32 %v1515_v26, %v1514_v4  ;;  %v627_v25 = vadd.f32 %v579_v45, %v3977_v53  ;;  %v628_v31 = vadd.f32 %v580_v14, %v3980_v55  ;;  %v629_v7 = vadd.f32 %v581_v20, %v3983_v56  ;;  %v4257_v56 = vpop.permute.xlu0 %522  ;;  %v6186_v14 = vld [vmem:[#allocation43_spill] sm:$0xff] }
  0xcf   : > { %v1285_v1 = vrot.slane %v1284_v22, 1  ;;  %v4240_v10 = vmul.f32 %v917_v5, %v4054_v54  ;;  %v4243_v34 = vmul.f32 %v917_v5, %v4071_v47  ;;  %v4246_v38 = vmul.f32 %v917_v5, %v4076_v0 }
  0xd0   : > { %v1517_v48 = vrot.slane %v1516_v9, 2  ;;  %v4249_v52 = vmul.f32 %v917_v5, %v4081_v50  ;;  %v4252_v53 = vmul.f32 %v917_v5, %v4098_v44  ;;  %v4255_v55 = vmul.f32 %v917_v5, %v4103_v27 }
  0xd1   : > { %6180 = vst [vmem:[#allocation58_spill] sm:$0xff] %v4240_v10  ;;  %6181 = vst [vmem:[#allocation59_spill] sm:$0xff] %v4243_v34  ;;  %v4259_v32 = vadd.f32 %v1285_v1, %v1284_v22  ;;  %v929_v35 = vmul.f32 %v901_v62, %v4054_v54  ;;  %v930_v30 = vmul.f32 %v901_v62, %v4071_v47 }
  0xd2   : > { %6182 = vst [vmem:[#allocation60_spill] sm:$0xff] %v4246_v38  ;;  %6183 = vst [vmem:[#allocation61_spill] sm:$0xff] %v4249_v52  ;;  %v931_v28 = vmul.f32 %v901_v62, %v4076_v0  ;;  %v1518_v61 = vadd.f32 %v1517_v48, %v1516_v9  ;;  %v953_v59 = vmul.f32 %v901_v62, %v4081_v50 }
  0xd3   : > { %6184 = vst [vmem:[#allocation62_spill] sm:$0xff] %v4252_v53  ;;  %6185 = vst [vmem:[#allocation63_spill] sm:$0xff] %v4255_v55  ;;  %v954_v15 = vmul.f32 %v901_v62, %v4098_v44  ;;  %v955_v4 = vmul.f32 %v901_v62, %v4103_v27  ;;  %v977_v5 = vadd.f32 %v929_v35, %v4022_v17 }
  0xd4   : > { %v978_v13 = vadd.f32 %v930_v30, %v4025_v63  ;;  %v979_v21 = vadd.f32 %v931_v28, %v4028_v57  ;;  %v552_v36 = vmul.f32 %v4257_v56, %v3802_v39  ;;  %v1519_v37 = vrot.slane %v1518_v61, 1 }
  0xd5   : > { %v1001_v26 = vadd.f32 %v953_v59, %v4031_v8  ;;  %v1002_v45 = vadd.f32 %v954_v15, %v4034_v60  ;;  %v1003_v20 = vadd.f32 %v955_v4, %v6186_v14  ;;  %v1025_v22 = vadd.f32 %v977_v5, %v603_v23 }
  0xd6   : > { %v1026_v9 = vadd.f32 %v978_v13, %v604_v18  ;;  %v1027_v1 = vadd.f32 %v979_v21, %v605_v19  ;;  %v553_v17 = vmul.f32 %v4257_v56, %v3807_v40  ;;  %v4277_v62 = vadd.f32 %v1519_v37, %v1518_v61 }
  0xd7   : > { %v1049_v63 = vadd.f32 %v1001_v26, %v627_v25  ;;  %v1050_v57 = vadd.f32 %v1002_v45, %v628_v31  ;;  %v1051_v48 = vadd.f32 %v1003_v20, %v629_v7  ;;  %1078 = vst.msk [vmem:[#allocation2 + $0x30] sm:$0xff] %vm1070_vm8, %v1025_v22  ;;  %v1161_v8 = vsel %vm3779_vm6, %v1025_v22, 0.0 }
  0xd8   : > { %1079 = vst.msk [vmem:[#allocation2 + $0x38] sm:$0xff] %vm1070_vm8, %v1026_v9  ;;  %v1162_v18 = vsel %vm4137_vm10, %v1026_v9, 0.0  ;;  %v1163_v35 = vsel %vm3785_vm7, %v1027_v1, 0.0  ;;  %v554_v25 = vmul.f32 %v4257_v56, %v3812_v41  ;;  %v1222_v28 = vsel %vm1070_vm8, %v1161_v8, 0.0 }
  0xd9   : > { %1080 = vst.msk [vmem:[#allocation2 + $0x40] sm:$0x3] %vm1073_vm9, %v1027_v1  ;;  %1104 = vst.msk [vmem:[#allocation2 + $0x100] sm:$0x3] %vm1073_vm9, %v1051_v48  ;;  %v1185_v31 = vsel %vm3779_vm6, %v1049_v63, 0.0  ;;  %v1186_v7 = vsel %vm4137_vm10, %v1050_v57, 0.0  ;;  %v1396_v37 = vmul.f32 %v1161_v8, %v1025_v22  ;;  %v1397_v45 = vmul.f32 %v1162_v18, %v1026_v9 }
  0xda   : > { %1102 = vst.msk [vmem:[#allocation2 + $0xf0] sm:$0xff] %vm1070_vm8, %v1049_v63  ;;  %1103 = vst.msk [vmem:[#allocation2 + $0xf8] sm:$0xff] %vm1070_vm8, %v1050_v57  ;;  %v1187_v30 = vsel %vm3785_vm7, %v1051_v48, 0.0  ;;  %v1223_v61 = vsel %vm1070_vm8, %v1185_v31, 0.0  ;;  %v1225_v59 = vsel %vm1070_vm8, %v1162_v18, 0.0  ;;  %v1226_v15 = vsel %vm1070_vm8, %v1186_v7, 0.0 }
  0xdb   : > { %v1228_v4 = vsel %vm1073_vm9, %v1163_v35, 0.0  ;;  %v1224_v5 = vadd.f32 %v1223_v61, %v1222_v28  ;;  %v1227_v13 = vadd.f32 %v1226_v15, %v1225_v59  ;;  %v1229_v21 = vsel %vm1073_vm9, %v1187_v30, 0.0  ;;  %v6192_v59 = vld [vmem:[#allocation27_spill] sm:$0xff] }
  0xdc   : > { %v1230_v26 = vadd.f32 %v1229_v21, %v1228_v4  ;;  %v1398_v14 = vmul.f32 %v1163_v35, %v1027_v1  ;;  %v1420_v20 = vmul.f32 %v1185_v31, %v1049_v63  ;;  %v1421_v52 = vmul.f32 %v1186_v7, %v1050_v57  ;;  %v6190_v31 = vld [vmem:[#allocation25_spill] sm:$0xff]  ;;  %v6193_v4 = vld [vmem:[#allocation28_spill] sm:$0xff] }
  0xdd   : > { %v1298_v55 = vsel %vm1070_vm8, %v1224_v5, 0.0  ;;  %v1299_v53 = vsel %vm1070_vm8, %v1227_v13, 0.0  ;;  %v1422_v38 = vmul.f32 %v1187_v30, %v1051_v48  ;;  %v1456_v3 = vsel %vm1070_vm8, %v1396_v37, 0.0  ;;  %v6194_v21 = vld [vmem:[#allocation29_spill] sm:$0xff] }
  0xde   : > { %v1300_v34 = vadd.f32 %v1299_v53, %v1298_v55  ;;  %v1301_v10 = vsel %vm1073_vm9, %v1230_v26, 0.0  ;;  %v1457_v28 = vsel %vm1070_vm8, %v1420_v20, 0.0  ;;  %v1459_v22 = vsel %vm1070_vm8, %v1397_v45, 0.0  ;;  %v6195_v26 = vld [vmem:[#allocation30_spill] sm:$0xff] }
  0xdf   : > { %v1458_v61 = vadd.f32 %v1457_v28, %v1456_v3  ;;  %v1460_v9 = vsel %vm1070_vm8, %v1421_v52, 0.0  ;;  %v1462_v1 = vsel %vm1073_vm9, %v1398_v14, 0.0  ;;  %v1463_v18 = vsel %vm1073_vm9, %v1422_v38, 0.0 }
  0xe0   : > { %v1302_v63 = vadd.f32 %v1301_v10, %v1300_v34  ;;  %v1461_v8 = vadd.f32 %v1460_v9, %v1459_v22  ;;  %v576_v53 = vmul.f32 %v4257_v56, %v3817_v42  ;;  %v1464_v55 = vadd.f32 %v1463_v18, %v1462_v1  ;;  %v6191_v34 = vld [vmem:[#allocation26_spill] sm:$0xff] }
  0xe1   : > { %v1532_v57 = vsel %vm1070_vm8, %v1458_v61, 0.0  ;;  %v577_v48 = vmul.f32 %v4257_v56, %v3822_v43  ;;  %v578_v3 = vmul.f32 %v4257_v56, %v3847_v49  ;;  %v600_v10 = vadd.f32 %v552_v36, %v6190_v31 }
  0xe2   : > { %v1303_v35 = vrot.slane %v1302_v63, 4  ;;  %v1533_v52 = vsel %vm1070_vm8, %v1461_v8, 0.0  ;;  %v601_v7 = vadd.f32 %v553_v17, %v6191_v34  ;;  %v1535_v30 = vsel %vm1073_vm9, %v1464_v55, 0.0 }
  0xe3   : > { %v1534_v38 = vadd.f32 %v1533_v52, %v1532_v57  ;;  %v602_v15 = vadd.f32 %v554_v25, %v6192_v59  ;;  %v624_v5 = vadd.f32 %v576_v53, %v6193_v4  ;;  %v625_v37 = vadd.f32 %v577_v48, %v6194_v21 }
  0xe4   : > { %v1304_v13 = vadd.f32 %v1303_v35, %v1302_v63  ;;  %v626_v45 = vadd.f32 %v578_v3, %v6195_v26  ;;  %v1022_v56 = vadd.f32 %v4190_v29, %v600_v10  ;;  %v1023_v20 = vadd.f32 %v4193_v6, %v601_v7 }
  0xe5   : > { %v1536_v14 = vadd.f32 %v1535_v30, %v1534_v38  ;;  %v1024_v36 = vadd.f32 %v4198_v33, %v602_v15  ;;  %v1046_v17 = vadd.f32 %v4201_v11, %v624_v5  ;;  %v1047_v61 = vadd.f32 %v4204_v24, %v625_v37 }
  0xe6   : > { %v1305_v28 = vrot.slane %v1304_v13, 2  ;;  %v1048_v25 = vadd.f32 %v4207_v51, %v626_v45  ;;  %1075 = vst.msk [vmem:[#allocation2 + $0x18] sm:$0xff] %vm1070_vm8, %v1022_v56  ;;  %v1158_v22 = vsel %vm3779_vm6, %v1022_v56, 0.0  ;;  %1076 = vst.msk [vmem:[#allocation2 + $0x20] sm:$0xff] %vm1070_vm8, %v1023_v20  ;;  %v1159_v29 = vsel %vm4137_vm10, %v1023_v20, 0.0 }
  0xe7   : > { %v1537_v9 = vrot.slane %v1536_v14, 4  ;;  %1077 = vst.msk [vmem:[#allocation2 + $0x28] sm:$0x3] %vm1073_vm9, %v1024_v36  ;;  %v1160_v6 = vsel %vm3785_vm7, %v1024_v36, 0.0  ;;  %v1182_v33 = vsel %vm3779_vm6, %v1046_v17, 0.0  ;;  %v1183_v24 = vsel %vm4137_vm10, %v1047_v61, 0.0 }
  0xe8   : > { %1099 = vst.msk [vmem:[#allocation2 + $0xd8] sm:$0xff] %vm1070_vm8, %v1046_v17  ;;  %v1306_v11 = vadd.f32 %v1305_v28, %v1304_v13  ;;  %1100 = vst.msk [vmem:[#allocation2 + $0xe0] sm:$0xff] %vm1070_vm8, %v1047_v61  ;;  %v1184_v51 = vsel %vm3785_vm7, %v1048_v25, 0.0  ;;  %v1213_v1 = vsel %vm1070_vm8, %v1158_v22, 0.0  ;;  %v1214_v8 = vsel %vm1070_vm8, %v1182_v33, 0.0  ;;  %v535_v28 = vpop.permute.xlu0 %534 }
  0xe9   : > { %1101 = vst.msk [vmem:[#allocation2 + $0xe8] sm:$0x3] %vm1073_vm9, %v1048_v25  ;;  %v1538_v63 = vadd.f32 %v1537_v9, %v1536_v14  ;;  %v1216_v18 = vsel %vm1070_vm8, %v1159_v29, 0.0  ;;  %v1217_v53 = vsel %vm1070_vm8, %v1183_v24, 0.0  ;;  %v1215_v57 = vadd.f32 %v1214_v8, %v1213_v1 }
  0xea   : > { %v1307_v55 = vrot.slane %v1306_v11, 1  ;;  %v1218_v48 = vadd.f32 %v1217_v53, %v1216_v18  ;;  %v1219_v3 = vsel %vm1073_vm9, %v1160_v6, 0.0  ;;  %v1220_v52 = vsel %vm1073_vm9, %v1184_v51, 0.0  ;;  %v531_v53 = vpop.permute.xlu1 %530 }
  0xeb   : > { %v1539_v35 = vrot.slane %v1538_v63, 2  ;;  %v1393_v31 = vmul.f32 %v1158_v22, %v1022_v56  ;;  %v1394_v10 = vmul.f32 %v1159_v29, %v1023_v20  ;;  %v1221_v7 = vadd.f32 %v1220_v52, %v1219_v3  ;;  %v6196_v3 = vld [vmem:[#allocation19_spill] sm:$0xff] }
  0xec   : > { %v4359_v34 = vadd.f32 %v1307_v55, %v1306_v11  ;;  %v1287_v38 = vsel %vm1070_vm8, %v1215_v57, 0.0  ;;  %v1288_v30 = vsel %vm1070_vm8, %v1218_v48, 0.0  ;;  %v1395_v4 = vmul.f32 %v1160_v6, %v1024_v36 }
  0xed   : > { %v1540_v59 = vadd.f32 %v1539_v35, %v1538_v63  ;;  %v1289_v15 = vadd.f32 %v1288_v30, %v1287_v38  ;;  %v1417_v5 = vmul.f32 %v1182_v33, %v1046_v17  ;;  %v1290_v13 = vsel %vm1073_vm9, %v1221_v7, 0.0  ;;  %v6198_v7 = vld [vmem:[#allocation21_spill] sm:$0xff]  ;;  %v6199_v30 = vld [vmem:[#allocation22_spill] sm:$0xff] }
  0xee   : > { %v1418_v21 = vmul.f32 %v1183_v24, %v1047_v61  ;;  %v1419_v37 = vmul.f32 %v1184_v51, %v1048_v25  ;;  %v1447_v26 = vsel %vm1070_vm8, %v1393_v31, 0.0  ;;  %v1450_v20 = vsel %vm1070_vm8, %v1394_v10, 0.0  ;;  %v6197_v31 = vld [vmem:[#allocation20_spill] sm:$0xff] }
  0xef   : > { %v1541_v45 = vrot.slane %v1540_v59, 1  ;;  %v1291_v56 = vadd.f32 %v1290_v13, %v1289_v15  ;;  %v1448_v14 = vsel %vm1070_vm8, %v1417_v5, 0.0  ;;  %v1453_v29 = vsel %vm1073_vm9, %v1395_v4, 0.0  ;;  %v6200_v4 = vld [vmem:[#allocation23_spill] sm:$0xff]  ;;  %v6201_v13 = vld [vmem:[#allocation24_spill] sm:$0xff] }
  0xf0   : > { %v1449_v22 = vadd.f32 %v1448_v14, %v1447_v26  ;;  %v1451_v9 = vsel %vm1070_vm8, %v1418_v21, 0.0  ;;  %v1454_v36 = vsel %vm1073_vm9, %v1419_v37, 0.0  ;;  %v561_v11 = vmul.f32 %v535_v28, %v3802_v39 }
  0xf1   : > { %v4370_v17 = vadd.f32 %v1541_v45, %v1540_v59  ;;  %v1292_v61 = vrot.slane %v1291_v56, 4  ;;  %v1452_v25 = vadd.f32 %v1451_v9, %v1450_v20  ;;  %v1455_v6 = vadd.f32 %v1454_v36, %v1453_v29  ;;  %v539_v20 = vpop.permute.xlu0 %538  ;;  %v6202_v29 = vld [vmem:[#allocation44_spill] sm:$0xff] }
  0xf2   : > { %v1521_v33 = vsel %vm1070_vm8, %v1449_v22, 0.0  ;;  %v562_v24 = vmul.f32 %v535_v28, %v3807_v40  ;;  %v563_v51 = vmul.f32 %v535_v28, %v3812_v41  ;;  %v585_v18 = vmul.f32 %v535_v28, %v3817_v42 }
  0xf3   : > { %v1293_v1 = vadd.f32 %v1292_v61, %v1291_v56  ;;  %v1522_v63 = vsel %vm1070_vm8, %v1452_v25, 0.0  ;;  %v1524_v8 = vsel %vm1073_vm9, %v1455_v6, 0.0  ;;  %v586_v57 = vmul.f32 %v535_v28, %v3822_v43  ;;  %v6203_v25 = vld [vmem:[#allocation45_spill] sm:$0xff] }
  0xf4   : > { %v1523_v55 = vadd.f32 %v1522_v63, %v1521_v33  ;;  %v587_v48 = vmul.f32 %v535_v28, %v3847_v49  ;;  %v4382_v35 = vadd.f32 %v561_v11, %v6196_v3  ;;  %v4385_v10 = vadd.f32 %v562_v24, %v6197_v31  ;;  %v6204_v33 = vld [vmem:[#allocation46_spill] sm:$0xff]  ;;  %v6205_v24 = vld [vmem:[#allocation47_spill] sm:$0xff] }
  0xf5   : > { %v1294_v52 = vrot.slane %v1293_v1, 2  ;;  %v4388_v38 = vadd.f32 %v563_v51, %v6198_v7  ;;  %v4391_v59 = vadd.f32 %v585_v18, %v6199_v30  ;;  %v4394_v5 = vadd.f32 %v586_v57, %v6200_v4 }
  0xf6   : > { %v1525_v15 = vadd.f32 %v1524_v8, %v1523_v55  ;;  %v4397_v21 = vadd.f32 %v587_v48, %v6201_v13  ;;  %v558_v37 = vmul.f32 %v531_v53, %v3802_v39  ;;  %v559_v45 = vmul.f32 %v531_v53, %v3807_v40  ;;  %v6206_v8 = vld [vmem:[#allocation48_spill] sm:$0xff]  ;;  %v6207_v55 = vld [vmem:[#allocation49_spill] sm:$0xff] }
  0xf7   : > { %v1295_v26 = vadd.f32 %v1294_v52, %v1293_v1  ;;  %v560_v56 = vmul.f32 %v531_v53, %v3812_v41  ;;  %v582_v14 = vmul.f32 %v531_v53, %v3817_v42  ;;  %v583_v22 = vmul.f32 %v531_v53, %v3822_v43  ;;  %v905_v1 = vpop.permute.xlu1 %904  ;;  %v6208_v13 = vld [vmem:[#allocation37_spill] sm:$0xff] }
  0xf8   : > { %v1526_v28 = vrot.slane %v1525_v15, 4  ;;  %v584_v9 = vmul.f32 %v531_v53, %v3847_v49  ;;  %v606_v36 = vadd.f32 %v558_v37, %v6202_v29  ;;  %v607_v6 = vadd.f32 %v559_v45, %v6203_v25  ;;  %v6209_v45 = vld [vmem:[#allocation38_spill] sm:$0xff] }
  0xf9   : > { %v1296_v61 = vrot.slane %v1295_v26, 1  ;;  %v608_v11 = vadd.f32 %v560_v56, %v6204_v33  ;;  %v630_v51 = vadd.f32 %v582_v14, %v6205_v24  ;;  %v631_v18 = vadd.f32 %v583_v22, %v6206_v8  ;;  %v6212_v14 = vld [vmem:[#allocation41_spill] sm:$0xff]  ;;  %v6214_v24 = vld [vmem:[#allocation50_spill] sm:$0xff] }
  0xfa   : > { %v1527_v63 = vadd.f32 %v1526_v28, %v1525_v15  ;;  %v632_v57 = vadd.f32 %v584_v9, %v6207_v55  ;;  %v564_v48 = vmul.f32 %v539_v20, %v3802_v39  ;;  %v565_v53 = vmul.f32 %v539_v20, %v3807_v40  ;;  %v6215_v55 = vld [vmem:[#allocation51_spill] sm:$0xff] }
  0xfb   : > { %v1297_v3 = vadd.f32 %v1296_v61, %v1295_v26  ;;  %v566_v52 = vmul.f32 %v539_v20, %v3812_v41  ;;  %v588_v31 = vmul.f32 %v539_v20, %v3817_v42  ;;  %v589_v30 = vmul.f32 %v539_v20, %v3822_v43  ;;  %v6210_v26 = vld [vmem:[#allocation39_spill] sm:$0xff]  ;;  %v6211_v41 = vld [vmem:[#allocation40_spill] sm:$0xff]  ;;  %v4442_v61 = vpop.permute.xlu1 %745 }
  0xfc   : > { %v1528_v7 = vrot.slane %v1527_v63, 2  ;;  %v590_v4 = vmul.f32 %v539_v20, %v3847_v49  ;;  %v4418_v15 = vadd.f32 %v564_v48, %v6208_v13  ;;  %v4423_v39 = vadd.f32 %v565_v53, %v6209_v45  ;;  %v6213_v49 = vld [vmem:[#allocation42_spill] sm:$0xff]  ;;  %v6219_v13 = vld [vmem:[#allocation55_spill] sm:$0xff] }
  0xfd   : > { %v1373_v37 = vsel %vm1372_vm11, %v1297_v3, %v4259_v32  ;;  %v4426_v40 = vadd.f32 %v566_v52, %v6210_v26  ;;  %v4429_v56 = vadd.f32 %v588_v31, %v6211_v41  ;;  %v4432_v43 = vadd.f32 %v589_v30, %v6212_v14  ;;  %v6216_v3 = vld [vmem:[#allocation52_spill] sm:$0xff]  ;;  %v6217_v52 = vld [vmem:[#allocation53_spill] sm:$0xff] }
  0xfe   : > { %v1529_v42 = vadd.f32 %v1528_v7, %v1527_v63  ;;  %v4435_v20 = vadd.f32 %v590_v4, %v6213_v49  ;;  %v932_v28 = vmul.f32 %v905_v1, %v4054_v54  ;;  %v933_v32 = vmul.f32 %v905_v1, %v4071_v47  ;;  %v6218_v7 = vld [vmem:[#allocation54_spill] sm:$0xff]  ;;  %v6220_v41 = vld [vmem:[#allocation13_spill] sm:$0xff] }
  0xff   : > { %v934_v22 = vmul.f32 %v905_v1, %v4076_v0  ;;  %v956_v9 = vmul.f32 %v905_v1, %v4081_v50  ;;  %v957_v29 = vmul.f32 %v905_v1, %v4098_v44  ;;  %v958_v33 = vmul.f32 %v905_v1, %v4103_v27 }
 0x100   : > { %v1530_v25 = vrot.slane %v1529_v42, 1  ;;  %v980_v63 = vadd.f32 %v932_v28, %v6214_v24  ;;  %v4448_v8 = vsel %vm1374_vm12, %v4359_v34, %v1373_v37  ;;  %v981_v48 = vadd.f32 %v933_v32, %v6215_v55 }
 0x101   : > { %v982_v53 = vadd.f32 %v934_v22, %v6216_v3  ;;  %v1004_v31 = vadd.f32 %v956_v9, %v6217_v52  ;;  %v1005_v30 = vadd.f32 %v957_v29, %v6218_v7  ;;  %v1006_v45 = vadd.f32 %v958_v33, %v6219_v13  ;;  %v6221_v22 = vld [vmem:[#allocation14_spill] sm:$0xff] }
 0x102   : > { %v1531_v4 = vadd.f32 %v1530_v25, %v1529_v42  ;;  %v1028_v26 = vadd.f32 %v980_v63, %v606_v36  ;;  %v4457_v1 = vmul.f32 %v4442_v61, %v6220_v41  ;;  %v1029_v14 = vadd.f32 %v981_v48, %v607_v6 }
 0x103   : > { %v1030_v49 = vadd.f32 %v982_v53, %v608_v11  ;;  %v1052_v34 = vadd.f32 %v1004_v31, %v630_v51  ;;  %v1053_v37 = vadd.f32 %v1005_v30, %v631_v18  ;;  %v1054_v32 = vadd.f32 %v1006_v45, %v632_v57 }
 0x104   : > { %v1606_v28 = vsel %vm1372_vm11, %v1531_v4, %v4277_v62  ;;  %1081 = vst.msk [vmem:[#allocation2 + $0x48] sm:$0xff] %vm1070_vm8, %v1028_v26  ;;  %v1164_v42 = vsel %vm3779_vm6, %v1028_v26, 0.0  ;;  %v773_v36 = vmul.f32 %v4442_v61, %v6221_v22  ;;  %1082 = vst.msk [vmem:[#allocation2 + $0x50] sm:$0xff] %vm1070_vm8, %v1029_v14  ;;  %v1165_v62 = vsel %vm4137_vm10, %v1029_v14, 0.0 }
 0x105   : > { %1083 = vst.msk [vmem:[#allocation2 + $0x58] sm:$0x3] %vm1073_vm9, %v1030_v49  ;;  %v1166_v6 = vsel %vm3785_vm7, %v1030_v49, 0.0  ;;  %v1188_v11 = vsel %vm3779_vm6, %v1052_v34, 0.0  ;;  %v1189_v51 = vsel %vm4137_vm10, %v1053_v37, 0.0  ;;  %v1190_v18 = vsel %vm3785_vm7, %v1054_v32, 0.0 }
 0x106   : > { %1105 = vst.msk [vmem:[#allocation2 + $0x108] sm:$0xff] %vm1070_vm8, %v1052_v34  ;;  %1106 = vst.msk [vmem:[#allocation2 + $0x110] sm:$0xff] %vm1070_vm8, %v1053_v37  ;;  %v1231_v57 = vsel %vm1070_vm8, %v1164_v42, 0.0  ;;  %v1232_v9 = vsel %vm1070_vm8, %v1188_v11, 0.0  ;;  %v1234_v29 = vsel %vm1070_vm8, %v1165_v62, 0.0  ;;  %v1235_v33 = vsel %vm1070_vm8, %v1189_v51, 0.0 }
 0x107   : > { %1107 = vst.msk [vmem:[#allocation2 + $0x118] sm:$0x3] %vm1073_vm9, %v1054_v32  ;;  %v1233_v25 = vadd.f32 %v1232_v9, %v1231_v57  ;;  %v1237_v24 = vsel %vm1073_vm9, %v1166_v6, 0.0  ;;  %v1238_v63 = vsel %vm1073_vm9, %v1190_v18, 0.0  ;;  %v1236_v55 = vadd.f32 %v1235_v33, %v1234_v29 }
 0x108   : > { %v1239_v48 = vadd.f32 %v1238_v63, %v1237_v24  ;;  %v1399_v3 = vmul.f32 %v1164_v42, %v1028_v26  ;;  %v1400_v53 = vmul.f32 %v1165_v62, %v1029_v14  ;;  %v1401_v31 = vmul.f32 %v1166_v6, %v1030_v49  ;;  %v6222_v6 = vld [vmem:[#allocation15_spill] sm:$0xff]  ;;  %v6224_v24 = vld [vmem:[#allocation17_spill] sm:$0xff] }
 0x109   : > { %v1309_v52 = vsel %vm1070_vm8, %v1233_v25, 0.0  ;;  %v1423_v7 = vmul.f32 %v1188_v11, %v1052_v34  ;;  %v1424_v30 = vmul.f32 %v1189_v51, %v1053_v37  ;;  %v1310_v4 = vsel %vm1070_vm8, %v1236_v55, 0.0  ;;  %v909_v51 = vpop.permute.xlu1 %908  ;;  %v6223_v25 = vld [vmem:[#allocation16_spill] sm:$0xff] }
 0x10a   : > { %v1312_v13 = vsel %vm1073_vm9, %v1239_v48, 0.0  ;;  %v1425_v45 = vmul.f32 %v1190_v18, %v1054_v32  ;;  %v1465_v41 = vsel %vm1070_vm8, %v1399_v3, 0.0  ;;  %v1311_v22 = vadd.f32 %v1310_v4, %v1309_v52 }
 0x10b   : > { %v1466_v57 = vsel %vm1070_vm8, %v1423_v7, 0.0  ;;  %v1468_v9 = vsel %vm1070_vm8, %v1400_v53, 0.0  ;;  %v1469_v26 = vsel %vm1070_vm8, %v1424_v30, 0.0  ;;  %v1471_v49 = vsel %vm1073_vm9, %v1401_v31, 0.0 }
 0x10c   : > { %v1467_v14 = vadd.f32 %v1466_v57, %v1465_v41  ;;  %v1470_v42 = vadd.f32 %v1469_v26, %v1468_v9  ;;  %v1472_v34 = vsel %vm1073_vm9, %v1425_v45, 0.0  ;;  %v1313_v37 = vadd.f32 %v1312_v13, %v1311_v22 }
 0x10d   : > { %v1473_v62 = vadd.f32 %v1472_v34, %v1471_v49  ;;  %v4498_v32 = vsel %vm1374_vm12, %v4370_v17, %v1606_v28  ;;  %v774_v11 = vmul.f32 %v4442_v61, %v6222_v6  ;;  %v796_v33 = vmul.f32 %v4442_v61, %v6223_v25  ;;  %v6225_v17 = vld [vmem:[#allocation18_spill] sm:$0xff] }
 0x10e   : > { %v1543_v18 = vsel %vm1070_vm8, %v1467_v14, 0.0  ;;  %v1544_v29 = vsel %vm1070_vm8, %v1470_v42, 0.0  ;;  %v797_v63 = vmul.f32 %v4442_v61, %v6224_v24  ;;  %v1314_v55 = vrot.slane %v1313_v37, 4 }
 0x10f   : > { %v1545_v48 = vadd.f32 %v1544_v29, %v1543_v18  ;;  %v1546_v3 = vsel %vm1073_vm9, %v1473_v62, 0.0  ;;  %v798_v28 = vmul.f32 %v4442_v61, %v6225_v17  ;;  %v935_v53 = vmul.f32 %v909_v51, %v4054_v54 }
 0x110   : > { %v936_v52 = vmul.f32 %v909_v51, %v4071_v47  ;;  %v937_v31 = vmul.f32 %v909_v51, %v4076_v0  ;;  %v959_v7 = vmul.f32 %v909_v51, %v4081_v50  ;;  %v1315_v30 = vadd.f32 %v1314_v55, %v1313_v37 }
 0x111   : > { %v1547_v4 = vadd.f32 %v1546_v3, %v1545_v48  ;;  %v960_v13 = vmul.f32 %v909_v51, %v4098_v44  ;;  %v961_v45 = vmul.f32 %v909_v51, %v4103_v27  ;;  %v983_v41 = vadd.f32 %v935_v53, %v4457_v1 }
 0x112   : > { %v984_v22 = vadd.f32 %v936_v52, %v773_v36  ;;  %v985_v57 = vadd.f32 %v937_v31, %v774_v11  ;;  %v1007_v61 = vadd.f32 %v959_v7, %v796_v33  ;;  %v1316_v9 = vrot.slane %v1315_v30, 2 }
 0x113   : > { %v1548_v26 = vrot.slane %v1547_v4, 4  ;;  %v1008_v54 = vadd.f32 %v960_v13, %v797_v63  ;;  %v1009_v14 = vadd.f32 %v961_v45, %v798_v28  ;;  %v1031_v47 = vadd.f32 %v983_v41, %v4382_v35  ;;  %v750_v41 = vpop.permute.xlu1 %749 }
 0x114   : > { %v1032_v0 = vadd.f32 %v984_v22, %v4385_v10  ;;  %v1033_v50 = vadd.f32 %v985_v57, %v4388_v38  ;;  %v1055_v42 = vadd.f32 %v1007_v61, %v4391_v59  ;;  %v1317_v44 = vadd.f32 %v1316_v9, %v1315_v30 }
 0x115   : > { %v1549_v49 = vadd.f32 %v1548_v26, %v1547_v4  ;;  %v1056_v27 = vadd.f32 %v1008_v54, %v4394_v5  ;;  %v1057_v1 = vadd.f32 %v1009_v14, %v4397_v21  ;;  %1084 = vst.msk [vmem:[#allocation2 + $0x60] sm:$0xff] %vm1070_vm8, %v1031_v47  ;;  %v1167_v35 = vsel %vm3779_vm6, %v1031_v47, 0.0 }
 0x116   : > { %1085 = vst.msk [vmem:[#allocation2 + $0x68] sm:$0xff] %vm1070_vm8, %v1032_v0  ;;  %1108 = vst.msk [vmem:[#allocation2 + $0x120] sm:$0xff] %vm1070_vm8, %v1055_v42  ;;  %v1168_v10 = vsel %vm4137_vm10, %v1032_v0, 0.0  ;;  %v1169_v38 = vsel %vm3785_vm7, %v1033_v50, 0.0  ;;  %v1191_v59 = vsel %vm3779_vm6, %v1055_v42, 0.0  ;;  %v1318_v5 = vrot.slane %v1317_v44, 1 }
 0x117   : > { %1086 = vst.msk [vmem:[#allocation2 + $0x70] sm:$0x3] %vm1073_vm9, %v1033_v50  ;;  %v1550_v21 = vrot.slane %v1549_v49, 2  ;;  %1110 = vst.msk [vmem:[#allocation2 + $0x130] sm:$0x3] %vm1073_vm9, %v1057_v1  ;;  %v1192_v36 = vsel %vm4137_vm10, %v1056_v27, 0.0  ;;  %v1402_v63 = vmul.f32 %v1167_v35, %v1031_v47  ;;  %v1403_v55 = vmul.f32 %v1168_v10, %v1032_v0 }
 0x118   : > { %1109 = vst.msk [vmem:[#allocation2 + $0x128] sm:$0xff] %vm1070_vm8, %v1056_v27  ;;  %v1193_v34 = vsel %vm3785_vm7, %v1057_v1, 0.0  ;;  %v1240_v37 = vsel %vm1070_vm8, %v1167_v35, 0.0  ;;  %v1241_v62 = vsel %vm1070_vm8, %v1191_v59, 0.0  ;;  %v1243_v6 = vsel %vm1070_vm8, %v1168_v10, 0.0 }
 0x119   : > { %v1244_v11 = vsel %vm1070_vm8, %v1192_v36, 0.0  ;;  %v1319_v51 = vadd.f32 %v1318_v5, %v1317_v44  ;;  %v1551_v18 = vadd.f32 %v1550_v21, %v1549_v49  ;;  %v1242_v29 = vadd.f32 %v1241_v62, %v1240_v37  ;;  %v4574_v44 = vld [vmem:[%s6080_s0 + $0x20] sm:$0xff] }
 0x11a   : > { %v1245_v25 = vadd.f32 %v1244_v11, %v1243_v6  ;;  %v1246_v33 = vsel %vm1073_vm9, %v1169_v38, 0.0  ;;  %v1247_v24 = vsel %vm1073_vm9, %v1193_v34, 0.0  ;;  %v1404_v52 = vmul.f32 %v1169_v38, %v1033_v50  ;;  %v4568_v50 = vld [vmem:[%s6080_s0 + $0x18] sm:$0xff]  ;;  %v4582_v38 = vld [vmem:[%s6080_s0 + $0x28] sm:$0x3]  ;;  %v4588_v5 = vld [vmem:[%s6080_s0 + $0x60] sm:$0xff] }
 0x11b   : > { %v4550_v48 = vsel %vm1376_vm13, %v1319_v51, %v4448_v8  ;;  %v1552_v3 = vrot.slane %v1551_v18, 1  ;;  %v1248_v17 = vadd.f32 %v1247_v24, %v1246_v33  ;;  %v1320_v28 = vsel %vm1070_vm8, %v1242_v29, 0.0  ;;  %v4601_v6 = vld [vmem:[%s6080_s0 + $0x70] sm:$0x3] }
 0x11c   : > { %v1321_v53 = vsel %vm1070_vm8, %v1245_v25, 0.0  ;;  %v1426_v31 = vmul.f32 %v1191_v59, %v1055_v42  ;;  %v1427_v7 = vmul.f32 %v1192_v36, %v1056_v27  ;;  %v1428_v45 = vmul.f32 %v1193_v34, %v1057_v1  ;;  %v4594_v36 = vld [vmem:[%s6080_s0 + $0x68] sm:$0xff] }
 0x11d   : > { %v1553_v30 = vadd.f32 %v1552_v3, %v1551_v18  ;;  %v1322_v4 = vadd.f32 %v1321_v53, %v1320_v28  ;;  %v1323_v13 = vsel %vm1073_vm9, %v1248_v17, 0.0  ;;  %v1474_v22 = vsel %vm1070_vm8, %v1402_v63, 0.0 }
 0x11e   : > { %v1475_v8 = vsel %vm1070_vm8, %v1426_v31, 0.0  ;;  %v1477_v57 = vsel %vm1070_vm8, %v1403_v55, 0.0  ;;  %v1478_v61 = vsel %vm1070_vm8, %v1427_v7, 0.0  ;;  %v1480_v47 = vsel %vm1073_vm9, %v1404_v52, 0.0  ;;  %v6226_v55 = vld [vmem:[#allocation57_spill] sm:$0xff] }
 0x11f   : > { %v4561_v9 = vsel %vm1376_vm13, %v1553_v30, %v4498_v32  ;;  %v1324_v26 = vadd.f32 %v1323_v13, %v1322_v4  ;;  %v1476_v54 = vadd.f32 %v1475_v8, %v1474_v22  ;;  %v1479_v14 = vadd.f32 %v1478_v61, %v1477_v57 }
 0x120   : > { %v1481_v0 = vsel %vm1073_vm9, %v1428_v45, 0.0  ;;  %v775_v42 = vmul.f32 %v4568_v50, %v750_v41  ;;  %v776_v32 = vmul.f32 %v4574_v44, %v750_v41  ;;  %v777_v59 = vmul.f32 %v4582_v38, %v750_v41 }
 0x121   : > { %v1325_v49 = vrot.slane %v1324_v26, 4  ;;  %v1482_v27 = vadd.f32 %v1481_v0, %v1480_v47  ;;  %v1554_v1 = vsel %vm1070_vm8, %v1476_v54, 0.0  ;;  %v1555_v35 = vsel %vm1070_vm8, %v1479_v14, 0.0 }
 0x122   : > { %v1556_v10 = vadd.f32 %v1555_v35, %v1554_v1  ;;  %v799_v21 = vmul.f32 %v4588_v5, %v750_v41  ;;  %v800_v34 = vmul.f32 %v4594_v36, %v750_v41  ;;  %v801_v11 = vmul.f32 %v4601_v6, %v750_v41 }
 0x123   : > { %v1326_v37 = vadd.f32 %v1325_v49, %v1324_v26  ;;  %v1557_v62 = vsel %vm1073_vm9, %v1482_v27, 0.0  ;;  %v986_v51 = vadd.f32 %v4210_v16, %v775_v42  ;;  %v987_v29 = vadd.f32 %v4213_v12, %v776_v32 }
 0x124   : > { %v1558_v18 = vadd.f32 %v1557_v62, %v1556_v10  ;;  %v988_v25 = vadd.f32 %v4216_v46, %v777_v59  ;;  %v1010_v33 = vadd.f32 %v4219_v58, %v799_v21  ;;  %v1011_v63 = vadd.f32 %v4222_v2, %v800_v34  ;;  %v543_v10 = vpop.permute.xlu1 %542 }
 0x125   : > { %v1327_v24 = vrot.slane %v1326_v37, 2  ;;  %v1012_v3 = vadd.f32 %v6226_v55, %v801_v11  ;;  %v1034_v17 = vadd.f32 %v986_v51, %v4418_v15  ;;  %v1035_v53 = vadd.f32 %v987_v29, %v4423_v39 }
 0x126   : > { %v1559_v28 = vrot.slane %v1558_v18, 4  ;;  %v1036_v52 = vadd.f32 %v988_v25, %v4426_v40  ;;  %v1058_v16 = vadd.f32 %v1010_v33, %v4429_v56  ;;  %v1059_v12 = vadd.f32 %v1011_v63, %v4432_v43 }
 0x127   : > { %v1328_v31 = vadd.f32 %v1327_v24, %v1326_v37  ;;  %v1060_v46 = vadd.f32 %v1012_v3, %v4435_v20  ;;  %1087 = vst.msk [vmem:[#allocation2 + $0x78] sm:$0xff] %vm1070_vm8, %v1034_v17  ;;  %v1170_v58 = vsel %vm3779_vm6, %v1034_v17, 0.0  ;;  %1088 = vst.msk [vmem:[#allocation2 + $0x80] sm:$0xff] %vm1070_vm8, %v1035_v53  ;;  %v1171_v15 = vsel %vm4137_vm10, %v1035_v53, 0.0 }
 0x128   : > { %v1560_v2 = vadd.f32 %v1559_v28, %v1558_v18  ;;  %1089 = vst.msk [vmem:[#allocation2 + $0x88] sm:$0x3] %vm1073_vm9, %v1036_v52  ;;  %v1172_v39 = vsel %vm3785_vm7, %v1036_v52, 0.0  ;;  %v1194_v40 = vsel %vm3779_vm6, %v1058_v16, 0.0  ;;  %v1195_v43 = vsel %vm4137_vm10, %v1059_v12, 0.0  ;;  %v4661_v28 = vld [vmem:[%s6080_s0] sm:$0xff] }
 0x129   : > { %1111 = vst.msk [vmem:[#allocation2 + $0x138] sm:$0xff] %vm1070_vm8, %v1058_v16  ;;  %v1329_v56 = vrot.slane %v1328_v31, 1  ;;  %1112 = vst.msk [vmem:[#allocation2 + $0x140] sm:$0xff] %vm1070_vm8, %v1059_v12  ;;  %v1196_v20 = vsel %vm3785_vm7, %v1060_v46, 0.0  ;;  %v1249_v7 = vsel %vm1070_vm8, %v1170_v58, 0.0  ;;  %v1250_v4 = vsel %vm1070_vm8, %v1194_v40, 0.0 }
 0x12a   : > { %1113 = vst.msk [vmem:[#allocation2 + $0x148] sm:$0x3] %vm1073_vm9, %v1060_v46  ;;  %v1561_v30 = vrot.slane %v1560_v2, 2  ;;  %v1252_v13 = vsel %vm1070_vm8, %v1171_v15, 0.0  ;;  %v1253_v45 = vsel %vm1070_vm8, %v1195_v43, 0.0  ;;  %v1251_v22 = vadd.f32 %v1250_v4, %v1249_v7 }
 0x12b   : > { %v1330_v41 = vadd.f32 %v1329_v56, %v1328_v31  ;;  %v1254_v8 = vadd.f32 %v1253_v45, %v1252_v13  ;;  %v1255_v57 = vsel %vm1073_vm9, %v1172_v39, 0.0  ;;  %v1256_v26 = vsel %vm1073_vm9, %v1196_v20, 0.0  ;;  %v4687_v56 = vld [vmem:[%s6080_s0 + $0x50] sm:$0xff] }
 0x12c   : > { %v1562_v61 = vadd.f32 %v1561_v30, %v1560_v2  ;;  %v1405_v54 = vmul.f32 %v1170_v58, %v1034_v17  ;;  %v1406_v14 = vmul.f32 %v1171_v15, %v1035_v53  ;;  %v1257_v0 = vadd.f32 %v1256_v26, %v1255_v57  ;;  %v4681_v2 = vld [vmem:[%s6080_s0 + $0x48] sm:$0xff]  ;;  %v6228_v45 = vld [vmem:[#allocation32_spill] sm:$0xff]  ;;  %v6230_v57 = vld [vmem:[#allocation34_spill] sm:$0xff] }
 0x12d   : > { %v4642_v47 = vsel %vm1378_vm14, %v1330_v41, %v4550_v48  ;;  %v1331_v42 = vsel %vm1070_vm8, %v1251_v22, 0.0  ;;  %v1332_v32 = vsel %vm1070_vm8, %v1254_v8, 0.0  ;;  %v1407_v1 = vmul.f32 %v1172_v39, %v1036_v52  ;;  %v4667_v52 = vld [vmem:[%s6080_s0 + $0x8] sm:$0xff]  ;;  %v754_v39 = vpop.permute.xlu1 %753  ;;  %v6229_v22 = vld [vmem:[#allocation33_spill] sm:$0xff] }
 0x12e   : > { %v1563_v49 = vrot.slane %v1562_v61, 1  ;;  %v1333_v27 = vadd.f32 %v1332_v32, %v1331_v42  ;;  %v1429_v35 = vmul.f32 %v1194_v40, %v1058_v16  ;;  %v1334_v59 = vsel %vm1073_vm9, %v1257_v0, 0.0  ;;  %v4673_v16 = vld [vmem:[%s6080_s0 + $0x10] sm:$0x3]  ;;  %v6227_v30 = vld [vmem:[#allocation31_spill] sm:$0xff] }
 0x12f   : > { %v1430_v21 = vmul.f32 %v1195_v43, %v1059_v12  ;;  %v1431_v34 = vmul.f32 %v1196_v20, %v1060_v46  ;;  %v1483_v37 = vsel %vm1070_vm8, %v1405_v54, 0.0  ;;  %v1486_v51 = vsel %vm1070_vm8, %v1406_v14, 0.0  ;;  %v4693_v20 = vld [vmem:[%s6080_s0 + $0x58] sm:$0x3]  ;;  %v6231_v54 = vld [vmem:[#allocation35_spill] sm:$0xff]  ;;  %v6232_v0 = vld [vmem:[#allocation36_spill] sm:$0xff] }
 0x130   : > { %v1564_v62 = vadd.f32 %v1563_v49, %v1562_v61  ;;  %v1335_v11 = vadd.f32 %v1334_v59, %v1333_v27  ;;  %v1484_v48 = vsel %vm1070_vm8, %v1429_v35, 0.0  ;;  %v1489_v25 = vsel %vm1073_vm9, %v1407_v1, 0.0 }
 0x131   : > { %v1485_v18 = vadd.f32 %v1484_v48, %v1483_v37  ;;  %v1487_v29 = vsel %vm1070_vm8, %v1430_v21, 0.0  ;;  %v1490_v33 = vsel %vm1073_vm9, %v1431_v34, 0.0  ;;  %v567_v53 = vmul.f32 %v4661_v28, %v543_v10  ;;  %v6233_v34 = vld [vmem:[#allocation58_spill] sm:$0xff] }
 0x132   : > { %v4655_v24 = vsel %vm1378_vm14, %v1564_v62, %v4561_v9  ;;  %v1336_v63 = vrot.slane %v1335_v11, 4  ;;  %v1488_v55 = vadd.f32 %v1487_v29, %v1486_v51  ;;  %v1491_v3 = vadd.f32 %v1490_v33, %v1489_v25  ;;  %v6235_v51 = vld [vmem:[#allocation60_spill] sm:$0xff]  ;;  %v6236_v29 = vld [vmem:[#allocation61_spill] sm:$0xff] }
 0x133   : > { %v1565_v17 = vsel %vm1070_vm8, %v1485_v18, 0.0  ;;  %v568_v9 = vmul.f32 %v4667_v52, %v543_v10  ;;  %v569_v31 = vmul.f32 %v4673_v16, %v543_v10  ;;  %v591_v15 = vmul.f32 %v4681_v2, %v543_v10 }
 0x134   : > { %v1337_v12 = vadd.f32 %v1336_v63, %v1335_v11  ;;  %v1566_v46 = vsel %vm1070_vm8, %v1488_v55, 0.0  ;;  %v1568_v58 = vsel %vm1073_vm9, %v1491_v3, 0.0  ;;  %v592_v43 = vmul.f32 %v4687_v56, %v543_v10  ;;  %v6234_v11 = vld [vmem:[#allocation59_spill] sm:$0xff]  ;;  %v6237_v63 = vld [vmem:[#allocation62_spill] sm:$0xff] }
 0x135   : > { %v1567_v40 = vadd.f32 %v1566_v46, %v1565_v17  ;;  %v593_v7 = vmul.f32 %v4693_v20, %v543_v10  ;;  %v615_v4 = vadd.f32 %v567_v53, %v6227_v30  ;;  %v616_v41 = vadd.f32 %v568_v9, %v6228_v45  ;;  %v6238_v3 = vld [vmem:[#allocation63_spill] sm:$0xff] }
 0x136   : > { %v1338_v13 = vrot.slane %v1337_v12, 2  ;;  %v617_v8 = vadd.f32 %v569_v31, %v6229_v22  ;;  %v639_v61 = vadd.f32 %v591_v15, %v6230_v57  ;;  %v640_v14 = vadd.f32 %v592_v43, %v6231_v54 }
 0x137   : > { %v1569_v26 = vadd.f32 %v1568_v58, %v1567_v40  ;;  %v641_v42 = vadd.f32 %v593_v7, %v6232_v0  ;;  %v778_v32 = vmul.f32 %v4568_v50, %v754_v39  ;;  %v779_v27 = vmul.f32 %v4574_v44, %v754_v39 }
 0x138   : > { %v1339_v49 = vadd.f32 %v1338_v13, %v1337_v12  ;;  %v780_v1 = vmul.f32 %v4582_v38, %v754_v39  ;;  %v802_v35 = vmul.f32 %v4588_v5, %v754_v39  ;;  %v803_v59 = vmul.f32 %v4594_v36, %v754_v39 }
 0x139   : > { %v1570_v10 = vrot.slane %v1569_v26, 4  ;;  %v804_v21 = vmul.f32 %v4601_v6, %v754_v39  ;;  %v989_v37 = vadd.f32 %v6233_v34, %v778_v32  ;;  %v990_v48 = vadd.f32 %v6234_v11, %v779_v27 }
 0x13a   : > { %v1340_v62 = vrot.slane %v1339_v49, 1  ;;  %v991_v18 = vadd.f32 %v6235_v51, %v780_v1  ;;  %v1013_v25 = vadd.f32 %v6236_v29, %v802_v35  ;;  %v1014_v55 = vadd.f32 %v6237_v63, %v803_v59  ;;  %v384_v1 = vpop.permute.xlu1 %383 }
 0x13b   : > { %v1571_v33 = vadd.f32 %v1570_v10, %v1569_v26  ;;  %v1015_v17 = vadd.f32 %v6238_v3, %v804_v21  ;;  %v1037_v53 = vadd.f32 %v989_v37, %v615_v4  ;;  %v1038_v31 = vadd.f32 %v990_v48, %v616_v41  ;;  %v547_v48 = vpop.permute.xlu0 %546 }
 0x13c   : > { %v1341_v9 = vadd.f32 %v1340_v62, %v1339_v49  ;;  %v1039_v12 = vadd.f32 %v991_v18, %v617_v8  ;;  %v1061_v46 = vadd.f32 %v1013_v25, %v639_v61  ;;  %v1062_v15 = vadd.f32 %v1014_v55, %v640_v14 }
 0x13d   : > { %v1572_v58 = vrot.slane %v1571_v33, 2  ;;  %v1063_v39 = vadd.f32 %v1015_v17, %v641_v42  ;;  %1090 = vst.msk [vmem:[#allocation2 + $0x90] sm:$0xff] %vm1070_vm8, %v1037_v53  ;;  %v1173_v40 = vsel %vm3779_vm6, %v1037_v53, 0.0  ;;  %1091 = vst.msk [vmem:[#allocation2 + $0x98] sm:$0xff] %vm1070_vm8, %v1038_v31  ;;  %v1174_v7 = vsel %vm4137_vm10, %v1038_v31, 0.0 }
 0x13e   : > { %v4719_v43 = vsel %vm1380_vm15, %v1341_v9, %v4642_v47  ;;  %1092 = vst.msk [vmem:[#allocation2 + $0xa0] sm:$0x3] %vm1073_vm9, %v1039_v12  ;;  %v1175_v30 = vsel %vm3785_vm7, %v1039_v12, 0.0  ;;  %v1197_v4 = vsel %vm3779_vm6, %v1061_v46, 0.0  ;;  %v1198_v47 = vsel %vm4137_vm10, %v1062_v15, 0.0 }
 0x13f   : > { %1114 = vst.msk [vmem:[#allocation2 + $0x150] sm:$0xff] %vm1070_vm8, %v1061_v46  ;;  %v1573_v13 = vadd.f32 %v1572_v58, %v1571_v33  ;;  %1115 = vst.msk [vmem:[#allocation2 + $0x158] sm:$0xff] %vm1070_vm8, %v1062_v15  ;;  %v1199_v45 = vsel %vm3785_vm7, %v1063_v39, 0.0  ;;  %v1258_v41 = vsel %vm1070_vm8, %v1173_v40, 0.0  ;;  %v1259_v22 = vsel %vm1070_vm8, %v1197_v4, 0.0  ;;  %v758_v58 = vpop.permute.xlu1 %757 }
 0x140   : > { %1116 = vst.msk [vmem:[#allocation2 + $0x160] sm:$0x3] %vm1073_vm9, %v1063_v39  ;;  %v1261_v8 = vsel %vm1070_vm8, %v1174_v7, 0.0  ;;  %v1262_v57 = vsel %vm1070_vm8, %v1198_v47, 0.0  ;;  %v1264_v61 = vsel %vm1073_vm9, %v1175_v30, 0.0  ;;  %v1260_v54 = vadd.f32 %v1259_v22, %v1258_v41  ;;  %v3425_v22 = vld [vmem:[%s6081_s1 + $0x20] sm:$0xff] }
 0x141   : > { %v1574_v26 = vrot.slane %v1573_v13, 1  ;;  %v1263_v14 = vadd.f32 %v1262_v57, %v1261_v8  ;;  %v1265_v0 = vsel %vm1073_vm9, %v1199_v45, 0.0  ;;  %v1408_v32 = vmul.f32 %v1173_v40, %v1037_v53 }
 0x142   : > { %v1266_v42 = vadd.f32 %v1265_v0, %v1264_v61  ;;  %v1409_v49 = vmul.f32 %v1174_v7, %v1038_v31  ;;  %v1410_v27 = vmul.f32 %v1175_v30, %v1039_v12  ;;  %v1342_v10 = vsel %vm1070_vm8, %v1260_v54, 0.0  ;;  %v3426_v54 = vld [vmem:[%s6081_s1 + $0x28] sm:$0x3] }
 0x143   : > { %v1575_v35 = vadd.f32 %v1574_v26, %v1573_v13  ;;  %v1343_v59 = vsel %vm1070_vm8, %v1263_v14, 0.0  ;;  %v1432_v21 = vmul.f32 %v1197_v4, %v1061_v46  ;;  %v1433_v62 = vmul.f32 %v1198_v47, %v1062_v15 }
 0x144   : > { %v1344_v34 = vadd.f32 %v1343_v59, %v1342_v10  ;;  %v1345_v37 = vsel %vm1073_vm9, %v1266_v42, 0.0  ;;  %v1434_v11 = vmul.f32 %v1199_v45, %v1063_v39  ;;  %v1492_v18 = vsel %vm1070_vm8, %v1408_v32, 0.0 }
 0x145   : > { %v4747_v51 = vsel %vm1380_vm15, %v1575_v35, %v4655_v24  ;;  %v1493_v29 = vsel %vm1070_vm8, %v1432_v21, 0.0  ;;  %v1495_v25 = vsel %vm1070_vm8, %v1409_v49, 0.0  ;;  %v1496_v55 = vsel %vm1070_vm8, %v1433_v62, 0.0  ;;  %v921_v21 = vpop.permute.xlu1 %920 }
 0x146   : > { %v1346_v33 = vadd.f32 %v1345_v37, %v1344_v34  ;;  %v1494_v63 = vadd.f32 %v1493_v29, %v1492_v18  ;;  %v1498_v3 = vsel %vm1073_vm9, %v1410_v27, 0.0  ;;  %v1497_v17 = vadd.f32 %v1496_v55, %v1495_v25 }
 0x147   : > { %v1499_v53 = vsel %vm1073_vm9, %v1434_v11, 0.0  ;;  %v570_v9 = vmul.f32 %v4661_v28, %v547_v48  ;;  %v571_v46 = vmul.f32 %v4667_v52, %v547_v48  ;;  %v572_v39 = vmul.f32 %v4673_v16, %v547_v48  ;;  %v3421_v28 = vld [vmem:[%s6081_s1] sm:$0xff]  ;;  %v3422_v52 = vld [vmem:[%s6081_s1 + $0x8] sm:$0xff]  ;;  %v3423_v16 = vld [vmem:[%s6081_s1 + $0x10] sm:$0x3] }
 0x148   : > { %v1347_v31 = vrot.slane %v1346_v33, 4  ;;  %v1500_v24 = vadd.f32 %v1499_v53, %v1498_v3  ;;  %v1576_v12 = vsel %vm1070_vm8, %v1494_v63, 0.0  ;;  %v1577_v15 = vsel %vm1070_vm8, %v1497_v17, 0.0  ;;  %v3430_v63 = vld [vmem:[%s6080_s0 + $0x78] sm:$0xff]  ;;  %v3431_v3 = vld [vmem:[%s6080_s0 + $0x80] sm:$0xff] }
 0x149   : > { %v594_v40 = vmul.f32 %v4681_v2, %v547_v48  ;;  %v595_v7 = vmul.f32 %v4687_v56, %v547_v48  ;;  %v1578_v4 = vadd.f32 %v1577_v15, %v1576_v12  ;;  %v407_v47 = vmul.f32 %v3421_v28, %v384_v1  ;;  %v3424_v56 = vld [vmem:[%s6081_s1 + $0x18] sm:$0xff]  ;;  %v3432_v53 = vld [vmem:[%s6080_s0 + $0x88] sm:$0x3] }
 0x14a   : > { %v1348_v30 = vadd.f32 %v1347_v31, %v1346_v33  ;;  %v1579_v13 = vsel %vm1073_vm9, %v1500_v24, 0.0  ;;  %v408_v45 = vmul.f32 %v3422_v52, %v384_v1  ;;  %v409_v2 = vmul.f32 %v3423_v16, %v384_v1 }
 0x14b   : > { %v431_v41 = vmul.f32 %v3424_v56, %v384_v1  ;;  %v432_v8 = vmul.f32 %v3425_v22, %v384_v1  ;;  %v1580_v61 = vadd.f32 %v1579_v13, %v1578_v4  ;;  %v596_v26 = vmul.f32 %v4693_v20, %v547_v48 }
 0x14c   : > { %v1349_v57 = vrot.slane %v1348_v30, 2  ;;  %v433_v14 = vmul.f32 %v3426_v54, %v384_v1  ;;  %v618_v0 = vadd.f32 %v570_v9, %v407_v47  ;;  %v619_v42 = vadd.f32 %v571_v46, %v408_v45 }
 0x14d   : > { %v620_v32 = vadd.f32 %v572_v39, %v409_v2  ;;  %v642_v49 = vadd.f32 %v594_v40, %v431_v41  ;;  %v1581_v35 = vrot.slane %v1580_v61, 4  ;;  %v643_v10 = vadd.f32 %v595_v7, %v432_v8 }
 0x14e   : > { %v1350_v27 = vadd.f32 %v1349_v57, %v1348_v30  ;;  %v644_v59 = vadd.f32 %v596_v26, %v433_v14  ;;  %v781_v34 = vmul.f32 %v4568_v50, %v758_v58  ;;  %v782_v37 = vmul.f32 %v4574_v44, %v758_v58  ;;  %v3427_v50 = vld [vmem:[%s6080_s0 + $0x30] sm:$0xff] }
 0x14f   : > { %v783_v20 = vmul.f32 %v4582_v38, %v758_v58  ;;  %v805_v62 = vmul.f32 %v4588_v5, %v758_v58  ;;  %v1582_v48 = vadd.f32 %v1581_v35, %v1580_v61  ;;  %v806_v1 = vmul.f32 %v4594_v36, %v758_v58  ;;  %v3428_v38 = vld [vmem:[%s6080_s0 + $0x38] sm:$0xff] }
 0x150   : > { %v1351_v11 = vrot.slane %v1350_v27, 1  ;;  %v807_v18 = vmul.f32 %v4601_v6, %v758_v58  ;;  %v3697_v29 = vmov 0.0   ;;  %v944_v44 = vmul.f32 %v3427_v50, %v921_v21  ;;  %v3429_v6 = vld [vmem:[%s6080_s0 + $0x40] sm:$0x3] }
 0x151   : > { %1124 = vst.msk [vmem:[#allocation3] sm:$0xff] %vm1070_vm8, %v3697_v29  ;;  %1125 = vst.msk [vmem:[#allocation4] sm:$0xff] %vm1070_vm8, %v3697_v29  ;;  %v945_v5 = vmul.f32 %v3428_v38, %v921_v21  ;;  %v1583_v36 = vrot.slane %v1582_v48, 2  ;;  %v946_v33 = vmul.f32 %v3429_v6, %v921_v21  ;;  %v968_v55 = vmul.f32 %v3430_v63, %v921_v21 }
 0x152   : > { %v1352_v25 = vadd.f32 %v1351_v11, %v1350_v27  ;;  %v969_v17 = vmul.f32 %v3431_v3, %v921_v21  ;;  %v970_v9 = vmul.f32 %v3432_v53, %v921_v21  ;;  %v992_v31 = vadd.f32 %v944_v44, %v781_v34 }
 0x153   : > { %v993_v24 = vadd.f32 %v945_v5, %v782_v37  ;;  %v1584_v12 = vadd.f32 %v1583_v36, %v1582_v48  ;;  %v994_v46 = vadd.f32 %v946_v33, %v783_v20  ;;  %v1016_v58 = vadd.f32 %v968_v55, %v805_v62 }
 0x154   : > { %v4810_v15 = vsel %vm1382_vm0, %v1352_v25, %v4719_v43  ;;  %v1017_v39 = vadd.f32 %v969_v17, %v806_v1  ;;  %v1018_v40 = vadd.f32 %v970_v9, %v807_v18  ;;  %v1040_v7 = vadd.f32 %v992_v31, %v618_v0 }
 0x155   : > { %v1041_v30 = vadd.f32 %v993_v24, %v619_v42  ;;  %v1585_v4 = vrot.slane %v1584_v12, 1  ;;  %v1042_v13 = vadd.f32 %v994_v46, %v620_v32  ;;  %v1064_v28 = vadd.f32 %v1016_v58, %v642_v49 }
 0x156   : > { %v1065_v47 = vadd.f32 %v1017_v39, %v643_v10  ;;  %v1066_v52 = vadd.f32 %v1018_v40, %v644_v59  ;;  %1093 = vst.msk [vmem:[#allocation2 + $0xa8] sm:$0xff] %vm1070_vm8, %v1040_v7  ;;  %v1176_v45 = vsel %vm3779_vm6, %v1040_v7, 0.0 }
 0x157   : > { %1094 = vst.msk [vmem:[#allocation2 + $0xb0] sm:$0xff] %vm1070_vm8, %v1041_v30  ;;  %v1177_v43 = vsel %vm4137_vm10, %v1041_v30, 0.0  ;;  %v1586_v16 = vadd.f32 %v1585_v4, %v1584_v12  ;;  %1117 = vst.msk [vmem:[#allocation2 + $0x168] sm:$0xff] %vm1070_vm8, %v1064_v28  ;;  %v1178_v2 = vsel %vm3785_vm7, %v1042_v13, 0.0  ;;  %v1200_v56 = vsel %vm3779_vm6, %v1064_v28, 0.0 }
 0x158   : > { %1095 = vst.msk [vmem:[#allocation2 + $0xb8] sm:$0x3] %vm1073_vm9, %v1042_v13  ;;  %v1267_v41 = vsel %vm1070_vm8, %v1176_v45, 0.0  ;;  %1119 = vst.msk [vmem:[#allocation2 + $0x178] sm:$0x3] %vm1073_vm9, %v1066_v52  ;;  %v1201_v22 = vsel %vm4137_vm10, %v1065_v47, 0.0  ;;  %v1411_v32 = vmul.f32 %v1176_v45, %v1040_v7  ;;  %v1412_v49 = vmul.f32 %v1177_v43, %v1041_v30 }
 0x159   : > { %1118 = vst.msk [vmem:[#allocation2 + $0x170] sm:$0xff] %vm1070_vm8, %v1065_v47  ;;  %v1202_v8 = vsel %vm3785_vm7, %v1066_v52, 0.0  ;;  %v1268_v57 = vsel %vm1070_vm8, %v1200_v56, 0.0  ;;  %v1270_v61 = vsel %vm1070_vm8, %v1177_v43, 0.0  ;;  %v1271_v60 = vsel %vm1070_vm8, %v1201_v22, 0.0  ;;  %v1203_v12 = vld [vmem:[#allocation3] sm:$0xff] }
 0x15a   : > { %v1269_v26 = vadd.f32 %v1268_v57, %v1267_v41  ;;  %v1273_v54 = vsel %vm1073_vm9, %v1178_v2, 0.0  ;;  %v1274_v14 = vsel %vm1073_vm9, %v1202_v8, 0.0  ;;  %v1272_v0 = vadd.f32 %v1271_v60, %v1270_v61  ;;  %v1389_v7 = vld [vmem:[#allocation4] sm:$0xff] }
 0x15b   : > { %v1275_v42 = vadd.f32 %v1274_v14, %v1273_v54  ;;  %v1413_v27 = vmul.f32 %v1178_v2, %v1042_v13  ;;  %v1435_v19 = vmul.f32 %v1200_v56, %v1064_v28  ;;  %v1436_v35 = vmul.f32 %v1201_v22, %v1065_v47 }
 0x15c   : > { %v1353_v23 = vsel %vm1070_vm8, %v1269_v26, 0.0  ;;  %v1354_v10 = vsel %vm1070_vm8, %v1272_v0, 0.0  ;;  %v1437_v21 = vmul.f32 %v1202_v8, %v1066_v52  ;;  %v1501_v34 = vsel %vm1070_vm8, %v1411_v32, 0.0 }
 0x15d   : > { %v1356_v59 = vsel %vm1073_vm9, %v1275_v42, 0.0  ;;  %v1355_v37 = vadd.f32 %v1354_v10, %v1353_v23  ;;  %v1502_v20 = vsel %vm1070_vm8, %v1435_v19, 0.0  ;;  %v1504_v62 = vsel %vm1070_vm8, %v1412_v49, 0.0 }
 0x15e   : > { %v1505_v11 = vsel %vm1070_vm8, %v1436_v35, 0.0  ;;  %v1503_v48 = vadd.f32 %v1502_v20, %v1501_v34  ;;  %v1507_v18 = vsel %vm1073_vm9, %v1413_v27, 0.0  ;;  %v1508_v29 = vsel %vm1073_vm9, %v1437_v21, 0.0 }
 0x15f   : > { %v1506_v1 = vadd.f32 %v1505_v11, %v1504_v62  ;;  %v1357_v50 = vadd.f32 %v1356_v59, %v1355_v37  ;;  %v1509_v44 = vadd.f32 %v1508_v29, %v1507_v18  ;;  %v1611_v38 = vsel %vm1382_vm0, %v1586_v16, %v4747_v51 }
 0x160   : > { %v1587_v5 = vsel %vm1070_vm8, %v1503_v48, 0.0 }
 0x161   : > { %v1588_v25 = vsel %vm1070_vm8, %v1506_v1, 0.0  ;;  %v1358_v36 = vrot.slane %v1357_v50, 4  ;;  %v1590_v33 = vsel %vm1073_vm9, %v1509_v44, 0.0 }
 0x162   : > { %v1589_v6 = vadd.f32 %v1588_v25, %v1587_v5 }
 0x163   : > { %v1359_v63 = vadd.f32 %v1358_v36, %v1357_v50 }
 0x164   : > { %v1591_v55 = vadd.f32 %v1590_v33, %v1589_v6 }
 0x165   : > { %v1360_v3 = vrot.slane %v1359_v63, 2 }
 0x166   : > { %v1592_v17 = vrot.slane %v1591_v55, 4 }
 0x167   : > { %v1361_v53 = vadd.f32 %v1360_v3, %v1359_v63 }
 0x168   : > { %v1593_v9 = vadd.f32 %v1592_v17, %v1591_v55 }
 0x169   : > { %v1362_v31 = vrot.slane %v1361_v53, 1 }
 0x16a   : > { %v1594_v24 = vrot.slane %v1593_v9, 2 }
 0x16b   : > { %v1363_v46 = vadd.f32 %v1362_v31, %v1361_v53 }
 0x16c   : > { %v1595_v51 = vadd.f32 %v1594_v24, %v1593_v9 }
 0x16d   : > { %v1385_v58 = vsel %vm1384_vm1, %v1363_v46, %v4810_v15 }
 0x16e   : > { %v1596_v39 = vrot.slane %v1595_v51, 1  ;;  %v1387_v40 = vadd.f32 %v1385_v58, %v1203_v12 }
 0x170   : > { %v1597_v30 = vadd.f32 %v1596_v39, %v1595_v51  ;;  %1388 = vst.msk [vmem:[#allocation3] sm:$0xff] %vm1070_vm8, %v1387_v40 }
 0x172   : > { %v1612_v4 = vsel %vm1384_vm1, %v1597_v30, %v1611_v38 }
 0x173   : > { %v1614_v13 = vadd.f32 %v1612_v4, %v1389_v7 }
 0x175   : > { %1615 = vst.msk [vmem:[#allocation4] sm:$0xff] %vm1070_vm8, %v1614_v13 }
 0x176 PF: > { %p3330_p5 = scmp.ne.s32.totalorder %s3682_s12, 1 }
 0x178   : > { %1619 = sbr.rel (%p3330_p5) target bundleno = 1130 (0x46a), region = 44 }
 0x17d   : > { %v1624_v28 = vld [vmem:[#allocation3] sm:$0xff]  ;;  %vm1625_vm2 = vcmask 146432   ;;  %v1629_v47 = vld [vmem:[#allocation4] sm:$0xff]  ;;  %s3698_s7 = smov 126   ;;  %v3699_v43 = vmov 0   ;;  %v3700_v16 = vmov 5   ;;  %v1723_v14 = vlaneseq }
 0x17e   : > { %v1638_v15 = vld [vmem:[%s6082_s2] sm:$0xff]  ;;  %v1626_v52 = vsel %vm1625_vm2, %v1624_v28, 0.0  ;;  %v1630_v45 = vsel %vm1625_vm2, %v1629_v47, 0.0  ;;  %3433 = vset.pattern.permute.xlu1 %v3699_v43  ;;  %3435 = vset.pattern.permute.xlu0 %v3700_v16  ;;  %vm1654_vm3 = vcmask 7168   ;;  %v3701_v60 = vmov 1966171168  }
 0x17f   : > { %1647 = vrot.lane.b32.xlu1 %v1638_v15, %s3698_s7  ;;  %1627 = vadd.xlane.f32.xlu0 %v1626_v52  ;;  %v1721_v54 = vunpack.c.l.s4 %v3701_v60  ;;  %v1724_v42 = vshrl.u32 %v1723_v14, 7  ;;  %v1642_v23 = vmul.f32 %v1638_v15, %v1638_v15  ;;  %s3702_s12 = smov 124   ;;  %v1872_v44 = vcombine.high %v1638_v15, %v1638_v15  ;;  %s3704_s8 = smov 127  }
 0x180   : > { %vm3171_vm4 = vcmask 130048   ;;  %vm3169_vm5 = vcmask 130049   ;;  %vm3173_vm6 = vcmask 122880  }
 0x181   : > { %v1722_v0 = vunpack.c.0.s8 %v1721_v54  ;;  %v4863_v10 = vsub.s32 0, %v1724_v42 }
 0x183   : > { %1631 = vadd.xlane.f32.xlu0 %v1630_v45  ;;  %v4860_v32 = vsub.s32 %v1722_v0, %v1724_v42 }
 0x185   : > { %v1879_v50 = vrot.slane %v1638_v15, %v4860_v32  ;;  %v1886_v6 = vrot.slane %v1872_v44, %v4860_v32 }
 0x187   : > { %v1887_v36 = vcombine.high %v1879_v50, %v1879_v50  ;;  %v1888_v9 = vcombine.high %v1886_v6, %v1886_v6  ;;  %v1902_v58 = vrot.slane %v1886_v6, %v4860_v32  ;;  %v1895_v13 = vrot.slane %v1879_v50, %v4860_v32 }
 0x189   : > { %v1909_v53 = vrot.slane %v1887_v36, %v4860_v32  ;;  %v1916_v39 = vrot.slane %v1888_v9, %v4860_v32  ;;  %v2164_v30 = vrot.slane %v1902_v58, %v4863_v10  ;;  %v2148_v52 = vrot.slane %v1895_v13, %v4863_v10 }
 0x18b   : > { %v2152_v51 = vrot.slane %v1909_v53, %v4863_v10  ;;  %v1920_v4 = vcombine.high %v1916_v39, %v1916_v39 }
 0x18d   : > { %v4888_v47 = vrot.slane %v1920_v4, %v4863_v10 }
 0x1f1   : > { %v1648_v33 = vpop.permute.xlu1 %1647 }
 0x208   : > { %v1628_v2 = vpop.xlane.xlu0 %1627 }
 0x209   : > { %v1633_v56 = vmul.f32 0.001953125, %v1628_v2  ;;  %v1919_v2 = vcombine.high %v1909_v53, %v1909_v53 }
 0x20b   : > { %1655 = vst.msk [vmem:[#allocation5] sm:$0xff] %vm1654_vm3, %v1633_v56  ;;  %v1635_v22 = vmul.f32 %v1633_v56, %v1633_v56  ;;  %v3703_v56 = vmov 7  }
 0x20c   : > { %v1632_v41 = vpop.xlane.xlu0 %1631 }
 0x20d   : > { %v1634_v8 = vmul.f32 0.001953125, %v1632_v41  ;;  %v2168_v41 = vrot.slane %v1916_v39, %v4863_v10 }
 0x20f   : > { %v1636_v57 = vsub.f32 %v1634_v8, %v1635_v22  ;;  %v2160_v22 = vrot.slane %v1919_v2, %v4863_v10 }
 0x211   : > { %v1637_v61 = vmax.f32 %v1636_v57, 0.0  ;;  %v1918_v57 = vcombine.high %v1902_v58, %v1902_v58 }
 0x212   : > { %v1717_v49 = vld [vmem:[#allocation5] sm:$0xff] }
 0x213   : > { %v1639_v26 = vadd.f32 1e-05, %v1637_v61  ;;  %v1726_v27 = vrot.slane %v1717_v49, %v4860_v32  ;;  %v1643_v35 = vmul.f32 %v1642_v23, %v1637_v61  ;;  %v1719_v29 = vcombine.high %v1717_v49, %v1717_v49 }
 0x215   : > { %3444 = vrsqrt.f32 %v1639_v26  ;;  %v1742_v34 = vrot.slane %v1726_v27, %v4860_v32  ;;  %v1734_v37 = vcombine.high %v1726_v27, %v1726_v27  ;;  %v1733_v25 = vrot.slane %v1719_v29, %v4860_v32 }
 0x217   : > { %v1924_v11 = vrot.slane %v1742_v34, %v4863_v10  ;;  %v1756_v48 = vrot.slane %v1734_v37, %v4860_v32  ;;  %v1764_v18 = vcombine.high %v1742_v34, %v1742_v34  ;;  %v1749_v55 = vrot.slane %v1733_v25, %v4860_v32 }
 0x218   : > { %v1735_v3 = vcombine.high %v1733_v25, %v1733_v25 }
 0x219   : > { %v1928_v1 = vrot.slane %v1756_v48, %v4863_v10  ;;  %v1932_v38 = vrot.slane %v1764_v18, %v4863_v10  ;;  %v1766_v5 = vcombine.high %v1756_v48, %v1756_v48  ;;  %v1940_v12 = vrot.slane %v1749_v55, %v4863_v10 }
 0x21a   : > { %v1763_v46 = vrot.slane %v1735_v3, %v4860_v32  ;;  %v1765_v8 = vcombine.high %v1749_v55, %v1749_v55 }
 0x21b   : > { %v1936_v63 = vrot.slane %v1766_v5, %v4863_v10 }
 0x21c   : > { %v1944_v40 = vrot.slane %v1763_v46, %v4863_v10  ;;  %v1767_v7 = vcombine.high %v1763_v46, %v1763_v46  ;;  %v1948_v61 = vrot.slane %v1765_v8, %v4863_v10 }
 0x21e   : > { %v1952_v28 = vrot.slane %v1767_v7, %v4863_v10 }
 0x222   : > { %v3445_v19 = vpop.eup %3444 }
 0x223   : > { %v1644_v59 = vmul.f32 %v3445_v19, %v3445_v19  ;;  %v1641_v21 = vmul.f32 %v3445_v19, %v1638_v15  ;;  %v1917_v15 = vcombine.high %v1895_v13, %v1895_v13 }
 0x225   : > { %v1645_v20 = vmul.f32 %v1644_v59, %v1643_v35  ;;  %1657 = vrot.lane.b32.xlu1 %v1641_v21, %s3702_s12  ;;  %v1650_v17 = vmul.f32 %v1648_v33, %v1641_v21  ;;  %v2156_v45 = vrot.slane %v1917_v15, %v4863_v10 }
 0x227   : > { %v1651_v62 = vadd.f32 1e-05, %v1645_v20 }
 0x229   : > { %3446 = vrsqrt.f32 %v1651_v62  ;;  %1954 = vperm.xlu1 %3433, %v1924_v11  }
 0x22d   : > { %1958 = vperm.xlu1 %3433, %v1928_v1  }
 0x231   : > { %1962 = vperm.xlu1 %3433, %v1932_v38  }
 0x235   : > { %1966 = vperm.xlu1 %3433, %v1936_v63  }
 0x236   : > { %v3447_v31 = vpop.eup %3446 }
 0x237   : > { %v1653_v24 = vmul.f32 %v3447_v31, %v1650_v17 }
 0x239   : > { %1970 = vperm.xlu1 %3433, %v1940_v12   ;;  %1662 = vrot.lane.b32.xlu0 %v1653_v24, %s3702_s12 }
 0x23d   : > { %1974 = vperm.xlu1 %3433, %v1944_v40   ;;  %2182 = vperm.xlu0 %3435, %v2152_v51  }
 0x241   : > { %1982 = vperm.xlu1 %3433, %v1952_v28   ;;  %2194 = vperm.xlu0 %3435, %v2164_v30  }
 0x245   : > { %2206 = vperm.xlu0 %3435, %v4888_v47   ;;  %3434 = vset.pattern.permute.xlu1 %v3700_v16  ;;  %v4900_v16 = vrot.slane %v1918_v57, %v4863_v10 }
 0x246   : > { %2178 = vperm.xlu1 %3434, %v2148_v52  }
 0x249   : > { %3437 = vset.pattern.permute.xlu0 %v3703_v56 }
 0x24a   : > { %2378 = vperm.xlu0 %3437, %v2156_v45   ;;  %2186 = vperm.xlu1 %3434, %v2156_v45  }
 0x24e   : > { %2390 = vperm.xlu0 %3437, %v2168_v41   ;;  %2190 = vperm.xlu1 %3434, %v2160_v22  }
 0x252   : > { %3438 = vset.pattern.permute.xlu0 %v3699_v43  ;;  %2198 = vperm.xlu1 %3434, %v2168_v41  }
 0x253   : > { %1978 = vperm.xlu0 %3438, %v1948_v61  }
 0x256   : > { %2202 = vperm.xlu1 %3434, %v4900_v16  }
 0x25a   : > { %3436 = vset.pattern.permute.xlu1 %v3703_v56 }
 0x25b   : > { %2370 = vperm.xlu1 %3436, %v2148_v52  }
 0x25f   : > { %2374 = vperm.xlu1 %3436, %v2152_v51  }
 0x263   : > { %2382 = vperm.xlu1 %3436, %v2160_v22  }
 0x267   : > { %2386 = vperm.xlu1 %3436, %v2164_v30  }
 0x26b   : > { %3439 = vset.pattern.permute.xlu1 %v3699_v43 }
 0x297   : > { %v1658_v26 = vpop.permute.xlu1 %1657 }
 0x298   : > { %1660 = vst.msk [vmem:[#allocation6] sm:$0xff] %vm1654_vm3, %v1658_v26  ;;  %v1670_v26 = vld [vmem:[#allocation2 + $0x8] sm:$0xff] }
 0x29f   : > { %v1768_v60 = vld [vmem:[#allocation6] sm:$0xff] }
 0x2a0   : > { %v1777_v54 = vrot.slane %v1768_v60, %v4860_v32  ;;  %v1770_v14 = vcombine.high %v1768_v60, %v1768_v60  ;;  %v1671_v60 = vld [vmem:[#allocation2 + $0x10] sm:$0x3] }
 0x2a2   : > { %v1793_v0 = vrot.slane %v1777_v54, %v4860_v32  ;;  %v1785_v42 = vcombine.high %v1777_v54, %v1777_v54  ;;  %v1784_v49 = vrot.slane %v1770_v14, %v4860_v32  ;;  %v1693_v54 = vld [vmem:[#allocation2 + $0xc0] sm:$0xff]  ;;  %v1694_v14 = vld [vmem:[#allocation2 + $0xc8] sm:$0xff] }
 0x2a4   : > { %v2036_v23 = vrot.slane %v1793_v0, %v4863_v10  ;;  %v1807_v27 = vrot.slane %v1785_v42, %v4860_v32  ;;  %v1815_v19 = vcombine.high %v1793_v0, %v1793_v0  ;;  %v1786_v59 = vcombine.high %v1784_v49, %v1784_v49  ;;  %v1955_v7 = vpop.permute.xlu1 %1954  ;;  %v1695_v0 = vld [vmem:[#allocation2 + $0xd0] sm:$0x3] }
 0x2a5   : > { %v1800_v34 = vrot.slane %v1784_v49, %v4860_v32  ;;  %v1672_v49 = vld [vmem:[#allocation2 + $0x18] sm:$0xff] }
 0x2a6   : > { %2066 = vperm.xlu1 %3439, %v2036_v23   ;;  %v2040_v43 = vrot.slane %v1807_v27, %v4863_v10  ;;  %v1817_v35 = vcombine.high %v1807_v27, %v1807_v27  ;;  %v2044_v21 = vrot.slane %v1815_v19, %v4863_v10  ;;  %v1814_v20 = vrot.slane %v1786_v59, %v4860_v32  ;;  %v1673_v23 = vld [vmem:[#allocation2 + $0x20] sm:$0xff]  ;;  %v1674_v27 = vld [vmem:[#allocation2 + $0x28] sm:$0x3]  ;;  %v1696_v19 = vld [vmem:[#allocation2 + $0xd8] sm:$0xff] }
 0x2a7   : > { %v2052_v11 = vrot.slane %v1800_v34, %v4863_v10  ;;  %v1816_v48 = vcombine.high %v1800_v34, %v1800_v34  ;;  %v1675_v59 = vld [vmem:[#allocation2 + $0x30] sm:$0xff]  ;;  %v1677_v34 = vld [vmem:[#allocation2 + $0x40] sm:$0x3] }
 0x2a8   : > { %2070 = vperm.xlu0 %3438, %v2040_v43   ;;  %v2048_v37 = vrot.slane %v1817_v35, %v4863_v10  ;;  %v2056_v1 = vrot.slane %v1814_v20, %v4863_v10  ;;  %v1818_v18 = vcombine.high %v1814_v20, %v1814_v20  ;;  %v1959_v4 = vpop.permute.xlu1 %1958  ;;  %v1697_v43 = vld [vmem:[#allocation2 + $0xe0] sm:$0xff]  ;;  %v1698_v35 = vld [vmem:[#allocation2 + $0xe8] sm:$0x3]  ;;  %v1700_v20 = vld [vmem:[#allocation2 + $0xf8] sm:$0xff] }
 0x2a9   : > { %v2060_v29 = vrot.slane %v1816_v48, %v4863_v10 }
 0x2aa   : > { %2074 = vperm.xlu1 %3439, %v2044_v21   ;;  %v2064_v50 = vrot.slane %v1818_v18, %v4863_v10  ;;  %v1676_v21 = vld [vmem:[#allocation2 + $0x38] sm:$0xff]  ;;  %v1678_v18 = vld [vmem:[#allocation2 + $0x48] sm:$0xff] }
 0x2ab   : > { %v1663_v62 = vpop.permute.xlu0 %1662 }
 0x2ac   : > { %1665 = vst.msk [vmem:[#allocation7] sm:$0xff] %vm1654_vm3, %v1663_v62  ;;  %2078 = vperm.xlu0 %3438, %v2048_v37   ;;  %v1699_v37 = vld [vmem:[#allocation2 + $0xf0] sm:$0xff]  ;;  %v1701_v62 = vld [vmem:[#allocation2 + $0x100] sm:$0x3] }
 0x2ae   : > { %2082 = vperm.xlu1 %3439, %v2052_v11  }
 0x2b0   : > { %2086 = vperm.xlu0 %3438, %v2056_v1   ;;  %v4975_v1 = vsub.f32 %v1670_v26, %v1955_v7 }
 0x2b2   : > { %2090 = vperm.xlu1 %3439, %v2060_v29   ;;  %6248 = vst [vmem:[#allocation73_spill] sm:$0xff] %v4975_v1  ;;  %v1679_v29 = vld [vmem:[#allocation2 + $0x50] sm:$0xff] }
 0x2b3   : > { %v1819_v44 = vld [vmem:[#allocation7] sm:$0xff] }
 0x2b4   : > { %2094 = vperm.xlu0 %3438, %v2064_v50   ;;  %v1828_v38 = vrot.slane %v1819_v44, %v4860_v32  ;;  %v1821_v5 = vcombine.high %v1819_v44, %v1819_v44  ;;  %v1680_v50 = vld [vmem:[#allocation2 + $0x58] sm:$0x3]  ;;  %v1702_v44 = vld [vmem:[#allocation2 + $0x108] sm:$0xff] }
 0x2b6   : > { %v1844_v25 = vrot.slane %v1828_v38, %v4860_v32  ;;  %v1836_v36 = vcombine.high %v1828_v38, %v1828_v38  ;;  %v1835_v6 = vrot.slane %v1821_v5, %v4860_v32  ;;  %v4977_v38 = vsub.f32 %v1671_v60, %v1955_v7 }
 0x2b7   : > { %v4979_v5 = vsub.f32 %v1693_v54, %v1955_v7  ;;  %v1685_v54 = vld [vmem:[#allocation2 + $0x80] sm:$0xff] }
 0x2b8   : > { %v2260_v33 = vrot.slane %v1844_v25, %v4863_v10  ;;  %v1858_v63 = vrot.slane %v1836_v36, %v4860_v32  ;;  %v1866_v17 = vcombine.high %v1844_v25, %v1844_v25  ;;  %v1837_v53 = vcombine.high %v1835_v6, %v1835_v6  ;;  %6249 = vst [vmem:[#allocation74_spill] sm:$0xff] %v4977_v38 }
 0x2b9   : > { %v1851_v12 = vrot.slane %v1835_v6, %v4860_v32  ;;  %6250 = vst [vmem:[#allocation75_spill] sm:$0xff] %v4979_v5  ;;  %v4981_v25 = vsub.f32 %v1694_v14, %v1955_v7  ;;  %v4983_v36 = vsub.f32 %v1695_v0, %v1955_v7  ;;  %v1703_v6 = vld [vmem:[#allocation2 + $0x110] sm:$0xff]  ;;  %v1686_v14 = vld [vmem:[#allocation2 + $0x88] sm:$0x3]  ;;  %v1708_v0 = vld [vmem:[#allocation2 + $0x138] sm:$0xff] }
 0x2ba   : > { %2290 = vperm.xlu0 %3438, %v2260_v33   ;;  %v2264_v55 = vrot.slane %v1858_v63, %v4863_v10  ;;  %v1868_v3 = vcombine.high %v1858_v63, %v1858_v63  ;;  %v2268_v31 = vrot.slane %v1866_v17, %v4863_v10  ;;  %v1865_v24 = vrot.slane %v1837_v53, %v4860_v32  ;;  %v4939_v32 = vpop.permute.xlu1 %1962  ;;  %v1704_v33 = vld [vmem:[#allocation2 + $0x118] sm:$0x3]  ;;  %v1681_v63 = vld [vmem:[#allocation2 + $0x60] sm:$0xff] }
 0x2bb   : > { %v2276_v58 = vrot.slane %v1851_v12, %v4863_v10  ;;  %v1867_v39 = vcombine.high %v1851_v12, %v1851_v12  ;;  %6251 = vst [vmem:[#allocation76_spill] sm:$0xff] %v4983_v36  ;;  %v4989_v17 = vsub.f32 %v1674_v27, %v1959_v4  ;;  %v4991_v53 = vsub.f32 %v1696_v19, %v1959_v4 }
 0x2bc   : > { %2294 = vperm.xlu1 %3439, %v2264_v55   ;;  %v2272_v9 = vrot.slane %v1868_v3, %v4863_v10  ;;  %v2280_v46 = vrot.slane %v1865_v24, %v4863_v10  ;;  %v1869_v51 = vcombine.high %v1865_v24, %v1865_v24  ;;  %v4985_v55 = vsub.f32 %v1672_v49, %v1959_v4  ;;  %v1705_v24 = vld [vmem:[#allocation2 + $0x120] sm:$0xff] }
 0x2bd   : > { %v2284_v30 = vrot.slane %v1867_v39, %v4863_v10  ;;  %v4987_v3 = vsub.f32 %v1673_v23, %v1959_v4  ;;  %6254 = vst [vmem:[#allocation79_spill] sm:$0xff] %v4989_v17  ;;  %6255 = vst [vmem:[#allocation80_spill] sm:$0xff] %v4991_v53  ;;  %v5003_v39 = vsub.f32 %v1676_v21, %v4939_v32 }
 0x2be   : > { %2302 = vperm.xlu0 %3438, %v2272_v9   ;;  %v2288_v40 = vrot.slane %v1869_v51, %v4863_v10  ;;  %v4941_v13 = vpop.permute.xlu1 %1966  ;;  %6252 = vst [vmem:[#allocation77_spill] sm:$0xff] %v4985_v55  ;;  %v1682_v9 = vld [vmem:[#allocation2 + $0x68] sm:$0xff]  ;;  %v4997_v51 = vsub.f32 %v1698_v35, %v1959_v4  ;;  %v5009_v26 = vsub.f32 %v1699_v37, %v4939_v32 }
 0x2bf   : > { %6253 = vst [vmem:[#allocation78_spill] sm:$0xff] %v4987_v3  ;;  %6260 = vst [vmem:[#allocation85_spill] sm:$0xff] %v5003_v39  ;;  %v5012_v60 = vsub.f32 %v1700_v20, %v4939_v32  ;;  %v5018_v49 = vsub.f32 %v1678_v18, %v4941_v13  ;;  %v5021_v23 = vsub.f32 %v1679_v29, %v4941_v13  ;;  %v1710_v35 = vld [vmem:[#allocation2 + $0x148] sm:$0x3]  ;;  %v1692_v18 = vld [vmem:[#allocation2 + $0xb8] sm:$0x3] }
 0x2c0   : > { %2298 = vperm.xlu1 %3439, %v2268_v31   ;;  %v1683_v31 = vld [vmem:[#allocation2 + $0x70] sm:$0x3]  ;;  %6258 = vst [vmem:[#allocation83_spill] sm:$0xff] %v4997_v51  ;;  %6262 = vst [vmem:[#allocation87_spill] sm:$0xff] %v5009_v26  ;;  %v5024_v27 = vsub.f32 %v1680_v50, %v4941_v13  ;;  %v5027_v19 = vsub.f32 %v1702_v44, %v4941_v13  ;;  %v5032_v21 = vsub.f32 %v1703_v6, %v4941_v13  ;;  %v1714_v29 = vld [vmem:[#allocation2 + $0x168] sm:$0xff] }
 0x2c1   : > { %6263 = vst [vmem:[#allocation88_spill] sm:$0xff] %v5012_v60 }
 0x2c2   : > { %2310 = vperm.xlu0 %3438, %v2280_v46   ;;  %v4943_v28 = vpop.permute.xlu1 %1970  ;;  %v4995_v46 = vsub.f32 %v1697_v43, %v1959_v4  ;;  %v5015_v4 = vsub.f32 %v1701_v62, %v4939_v32  ;;  %v1709_v43 = vld [vmem:[#allocation2 + $0x140] sm:$0xff]  ;;  %v1691_v62 = vld [vmem:[#allocation2 + $0xb0] sm:$0xff] }
 0x2c3   : > { %v5038_v37 = vsub.f32 %v1681_v63, %v4943_v28  ;;  %v5041_v20 = vsub.f32 %v1682_v9, %v4943_v28  ;;  %v5044_v50 = vsub.f32 %v1683_v31, %v4943_v28  ;;  %v5047_v44 = vsub.f32 %v1705_v24, %v4943_v28  ;;  %v1716_v63 = vld [vmem:[#allocation2 + $0x178] sm:$0x3] }
 0x2c4   : > { %2306 = vperm.xlu1 %3439, %v2276_v58   ;;  %6257 = vst [vmem:[#allocation82_spill] sm:$0xff] %v4995_v46  ;;  %v5000_v58 = vsub.f32 %v1675_v59, %v4939_v32  ;;  %6264 = vst [vmem:[#allocation89_spill] sm:$0xff] %v5015_v4  ;;  %v1690_v59 = vld [vmem:[#allocation2 + $0xa8] sm:$0xff] }
 0x2c5   : > { %6266 = vst [vmem:[#allocation91_spill] sm:$0xff] %v5044_v50 }
 0x2c6   : > { %2318 = vperm.xlu0 %3438, %v2288_v40   ;;  %v4945_v15 = vpop.permute.xlu1 %1974  ;;  %6259 = vst [vmem:[#allocation84_spill] sm:$0xff] %v5000_v58  ;;  %v1706_v40 = vld [vmem:[#allocation2 + $0x128] sm:$0xff] }
 0x2c7   : > { %v5050_v6 = vsub.f32 %v1706_v40, %v4943_v28  ;;  %v5062_v31 = vsub.f32 %v1686_v14, %v4945_v15  ;;  %v5065_v24 = vsub.f32 %v1708_v0, %v4945_v15  ;;  %v1688_v40 = vld [vmem:[#allocation2 + $0x98] sm:$0xff] }
 0x2c8   : > { %2314 = vperm.xlu1 %3439, %v2284_v30   ;;  %v1684_v30 = vld [vmem:[#allocation2 + $0x78] sm:$0xff] }
 0x2c9   : > { %6267 = vst [vmem:[#allocation92_spill] sm:$0xff] %v5050_v6  ;;  %v5056_v9 = vsub.f32 %v1684_v30, %v4945_v15  ;;  %v1712_v14 = vld [vmem:[#allocation2 + $0x158] sm:$0xff] }
 0x2ca   : > { %3441 = vset.pattern.permute.xlu0 %v3703_v56  ;;  %v4947_v52 = vpop.permute.xlu1 %1982 }
 0x2cb   : > { %2398 = vperm.xlu0 %3441, %v4888_v47   ;;  %v5074_v30 = vsub.f32 %v1690_v59, %v4947_v52  ;;  %v5080_v0 = vsub.f32 %v1692_v18, %v4947_v52 }
 0x2cc   : > { %3440 = vset.pattern.permute.xlu1 %v3703_v56  ;;  %v4957_v56 = vpop.permute.xlu0 %2182 }
 0x2cd   : > { %2394 = vperm.xlu1 %3440, %v4900_v16   ;;  %v1669_v16 = vld [vmem:[#allocation2] sm:$0xff] }
 0x2ce   : > { %v4949_v10 = vpop.permute.xlu1 %2178  ;;  %v4973_v48 = vsub.f32 %v1669_v16, %v1955_v7  ;;  %v1707_v7 = vld [vmem:[#allocation2 + $0x130] sm:$0x3]  ;;  %v5006_v16 = vsub.f32 %v1677_v34, %v4939_v32  ;;  %v5035_v34 = vsub.f32 %v1704_v33, %v4941_v13 }
 0x2cf   : > { %v5053_v13 = vsub.f32 %v1707_v7, %v4943_v28  ;;  %v1715_v33 = vld [vmem:[#allocation2 + $0x170] sm:$0xff]  ;;  %v5068_v7 = vsub.f32 %v1709_v43, %v4945_v15 }
 0x2d0   : > { %v4961_v22 = vpop.permute.xlu0 %2194  ;;  %6247 = vst [vmem:[#allocation72_spill] sm:$0xff] %v4973_v48  ;;  %6261 = vst [vmem:[#allocation86_spill] sm:$0xff] %v5006_v16  ;;  %v5086_v43 = vsub.f32 %v1715_v33, %v4947_v52 }
 0x2d2   : > { %v4951_v45 = vpop.permute.xlu1 %2186 }
 0x2d4   : > { %v4965_v57 = vpop.permute.xlu0 %2206 }
 0x2d5   : > { %6243 = vst [vmem:[#allocation68_spill] sm:$0xff] %v4965_v57  ;;  %v1687_v57 = vld [vmem:[#allocation2 + $0x90] sm:$0xff] }
 0x2d6   : > { %v4953_v2 = vpop.permute.xlu1 %2190 }
 0x2d7   : > { %6239 = vst [vmem:[#allocation64_spill] sm:$0xff] %v4953_v2 }
 0x2d8   : > { %v4969_v42 = vpop.permute.xlu0 %2378 }
 0x2d9   : > { %6245 = vst [vmem:[#allocation70_spill] sm:$0xff] %v4969_v42  ;;  %v5071_v42 = vsub.f32 %v1710_v35, %v4945_v15 }
 0x2da   : > { %v4955_v47 = vpop.permute.xlu1 %2198 }
 0x2db   : > { %6240 = vst [vmem:[#allocation65_spill] sm:$0xff] %v4955_v47 }
 0x2dc   : > { %v4993_v12 = vpop.permute.xlu0 %2390 }
 0x2dd   : > { %6256 = vst [vmem:[#allocation81_spill] sm:$0xff] %v4993_v12  ;;  %v5059_v12 = vsub.f32 %v1685_v54, %v4945_v15  ;;  %v5077_v54 = vsub.f32 %v1691_v62, %v4947_v52  ;;  %v5089_v15 = vsub.f32 %v1716_v63, %v4947_v52 }
 0x2de   : > { %v4959_v41 = vpop.permute.xlu1 %2202 }
 0x2df   : > { %6241 = vst [vmem:[#allocation66_spill] sm:$0xff] %v4959_v41 }
 0x2e0   : > { %v1979_v28 = vpop.permute.xlu0 %1978 }
 0x2e1   : > { %v5091_v35 = vsub.f32 %v1687_v57, %v1979_v28  ;;  %v5093_v59 = vsub.f32 %v1688_v40, %v1979_v28  ;;  %v5099_v18 = vsub.f32 %v1712_v14, %v1979_v28 }
 0x2e2   : > { %v4963_v8 = vpop.permute.xlu1 %2370 }
 0x2e3   : > { %6242 = vst [vmem:[#allocation67_spill] sm:$0xff] %v4963_v8  ;;  %v5083_v8 = vsub.f32 %v1714_v29, %v4947_v52 }
 0x2e6   : > { %v4967_v61 = vpop.permute.xlu1 %2374 }
 0x2e7   : > { %6244 = vst [vmem:[#allocation69_spill] sm:$0xff] %v4967_v61  ;;  %v1713_v61 = vld [vmem:[#allocation2 + $0x160] sm:$0x3] }
 0x2e8   : > { %v5101_v2 = vsub.f32 %v1713_v61, %v1979_v28 }
 0x2ea   : > { %v4971_v11 = vpop.permute.xlu1 %2382 }
 0x2eb   : > { %6246 = vst [vmem:[#allocation71_spill] sm:$0xff] %v4971_v11  ;;  %v1689_v11 = vld [vmem:[#allocation2 + $0xa0] sm:$0x3] }
 0x2ec   : > { %v5095_v62 = vsub.f32 %v1689_v11, %v1979_v28 }
 0x2ee   : > { %v5029_v32 = vpop.permute.xlu1 %2386 }
 0x2ef   : > { %6265 = vst [vmem:[#allocation90_spill] sm:$0xff] %v5029_v32  ;;  %v1711_v32 = vld [vmem:[#allocation2 + $0x150] sm:$0xff] }
 0x2f0   : > { %v5097_v41 = vsub.f32 %v1711_v32, %v1979_v28 }
 0x321   : > { %v2067_v47 = vpop.permute.xlu1 %2066 }
 0x322   : > { %v2097_v29 = vmul.f32 %v2067_v47, %v4973_v48  ;;  %v2098_v33 = vmul.f32 %v2067_v47, %v4975_v1  ;;  %v2099_v52 = vmul.f32 %v2067_v47, %v4977_v38  ;;  %v2121_v57 = vmul.f32 %v2067_v47, %v4979_v5 }
 0x323   : > { %v2122_v63 = vmul.f32 %v2067_v47, %v4981_v25  ;;  %v2123_v11 = vmul.f32 %v2067_v47, %v4983_v36  ;;  %v2071_v40 = vpop.permute.xlu0 %2070 }
 0x324   : > { %v2100_v32 = vmul.f32 %v2071_v40, %v4985_v55  ;;  %v2101_v14 = vmul.f32 %v2071_v40, %v4987_v3  ;;  %v2102_v61 = vmul.f32 %v2071_v40, %v4989_v17  ;;  %v2124_v28 = vmul.f32 %v2071_v40, %v4991_v53 }
 0x325   : > { %v5114_v48 = vmul.f32 %v2071_v40, %v4995_v46  ;;  %v2126_v38 = vmul.f32 %v2071_v40, %v4997_v51  ;;  %v2075_v1 = vpop.permute.xlu1 %2074  ;;  %v5118_v5 = vadd.f32 %v4949_v10, %v2098_v33  ;;  %v5121_v47 = vadd.f32 %v4949_v10, %v2097_v29 }
 0x326   : > { %v2103_v55 = vmul.f32 %v2075_v1, %v5000_v58  ;;  %v2104_v3 = vmul.f32 %v2075_v1, %v5003_v39  ;;  %v2105_v17 = vmul.f32 %v2075_v1, %v5006_v16  ;;  %v2127_v53 = vmul.f32 %v2075_v1, %v5009_v26 }
 0x327   : > { %6268 = vst [vmem:[#allocation93_spill] sm:$0xff] %v5118_v5  ;;  %6269 = vst [vmem:[#allocation94_spill] sm:$0xff] %v5121_v47  ;;  %v2128_v46 = vmul.f32 %v2075_v1, %v5012_v60  ;;  %v2129_v36 = vmul.f32 %v2075_v1, %v5015_v4  ;;  %v2079_v40 = vpop.permute.xlu0 %2078  ;;  %v5130_v51 = vadd.f32 %v4949_v10, %v2122_v63 }
 0x328   : > { %v5133_v33 = vadd.f32 %v4949_v10, %v2099_v52  ;;  %v2106_v29 = vmul.f32 %v2079_v40, %v5018_v49  ;;  %v2107_v58 = vmul.f32 %v2079_v40, %v5021_v23  ;;  %v2108_v39 = vmul.f32 %v2079_v40, %v5024_v27 }
 0x329   : > { %6270 = vst [vmem:[#allocation95_spill] sm:$0xff] %v5130_v51  ;;  %v5139_v16 = vmul.f32 %v2079_v40, %v5027_v19  ;;  %v5142_v60 = vmul.f32 %v2079_v40, %v5032_v21  ;;  %v5145_v1 = vmul.f32 %v2079_v40, %v5035_v34  ;;  %v2083_v63 = vpop.permute.xlu1 %2082  ;;  %v5148_v51 = vadd.f32 %v4957_v56, %v2100_v32 }
 0x32a   : > { %6271 = vst [vmem:[#allocation96_spill] sm:$0xff] %v5133_v33  ;;  %v5151_v52 = vadd.f32 %v4949_v10, %v2121_v57  ;;  %v2109_v33 = vmul.f32 %v2083_v63, %v5038_v37  ;;  %v2110_v4 = vmul.f32 %v2083_v63, %v5041_v20  ;;  %v2111_v26 = vmul.f32 %v2083_v63, %v5044_v50 }
 0x32b   : > { %6272 = vst [vmem:[#allocation97_spill] sm:$0xff] %v5142_v60  ;;  %6273 = vst [vmem:[#allocation98_spill] sm:$0xff] %v5145_v1  ;;  %v2133_v47 = vmul.f32 %v2083_v63, %v5047_v44  ;;  %v2134_v60 = vmul.f32 %v2083_v63, %v5050_v6  ;;  %v2135_v40 = vmul.f32 %v2083_v63, %v5053_v13  ;;  %v2087_v1 = vpop.permute.xlu0 %2086 }
 0x32c   : > { %6274 = vst [vmem:[#allocation99_spill] sm:$0xff] %v5148_v51  ;;  %6275 = vst [vmem:[#allocation100_spill] sm:$0xff] %v5151_v52  ;;  %v5160_v5 = vadd.f32 %v4957_v56, %v2102_v61  ;;  %v5163_v32 = vadd.f32 %v4949_v10, %v2123_v11  ;;  %v2112_v57 = vmul.f32 %v2087_v1, %v5056_v9 }
 0x32d   : > { %v2113_v52 = vmul.f32 %v2087_v1, %v5059_v12  ;;  %v2114_v51 = vmul.f32 %v2087_v1, %v5062_v31  ;;  %v5169_v50 = vmul.f32 %v2087_v1, %v5065_v24  ;;  %v5172_v6 = vmul.f32 %v2087_v1, %v5068_v7  ;;  %v2091_v61 = vpop.permute.xlu1 %2090 }
 0x32e   : > { %6276 = vst [vmem:[#allocation101_spill] sm:$0xff] %v5160_v5  ;;  %6277 = vst [vmem:[#allocation102_spill] sm:$0xff] %v5163_v32  ;;  %v5175_v63 = vmul.f32 %v2087_v1, %v5071_v42  ;;  %v5178_v5 = vadd.f32 %v4951_v45, %v2104_v3  ;;  %v5181_v10 = vadd.f32 %v4957_v56, %v2101_v14 }
 0x32f   : > { %6278 = vst [vmem:[#allocation103_spill] sm:$0xff] %v5169_v50  ;;  %6279 = vst [vmem:[#allocation104_spill] sm:$0xff] %v5172_v6  ;;  %v5184_v11 = vmul.f32 %v2091_v61, %v5091_v35  ;;  %v2116_v32 = vmul.f32 %v2091_v61, %v5093_v59  ;;  %v5188_v50 = vmul.f32 %v2091_v61, %v5095_v62 }
 0x330   : > { %6280 = vst [vmem:[#allocation105_spill] sm:$0xff] %v5175_v63  ;;  %6281 = vst [vmem:[#allocation106_spill] sm:$0xff] %v5181_v10  ;;  %v5191_v6 = vmul.f32 %v2091_v61, %v5097_v41  ;;  %v5194_v1 = vmul.f32 %v2091_v61, %v5099_v18  ;;  %v5197_v3 = vmul.f32 %v2091_v61, %v5101_v2  ;;  %v2095_v63 = vpop.permute.xlu0 %2094 }
 0x331   : > { %6282 = vst [vmem:[#allocation107_spill] sm:$0xff] %v5184_v11  ;;  %6283 = vst [vmem:[#allocation108_spill] sm:$0xff] %v5188_v50  ;;  %v5200_v14 = vadd.f32 %v4961_v22, %v2110_v4  ;;  %v5203_v11 = vadd.f32 %v4951_v45, %v2103_v55  ;;  %v5206_v10 = vmul.f32 %v2095_v63, %v5074_v30 }
 0x332   : > { %6284 = vst [vmem:[#allocation109_spill] sm:$0xff] %v5191_v6  ;;  %6285 = vst [vmem:[#allocation110_spill] sm:$0xff] %v5194_v1  ;;  %v5209_v50 = vmul.f32 %v2095_v63, %v5077_v54  ;;  %v5212_v6 = vmul.f32 %v2095_v63, %v5080_v0  ;;  %v5215_v1 = vmul.f32 %v2095_v63, %v5083_v8 }
 0x333   : > { %6286 = vst [vmem:[#allocation111_spill] sm:$0xff] %v5197_v3  ;;  %6287 = vst [vmem:[#allocation112_spill] sm:$0xff] %v5206_v10  ;;  %v5218_v61 = vmul.f32 %v2095_v63, %v5086_v43  ;;  %v5221_v4 = vmul.f32 %v2095_v63, %v5089_v15  ;;  %v5224_v55 = vadd.f32 %v4957_v56, %v2124_v28 }
 0x334   : > { %6288 = vst [vmem:[#allocation113_spill] sm:$0xff] %v5209_v50  ;;  %6289 = vst [vmem:[#allocation114_spill] sm:$0xff] %v5212_v6  ;;  %v5227_v3 = vadd.f32 %v4951_v45, %v2105_v17  ;;  %v5230_v50 = vadd.f32 %v4957_v56, %v2126_v38  ;;  %v5233_v6 = vadd.f32 %v4961_v22, %v2109_v33  ;;  %v6293_v38 = vld [vmem:[#allocation64_spill] sm:$0xff] }
 0x335   : > { %6290 = vst [vmem:[#allocation115_spill] sm:$0xff] %v5215_v1  ;;  %6291 = vst [vmem:[#allocation116_spill] sm:$0xff] %v5218_v61  ;;  %v5236_v1 = vadd.f32 %v4951_v45, %v2128_v46  ;;  %v5239_v61 = vadd.f32 %v4961_v22, %v2111_v26  ;;  %v5242_v63 = vadd.f32 %v4961_v22, %v2134_v60  ;;  %v6298_v60 = vld [vmem:[#allocation65_spill] sm:$0xff] }
 0x336   : > { %6292 = vst [vmem:[#allocation117_spill] sm:$0xff] %v5221_v4  ;;  %v5246_v28 = vadd.f32 %v4957_v56, %v5114_v48  ;;  %v5249_v17 = vadd.f32 %v4951_v45, %v2127_v53  ;;  %v5252_v4 = vadd.f32 %v6293_v38, %v2106_v29  ;;  %v5255_v33 = vadd.f32 %v4951_v45, %v2129_v36  ;;  %v2291_v56 = vpop.permute.xlu0 %2290  ;;  %v6303_v45 = vld [vmem:[#allocation66_spill] sm:$0xff] }
 0x337   : > { %v5258_v46 = vadd.f32 %v6293_v38, %v2108_v39  ;;  %v5261_v26 = vadd.f32 %v4961_v22, %v2133_v47  ;;  %v5264_v10 = vadd.f32 %v6298_v60, %v2112_v57  ;;  %v5267_v48 = vadd.f32 %v4961_v22, %v2135_v40  ;;  %v6305_v39 = vld [vmem:[#allocation72_spill] sm:$0xff]  ;;  %v6306_v47 = vld [vmem:[#allocation73_spill] sm:$0xff] }
 0x338   : > { %6294 = vst [vmem:[#allocation118_spill] sm:$0xff] %v5252_v4  ;;  %6295 = vst [vmem:[#allocation119_spill] sm:$0xff] %v5255_v33  ;;  %v5270_v53 = vadd.f32 %v6298_v60, %v2114_v51  ;;  %v5273_v29 = vadd.f32 %v6293_v38, %v2107_v58  ;;  %v5276_v36 = vadd.f32 %v6303_v45, %v2116_v32  ;;  %v6307_v33 = vld [vmem:[#allocation74_spill] sm:$0xff]  ;;  %v6309_v40 = vld [vmem:[#allocation76_spill] sm:$0xff] }
 0x339   : > { %6296 = vst [vmem:[#allocation120_spill] sm:$0xff] %v5258_v46  ;;  %6297 = vst [vmem:[#allocation121_spill] sm:$0xff] %v5261_v26  ;;  %v2321_v46 = vmul.f32 %v2291_v56, %v6305_v39  ;;  %v2322_v26 = vmul.f32 %v2291_v56, %v6306_v47  ;;  %v2323_v57 = vmul.f32 %v2291_v56, %v6307_v33  ;;  %v6312_v39 = vld [vmem:[#allocation77_spill] sm:$0xff]  ;;  %v6313_v33 = vld [vmem:[#allocation78_spill] sm:$0xff] }
 0x33a   : > { %6299 = vst [vmem:[#allocation122_spill] sm:$0xff] %v5264_v10  ;;  %6300 = vst [vmem:[#allocation123_spill] sm:$0xff] %v5267_v48  ;;  %v6308_v10 = vld [vmem:[#allocation75_spill] sm:$0xff]  ;;  %v2346_v22 = vmul.f32 %v2291_v56, %v4981_v25  ;;  %v5286_v51 = vmul.f32 %v2291_v56, %v6309_v40  ;;  %v5289_v58 = vadd.f32 %v6298_v60, %v2113_v52  ;;  %v6315_v25 = vld [vmem:[#allocation80_spill] sm:$0xff] }
 0x33b   : > { %6301 = vst [vmem:[#allocation124_spill] sm:$0xff] %v5270_v53  ;;  %6302 = vst [vmem:[#allocation125_spill] sm:$0xff] %v5273_v29  ;;  %v5282_v4 = vmul.f32 %v2291_v56, %v6308_v10  ;;  %v2295_v53 = vpop.permute.xlu1 %2294  ;;  %v5293_v32 = vadd.f32 %v6293_v38, %v5139_v16  ;;  %v6314_v10 = vld [vmem:[#allocation79_spill] sm:$0xff]  ;;  %v6316_v40 = vld [vmem:[#allocation82_spill] sm:$0xff]  ;;  %v2303_v16 = vpop.permute.xlu0 %2302 }
 0x33c   : > { %6304 = vst [vmem:[#allocation126_spill] sm:$0xff] %v5276_v36  ;;  %6310 = vst [vmem:[#allocation72_spill] sm:$0xff] %v5289_v58  ;;  %v5296_v47 = vmul.f32 %v2295_v53, %v6312_v39  ;;  %v5299_v36 = vmul.f32 %v2295_v53, %v6313_v33  ;;  %v5302_v45 = vmul.f32 %v2295_v53, %v6314_v10  ;;  %v6317_v52 = vld [vmem:[#allocation83_spill] sm:$0xff] }
 0x33d   : > { %6311 = vst [vmem:[#allocation73_spill] sm:$0xff] %v5293_v32  ;;  %v5305_v56 = vmul.f32 %v2295_v53, %v6315_v25  ;;  %v5308_v29 = vmul.f32 %v2295_v53, %v6316_v40  ;;  %v5311_v60 = vmul.f32 %v2295_v53, %v6317_v52  ;;  %v6318_v38 = vld [vmem:[#allocation67_spill] sm:$0xff]  ;;  %v5316_v33 = vmul.f32 %v2303_v16, %v5018_v49  ;;  %v6325_v49 = vld [vmem:[#allocation94_spill] sm:$0xff] }
 0x33e   : > { %v2402_v32 = vadd.f32 %v6318_v38, %v2322_v26  ;;  %v2401_v39 = vadd.f32 %v6318_v38, %v2321_v46  ;;  %v5319_v10 = vmul.f32 %v2303_v16, %v5021_v23  ;;  %v5322_v25 = vmul.f32 %v2303_v16, %v5024_v27  ;;  %v6324_v46 = vld [vmem:[#allocation93_spill] sm:$0xff]  ;;  %v6326_v23 = vld [vmem:[#allocation84_spill] sm:$0xff] }
 0x33f   : > { %v5325_v40 = vmul.f32 %v2303_v16, %v5027_v19  ;;  %v5328_v53 = vmul.f32 %v2303_v16, %v5032_v21  ;;  %v5331_v52 = vmul.f32 %v2303_v16, %v5035_v34  ;;  %v2299_v26 = vpop.permute.xlu1 %2298  ;;  %v6327_v27 = vld [vmem:[#allocation85_spill] sm:$0xff]  ;;  %v6328_v19 = vld [vmem:[#allocation86_spill] sm:$0xff]  ;;  %v6329_v21 = vld [vmem:[#allocation87_spill] sm:$0xff] }
 0x340   : > { %6319 = vst [vmem:[#allocation74_spill] sm:$0xff] %v5319_v10  ;;  %6320 = vst [vmem:[#allocation75_spill] sm:$0xff] %v5322_v25  ;;  %v5334_v58 = vmul.f32 %v2402_v32, %v6324_v46  ;;  %v5337_v48 = vmul.f32 %v2401_v39, %v6325_v49  ;;  %v5340_v10 = vmul.f32 %v2299_v26, %v6326_v23  ;;  %v6330_v34 = vld [vmem:[#allocation88_spill] sm:$0xff]  ;;  %v2311_v46 = vpop.permute.xlu0 %2310 }
 0x341   : > { %6321 = vst [vmem:[#allocation76_spill] sm:$0xff] %v5325_v40  ;;  %6322 = vst [vmem:[#allocation77_spill] sm:$0xff] %v5328_v53  ;;  %v2328_v25 = vmul.f32 %v2299_v26, %v6327_v27  ;;  %v5344_v40 = vmul.f32 %v2299_v26, %v6328_v19  ;;  %v5347_v53 = vmul.f32 %v2299_v26, %v6329_v21 }
 0x342   : > { %6323 = vst [vmem:[#allocation78_spill] sm:$0xff] %v5331_v52  ;;  %v5350_v16 = vmul.f32 %v2299_v26, %v6330_v34  ;;  %v6331_v52 = vld [vmem:[#allocation89_spill] sm:$0xff]  ;;  %v2498_v39 = vmul.f32 0.5, %v5334_v58  ;;  %v2497_v49 = vmul.f32 0.5, %v5337_v48  ;;  %v5358_v23 = vmul.f32 %v2311_v46, %v5056_v9 }
 0x343   : > { %v5353_v32 = vmul.f32 %v2299_v26, %v6331_v52  ;;  %v5361_v27 = vmul.f32 %v2311_v46, %v5059_v12  ;;  %v5364_v19 = vmul.f32 %v2311_v46, %v5062_v31  ;;  %v5367_v21 = vmul.f32 %v2311_v46, %v5065_v24  ;;  %v2307_v34 = vpop.permute.xlu1 %2306  ;;  %v6335_v31 = vld [vmem:[#allocation91_spill] sm:$0xff] }
 0x344   : > { %6332 = vst [vmem:[#allocation79_spill] sm:$0xff] %v5358_v23  ;;  %v5370_v52 = vmul.f32 %v2311_v46, %v5068_v7  ;;  %v5373_v26 = vmul.f32 %v2311_v46, %v5071_v42  ;;  %3448 = vtanh.f32 %v2498_v39  ;;  %v2426_v9 = vadd.f32 %v6318_v38, %v2346_v22  ;;  %v6336_v7 = vld [vmem:[#allocation92_spill] sm:$0xff]  ;;  %v2319_v46 = vpop.permute.xlu0 %2318  ;;  %v6337_v22 = vld [vmem:[#allocation95_spill] sm:$0xff] }
 0x345   : > { %6333 = vst [vmem:[#allocation80_spill] sm:$0xff] %v5361_v27  ;;  %v5377_v23 = vmul.f32 %v2307_v34, %v5038_v37  ;;  %v2334_v12 = vmul.f32 %v2307_v34, %v5041_v20  ;;  %v5381_v27 = vmul.f32 %v2307_v34, %v6335_v31  ;;  %v5384_v24 = vmul.f32 %v2307_v34, %v5047_v44 }
 0x346   : > { %6334 = vst [vmem:[#allocation82_spill] sm:$0xff] %v5370_v52  ;;  %v5387_v52 = vmul.f32 %v2307_v34, %v6336_v7  ;;  %v5390_v42 = vmul.f32 %v2307_v34, %v5053_v13  ;;  %3450 = vtanh.f32 %v2497_v49  ;;  %v5393_v39 = vmul.f32 %v2426_v9, %v6337_v22 }
 0x347   : > { %v5396_v37 = vmul.f32 %v2319_v46, %v5074_v30  ;;  %v2343_v20 = vmul.f32 %v2319_v46, %v5077_v54  ;;  %v5400_v31 = vmul.f32 %v2319_v46, %v5080_v0  ;;  %v5403_v44 = vmul.f32 %v2319_v46, %v5083_v8  ;;  %v2315_v49 = vpop.permute.xlu1 %2314 }
 0x348   : > { %v2367_v7 = vmul.f32 %v2319_v46, %v5086_v43  ;;  %v5407_v13 = vmul.f32 %v2319_v46, %v5089_v15  ;;  %v2522_v34 = vmul.f32 0.5, %v5393_v39  ;;  %v2403_v9 = vadd.f32 %v6318_v38, %v2323_v57  ;;  %v6341_v57 = vld [vmem:[#allocation96_spill] sm:$0xff] }
 0x349   : > { %6338 = vst [vmem:[#allocation83_spill] sm:$0xff] %v5400_v31  ;;  %6339 = vst [vmem:[#allocation67_spill] sm:$0xff] %v5403_v44  ;;  %v5412_v30 = vmul.f32 %v2315_v49, %v5091_v35  ;;  %v5415_v54 = vmul.f32 %v2315_v49, %v5093_v59  ;;  %v5418_v0 = vmul.f32 %v2315_v49, %v5095_v62  ;;  %v5432_v35 = vpop.permute.xlu0 %2398  ;;  %v6342_v59 = vld [vmem:[#allocation69_spill] sm:$0xff] }
 0x34a   : > { %6340 = vst [vmem:[#allocation93_spill] sm:$0xff] %v5407_v13  ;;  %v5421_v8 = vmul.f32 %v2315_v49, %v5097_v41  ;;  %v5424_v43 = vmul.f32 %v2315_v49, %v5099_v18  ;;  %v5427_v15 = vmul.f32 %v2315_v49, %v5101_v2  ;;  %3452 = vtanh.f32 %v2522_v34 }
 0x34b   : > { %v5430_v46 = vmul.f32 %v2403_v9, %v6341_v57  ;;  %v2404_v22 = vadd.f32 %v6342_v59, %v5296_v47  ;;  %v2425_v62 = vadd.f32 %v6318_v38, %v5282_v4  ;;  %v2406_v41 = vadd.f32 %v6342_v59, %v5302_v45  ;;  %v6345_v9 = vld [vmem:[#allocation70_spill] sm:$0xff]  ;;  %v6346_v47 = vld [vmem:[#allocation99_spill] sm:$0xff]  ;;  %v6347_v4 = vld [vmem:[#allocation100_spill] sm:$0xff] }
 0x34c   : > { %v2427_v18 = vadd.f32 %v6318_v38, %v5286_v51  ;;  %v5443_v2 = vadd.f32 %v5432_v35, %v2343_v20  ;;  %v5446_v49 = vadd.f32 %v5432_v35, %v2367_v7  ;;  %v2408_v57 = vadd.f32 %v6345_v9, %v2328_v25  ;;  %v6348_v45 = vld [vmem:[#allocation101_spill] sm:$0xff]  ;;  %v6349_v38 = vld [vmem:[#allocation102_spill] sm:$0xff] }
 0x34d   : > { %v2499_v34 = vmul.f32 0.5, %v5430_v46  ;;  %v5451_v13 = vmul.f32 %v2404_v22, %v6346_v47  ;;  %v5454_v44 = vmul.f32 %v2425_v62, %v6347_v4  ;;  %v5457_v31 = vmul.f32 %v2406_v41, %v6348_v45  ;;  %v6350_v25 = vld [vmem:[#allocation90_spill] sm:$0xff] }
 0x34e   : > { %6343 = vst [vmem:[#allocation94_spill] sm:$0xff] %v5443_v2  ;;  %6344 = vst [vmem:[#allocation84_spill] sm:$0xff] %v5446_v49  ;;  %v5460_v51 = vmul.f32 %v2427_v18, %v6349_v38  ;;  %v5463_v20 = vmul.f32 %v2408_v57, %v5178_v5  ;;  %v2405_v7 = vadd.f32 %v6342_v59, %v5299_v36  ;;  %v6351_v4 = vld [vmem:[#allocation106_spill] sm:$0xff] }
 0x34f   : > { %3454 = vtanh.f32 %v2499_v34  ;;  %v2414_v49 = vadd.f32 %v6350_v25, %v2334_v12  ;;  %v2500_v22 = vmul.f32 0.5, %v5451_v13  ;;  %v2521_v62 = vmul.f32 0.5, %v5454_v44 }
 0x350   : > { %v2502_v47 = vmul.f32 0.5, %v5457_v31  ;;  %v2523_v41 = vmul.f32 0.5, %v5460_v51  ;;  %v2504_v18 = vmul.f32 0.5, %v5463_v20  ;;  %v5474_v34 = vmul.f32 %v2405_v7, %v6351_v4 }
 0x351   : > { %v5477_v5 = vmul.f32 %v2414_v49, %v5200_v14  ;;  %v2407_v36 = vadd.f32 %v6345_v9, %v5340_v10  ;;  %v3449_v12 = vpop.eup %3448  ;;  %3456 = vtanh.f32 %v2500_v22  ;;  %v2428_v57 = vadd.f32 %v6342_v59, %v5305_v56 }
 0x352   : > { %v2409_v45 = vadd.f32 %v6345_v9, %v5344_v40  ;;  %v2430_v38 = vadd.f32 %v6342_v59, %v5311_v60  ;;  %v2594_v2 = vadd.f32 1.0, %v3449_v12  ;;  %3458 = vtanh.f32 %v2521_v62 }
 0x353   : > { %v2501_v7 = vmul.f32 0.5, %v5474_v34  ;;  %v2510_v14 = vmul.f32 0.5, %v5477_v5  ;;  %v3451_v49 = vpop.eup %3450  ;;  %3460 = vtanh.f32 %v2502_v47  ;;  %v5490_v10 = vmul.f32 %v2407_v36, %v5203_v11 }
 0x354   : > { %v5493_v22 = vmul.f32 %v2428_v57, %v5224_v55  ;;  %v5496_v56 = vmul.f32 %v2409_v45, %v5227_v3  ;;  %v2642_v40 = vmul.f32 0.5, %v2594_v2  ;;  %v2593_v4 = vadd.f32 1.0, %v3451_v49 }
 0x355   : > { %3462 = vtanh.f32 %v2523_v41  ;;  %v5499_v60 = vmul.f32 %v2430_v38, %v5230_v50  ;;  %v2503_v62 = vmul.f32 0.5, %v5490_v10  ;;  %v2413_v50 = vadd.f32 %v6350_v25, %v5377_v23 }
 0x356   : > { %3464 = vtanh.f32 %v2504_v18  ;;  %v2524_v47 = vmul.f32 0.5, %v5493_v22  ;;  %v2505_v11 = vmul.f32 0.5, %v5496_v56  ;;  %v5505_v36 = vmul.f32 %v2642_v40, %v5334_v58 }
 0x357   : > { %v2641_v55 = vmul.f32 0.5, %v2593_v4  ;;  %3466 = vtanh.f32 %v2501_v7  ;;  %v2526_v3 = vmul.f32 0.5, %v5499_v60  ;;  %v3453_v2 = vpop.eup %3452  ;;  %v2432_v41 = vadd.f32 %v6345_v9, %v5350_v16 }
 0x358   : > { %3468 = vtanh.f32 %v2510_v14  ;;  %v2415_v18 = vadd.f32 %v6350_v25, %v5381_v27  ;;  %v2738_v12 = vmul.f32 0.5, %v5505_v36  ;;  %v2618_v57 = vadd.f32 1.0, %v3453_v2 }
 0x359   : > { %v5516_v58 = vmul.f32 %v2641_v55, %v5337_v48  ;;  %3470 = vtanh.f32 %v2503_v62  ;;  %v5519_v45 = vmul.f32 %v2413_v50, %v5233_v6  ;;  %v5522_v38 = vmul.f32 %v2432_v41, %v5236_v1  ;;  %v6352_v62 = vld [vmem:[#allocation71_spill] sm:$0xff]  ;;  %v6353_v41 = vld [vmem:[#allocation118_spill] sm:$0xff] }
 0x35a   : > { %3472 = vtanh.f32 %v2524_v47  ;;  %v5525_v23 = vmul.f32 %v2415_v18, %v5239_v61  ;;  %v2666_v27 = vmul.f32 0.5, %v2618_v57  ;;  %v2438_v48 = vadd.f32 %v6350_v25, %v5387_v52 }
 0x35b   : > { %3474 = vtanh.f32 %v2738_v12  ;;  %v2737_v16 = vmul.f32 0.5, %v5516_v58  ;;  %v2509_v14 = vmul.f32 0.5, %v5519_v45  ;;  %v2528_v6 = vmul.f32 0.5, %v5522_v38 }
 0x35c   : > { %v3455_v7 = vpop.eup %3454  ;;  %3476 = vtanh.f32 %v2505_v11  ;;  %v2511_v49 = vmul.f32 0.5, %v5525_v23  ;;  %v5534_v1 = vmul.f32 %v2666_v27, %v5393_v39  ;;  %v5537_v40 = vmul.f32 %v2438_v48, %v5242_v63 }
 0x35d   : > { %3478 = vtanh.f32 %v2737_v16  ;;  %v2595_v61 = vadd.f32 1.0, %v3455_v7  ;;  %v2429_v52 = vadd.f32 %v6342_v59, %v5308_v29  ;;  %v2431_v4 = vadd.f32 %v6345_v9, %v5347_v53 }
 0x35e   : > { %3480 = vtanh.f32 %v2526_v3  ;;  %v2410_v47 = vadd.f32 %v6352_v62, %v5316_v33  ;;  %v3457_v11 = vpop.eup %3456  ;;  %v2762_v55 = vmul.f32 0.5, %v5534_v1  ;;  %v2534_v39 = vmul.f32 0.5, %v5537_v40 }
 0x35f   : > { %v2643_v2 = vmul.f32 0.5, %v2595_v61  ;;  %3482 = vtanh.f32 %v2509_v14  ;;  %v3459_v50 = vpop.eup %3458  ;;  %v2596_v63 = vadd.f32 1.0, %v3457_v11  ;;  %v5548_v3 = vmul.f32 %v2429_v52, %v5246_v28 }
 0x360   : > { %3484 = vtanh.f32 %v2528_v6  ;;  %v5551_v29 = vmul.f32 %v2431_v4, %v5249_v17  ;;  %v3461_v53 = vpop.eup %3460  ;;  %v2617_v59 = vadd.f32 1.0, %v3459_v50  ;;  %v5557_v18 = vmul.f32 %v2410_v47, %v6353_v41 }
 0x361   : > { %3486 = vtanh.f32 %v2762_v55  ;;  %v5554_v33 = vmul.f32 %v2643_v2, %v5430_v46  ;;  %v2644_v57 = vmul.f32 0.5, %v2596_v63  ;;  %v2598_v16 = vadd.f32 1.0, %v3461_v53 }
 0x362   : > { %v3463_v12 = vpop.eup %3462  ;;  %3488 = vtanh.f32 %v2511_v49  ;;  %v2525_v27 = vmul.f32 0.5, %v5548_v3  ;;  %v2665_v17 = vmul.f32 0.5, %v2617_v59 }
 0x363   : > { %v3465_v28 = vpop.eup %3464  ;;  %v2739_v48 = vmul.f32 0.5, %v5554_v33  ;;  %v2619_v7 = vadd.f32 1.0, %v3463_v12  ;;  %3490 = vtanh.f32 %v2534_v39  ;;  %v5562_v46 = vmul.f32 %v2644_v57, %v5451_v13 }
 0x364   : > { %v3467_v14 = vpop.eup %3466  ;;  %v2646_v6 = vmul.f32 0.5, %v2598_v16  ;;  %v2600_v61 = vadd.f32 1.0, %v3465_v28  ;;  %3492 = vtanh.f32 %v2525_v27  ;;  %v5565_v4 = vmul.f32 %v2665_v17, %v5454_v44 }
 0x365   : > { %v3469_v52 = vpop.eup %3468  ;;  %3494 = vtanh.f32 %v2739_v48  ;;  %v2667_v49 = vmul.f32 0.5, %v2619_v7  ;;  %v2597_v47 = vadd.f32 1.0, %v3467_v14  ;;  %v2740_v55 = vmul.f32 0.5, %v5562_v46 }
 0x366   : > { %v3471_v11 = vpop.eup %3470  ;;  %v5569_v2 = vmul.f32 %v2646_v6, %v5457_v31  ;;  %v2648_v39 = vmul.f32 0.5, %v2600_v61  ;;  %v2606_v50 = vadd.f32 1.0, %v3469_v52  ;;  %v2761_v63 = vmul.f32 0.5, %v5565_v4 }
 0x367   : > { %v3473_v13 = vpop.eup %3472  ;;  %v5573_v53 = vmul.f32 %v2667_v49, %v5460_v51  ;;  %v2645_v59 = vmul.f32 0.5, %v2597_v47  ;;  %v2599_v41 = vadd.f32 1.0, %v3471_v11  ;;  %3496 = vtanh.f32 %v2740_v55 }
 0x368   : > { %v3475_v44 = vpop.eup %3474  ;;  %v2742_v12 = vmul.f32 0.5, %v5569_v2  ;;  %v5577_v57 = vmul.f32 %v2648_v39, %v5463_v20  ;;  %v2654_v16 = vmul.f32 0.5, %v2606_v50  ;;  %3498 = vtanh.f32 %v2761_v63 }
 0x369   : > { %v3477_v31 = vpop.eup %3476  ;;  %v2834_v27 = vadd.f32 1.0, %v3475_v44  ;;  %v2763_v28 = vmul.f32 0.5, %v5573_v53  ;;  %v5581_v48 = vmul.f32 %v2645_v59, %v5474_v34  ;;  %v2647_v14 = vmul.f32 0.5, %v2599_v41 }
 0x36a   : > { %v3479_v51 = vpop.eup %3478  ;;  %3500 = vtanh.f32 %v2742_v12  ;;  %v2744_v17 = vmul.f32 0.5, %v5577_v57  ;;  %v5585_v7 = vmul.f32 %v2654_v16, %v5477_v5  ;;  %v2620_v11 = vadd.f32 1.0, %v3473_v13 }
 0x36b   : > { %v3481_v6 = vpop.eup %3480  ;;  %v2882_v20 = vmul.f32 0.5, %v2834_v27  ;;  %v2833_v61 = vadd.f32 1.0, %v3479_v51  ;;  %3502 = vtanh.f32 %v2763_v28  ;;  %v2741_v52 = vmul.f32 0.5, %v5581_v48 }
 0x36c   : > { %v3483_v49 = vpop.eup %3482  ;;  %3504 = vtanh.f32 %v2744_v17  ;;  %v2750_v47 = vmul.f32 0.5, %v5585_v7  ;;  %v5590_v34 = vmul.f32 %v2647_v14, %v5490_v10  ;;  %v2601_v50 = vadd.f32 1.0, %v3477_v31 }
 0x36d   : > { %v3485_v55 = vpop.eup %3484  ;;  %v2930_v39 = vmul.f32 %v2882_v20, %v5505_v36  ;;  %v2881_v5 = vmul.f32 0.5, %v2833_v61  ;;  %3506 = vtanh.f32 %v2741_v52  ;;  %v2668_v41 = vmul.f32 0.5, %v2620_v11 }
 0x36e   : > { %v3487_v63 = vpop.eup %3486  ;;  %3508 = vtanh.f32 %v2750_v47  ;;  %v2743_v59 = vmul.f32 0.5, %v5590_v34  ;;  %v2622_v44 = vadd.f32 1.0, %v3481_v6  ;;  %v2649_v13 = vmul.f32 0.5, %v2601_v50 }
 0x36f   : > { %v3489_v12 = vpop.eup %3488  ;;  %3027 = vrot.lane.b32.xlu0 %v2930_v39, %s3704_s8  ;;  %v2929_v10 = vmul.f32 %v2881_v5, %v5516_v58  ;;  %v2858_v16 = vadd.f32 1.0, %v3487_v63  ;;  %v2605_v27 = vadd.f32 1.0, %v3483_v49  ;;  %v5597_v36 = vmul.f32 %v2668_v41, %v5493_v22 }
 0x370   : > { %v3491_v28 = vpop.eup %3490  ;;  %3510 = vtanh.f32 %v2743_v59  ;;  %v2670_v31 = vmul.f32 0.5, %v2622_v44  ;;  %v2624_v51 = vadd.f32 1.0, %v3485_v55  ;;  %v5601_v6 = vmul.f32 %v2649_v13, %v5496_v56 }
 0x371   : > { %v3493_v17 = vpop.eup %3492  ;;  %3025 = vrot.lane.b32.xlu1 %v2929_v10, %s3704_s8  ;;  %v2906_v14 = vmul.f32 0.5, %v2858_v16  ;;  %v2653_v20 = vmul.f32 0.5, %v2605_v27  ;;  %v2607_v61 = vadd.f32 1.0, %v3489_v12  ;;  %v2764_v52 = vmul.f32 0.5, %v5597_v36 }
 0x372   : > { %v3495_v58 = vpop.eup %3494  ;;  %v5605_v49 = vmul.f32 %v2670_v31, %v5499_v60  ;;  %v2672_v47 = vmul.f32 0.5, %v2624_v51  ;;  %v2630_v22 = vadd.f32 1.0, %v3491_v28  ;;  %v2745_v39 = vmul.f32 0.5, %v5601_v6 }
 0x373   : > { %v2954_v11 = vmul.f32 %v2906_v14, %v5534_v1  ;;  %v2835_v55 = vadd.f32 1.0, %v3495_v58  ;;  %v5610_v5 = vmul.f32 %v2653_v20, %v5519_v45  ;;  %3512 = vtanh.f32 %v2764_v52 }
 0x374   : > { %v2766_v56 = vmul.f32 0.5, %v5605_v49  ;;  %v5614_v50 = vmul.f32 %v2672_v47, %v5522_v38  ;;  %v2655_v63 = vmul.f32 0.5, %v2607_v61  ;;  %v3497_v59 = vpop.eup %3496  ;;  %3514 = vtanh.f32 %v2745_v39 }
 0x375   : > { %3075 = vrot.lane.b32.xlu0 %v2954_v11, %s3704_s8  ;;  %v2883_v60 = vmul.f32 0.5, %v2835_v55  ;;  %v2749_v1 = vmul.f32 0.5, %v5610_v5  ;;  %v2678_v41 = vmul.f32 0.5, %v2630_v22  ;;  %v3499_v44 = vpop.eup %3498  ;;  %v2836_v12 = vadd.f32 1.0, %v3497_v59 }
 0x376   : > { %3516 = vtanh.f32 %v2766_v56  ;;  %v2768_v45 = vmul.f32 0.5, %v5614_v50  ;;  %v5620_v10 = vmul.f32 %v2655_v63, %v5525_v23  ;;  %v2857_v13 = vadd.f32 1.0, %v3499_v44 }
 0x377   : > { %v3501_v16 = vpop.eup %3500  ;;  %v2931_v38 = vmul.f32 %v2883_v60, %v5554_v33  ;;  %3518 = vtanh.f32 %v2749_v1  ;;  %v5624_v27 = vmul.f32 %v2678_v41, %v5537_v40  ;;  %v2884_v31 = vmul.f32 0.5, %v2836_v12 }
 0x378   : > { %v3503_v28 = vpop.eup %3502  ;;  %v2838_v51 = vadd.f32 1.0, %v3501_v16  ;;  %3520 = vtanh.f32 %v2768_v45  ;;  %v2751_v14 = vmul.f32 0.5, %v5620_v10  ;;  %v2905_v61 = vmul.f32 0.5, %v2857_v13 }
 0x379   : > { %v3505_v20 = vpop.eup %3504  ;;  %3029 = vrot.lane.b32.xlu1 %v2931_v38, %s3704_s8  ;;  %v2859_v23 = vadd.f32 1.0, %v3503_v28  ;;  %v2774_v58 = vmul.f32 0.5, %v5624_v27  ;;  %v2621_v52 = vadd.f32 1.0, %v3493_v17  ;;  %v2932_v47 = vmul.f32 %v2884_v31, %v5562_v46  ;;  %v6354_v28 = vld [vmem:[#allocation75_spill] sm:$0xff] }
 0x37a   : > { %v3507_v33 = vpop.eup %3506  ;;  %v2886_v22 = vmul.f32 0.5, %v2838_v51  ;;  %v2840_v40 = vadd.f32 1.0, %v3505_v20  ;;  %3522 = vtanh.f32 %v2751_v14  ;;  %v2953_v55 = vmul.f32 %v2905_v61, %v5565_v4  ;;  %v6356_v20 = vld [vmem:[#allocation120_spill] sm:$0xff] }
 0x37b   : > { %v3509_v11 = vpop.eup %3508  ;;  %v2907_v39 = vmul.f32 0.5, %v2859_v23  ;;  %v2837_v56 = vadd.f32 1.0, %v3507_v33  ;;  %3524 = vtanh.f32 %v2774_v58  ;;  %3031 = vrot.lane.b32.xlu0 %v2932_v47, %s3704_s8  ;;  %v2669_v1 = vmul.f32 0.5, %v2621_v52  ;;  %v6358_v23 = vld [vmem:[#allocation81_spill] sm:$0xff] }
 0x37c   : > { %v2934_v63 = vmul.f32 %v2886_v22, %v5569_v2  ;;  %v2888_v59 = vmul.f32 0.5, %v2840_v40  ;;  %v2846_v60 = vadd.f32 1.0, %v3509_v11  ;;  %v2527_v44 = vmul.f32 0.5, %v5551_v29 }
 0x37d   : > { %v3511_v17 = vpop.eup %3510  ;;  %3073 = vrot.lane.b32.xlu1 %v2953_v55, %s3704_s8  ;;  %v2955_v46 = vmul.f32 %v2907_v39, %v5573_v53  ;;  %v2885_v41 = vmul.f32 0.5, %v2837_v56  ;;  %v2506_v4 = vmul.f32 0.5, %v5557_v18  ;;  %v5639_v38 = vmul.f32 %v2669_v1, %v5548_v3  ;;  %v6355_v3 = vld [vmem:[#allocation119_spill] sm:$0xff]  ;;  %v6359_v39 = vld [vmem:[#allocation121_spill] sm:$0xff] }
 0x37e   : > { %v2936_v12 = vmul.f32 %v2888_v59, %v5577_v57  ;;  %v2894_v45 = vmul.f32 0.5, %v2846_v60  ;;  %v2839_v16 = vadd.f32 1.0, %v3511_v17  ;;  %3526 = vtanh.f32 %v2527_v44  ;;  %v6361_v1 = vld [vmem:[#allocation123_spill] sm:$0xff] }
 0x37f   : > { %v2933_v2 = vmul.f32 %v2885_v41, %v5581_v48  ;;  %v2433_v13 = vadd.f32 %v6345_v9, %v5353_v32  ;;  %v2412_v53 = vadd.f32 %v6352_v62, %v6354_v28  ;;  %3035 = vrot.lane.b32.xlu0 %v2934_v63, %s3704_s8  ;;  %v2765_v57 = vmul.f32 0.5, %v5639_v38  ;;  %v6357_v9 = vld [vmem:[#allocation79_spill] sm:$0xff] }
 0x380   : > { %v2942_v31 = vmul.f32 %v2894_v45, %v5585_v7  ;;  %v2887_v51 = vmul.f32 0.5, %v2839_v16  ;;  %3528 = vtanh.f32 %v2506_v4  ;;  %v3513_v14 = vpop.eup %3512  ;;  %v2437_v32 = vadd.f32 %v6350_v25, %v5384_v24 }
 0x381   : > { %3077 = vrot.lane.b32.xlu1 %v2955_v46, %s3704_s8  ;;  %v5651_v48 = vmul.f32 %v2433_v13, %v6355_v3  ;;  %v5654_v61 = vmul.f32 %v2412_v53, %v6356_v20  ;;  %v2416_v58 = vadd.f32 %v6358_v23, %v6357_v9  ;;  %v3515_v7 = vpop.eup %3514  ;;  %v2860_v33 = vadd.f32 1.0, %v3513_v14 }
 0x382   : > { %v2935_v52 = vmul.f32 %v2887_v51, %v5590_v34  ;;  %3530 = vtanh.f32 %v2765_v57  ;;  %v2439_v47 = vadd.f32 %v6350_v25, %v5390_v42  ;;  %v2841_v40 = vadd.f32 1.0, %v3515_v7  ;;  %v6360_v34 = vld [vmem:[#allocation122_spill] sm:$0xff]  ;;  %v5680_v51 = vpop.permute.xlu1 %2394  ;;  %v6363_v7 = vld [vmem:[#allocation124_spill] sm:$0xff] }
 0x383   : > { %v3517_v22 = vpop.eup %3516  ;;  %v2529_v11 = vmul.f32 0.5, %v5651_v48  ;;  %v2508_v55 = vmul.f32 0.5, %v5654_v61  ;;  %v5666_v56 = vmul.f32 %v2437_v32, %v6359_v39  ;;  %3039 = vrot.lane.b32.xlu0 %v2936_v12, %s3704_s8  ;;  %v2908_v63 = vmul.f32 0.5, %v2860_v33  ;;  %v6367_v39 = vld [vmem:[#allocation107_spill] sm:$0xff] }
 0x384   : > { %v3519_v24 = vpop.eup %3518  ;;  %v2862_v59 = vadd.f32 1.0, %v3517_v22  ;;  %v5670_v60 = vmul.f32 %v2416_v58, %v6360_v34  ;;  %v5673_v17 = vmul.f32 %v2439_v47, %v6361_v1  ;;  %v2889_v25 = vmul.f32 0.5, %v2841_v40 }
 0x385   : > { %v3521_v42 = vpop.eup %3520  ;;  %3033 = vrot.lane.b32.xlu1 %v2933_v2, %s3704_s8  ;;  %v2845_v46 = vadd.f32 1.0, %v3519_v24  ;;  %3532 = vtanh.f32 %v2529_v11  ;;  %v2533_v41 = vmul.f32 0.5, %v5666_v56  ;;  %v2956_v44 = vmul.f32 %v2908_v63, %v5597_v36  ;;  %v6366_v11 = vld [vmem:[#allocation76_spill] sm:$0xff]  ;;  %v6368_v24 = vld [vmem:[#allocation66_spill] sm:$0xff] }
 0x386   : > { %v2910_v4 = vmul.f32 0.5, %v2862_v59  ;;  %v2864_v12 = vadd.f32 1.0, %v3521_v42  ;;  %3534 = vtanh.f32 %v2508_v55  ;;  %v2937_v16 = vmul.f32 %v2889_v25, %v5601_v6  ;;  %v6369_v42 = vld [vmem:[#allocation126_spill] sm:$0xff] }
 0x387   : > { %v3523_v45 = vpop.eup %3522  ;;  %v2893_v13 = vmul.f32 0.5, %v2845_v46  ;;  %3536 = vtanh.f32 %v2533_v41  ;;  %v2512_v28 = vmul.f32 0.5, %v5670_v60  ;;  %3051 = vrot.lane.b32.xlu0 %v2942_v31, %s3704_s8  ;;  %v2535_v36 = vmul.f32 0.5, %v5673_v17  ;;  %v6362_v31 = vld [vmem:[#allocation74_spill] sm:$0xff]  ;;  %v6370_v41 = vld [vmem:[#allocation72_spill] sm:$0xff] }
 0x388   : > { %v3525_v53 = vpop.eup %3524  ;;  %v2958_v2 = vmul.f32 %v2910_v4, %v5605_v49  ;;  %v2912_v57 = vmul.f32 0.5, %v2864_v12  ;;  %v2847_v14 = vadd.f32 1.0, %v3523_v45  ;;  %v2418_v20 = vadd.f32 %v6358_v23, %v5364_v19  ;;  %v6371_v4 = vld [vmem:[#allocation73_spill] sm:$0xff] }
 0x389   : > { %3037 = vrot.lane.b32.xlu1 %v2935_v52, %s3704_s8  ;;  %v2941_v3 = vmul.f32 %v2893_v13, %v5610_v5  ;;  %v2870_v6 = vadd.f32 1.0, %v3525_v53  ;;  %3538 = vtanh.f32 %v2512_v28  ;;  %v2411_v49 = vadd.f32 %v6352_v62, %v6362_v31  ;;  %v6364_v5 = vld [vmem:[#allocation80_spill] sm:$0xff] }
 0x38a   : > { %v2960_v32 = vmul.f32 %v2912_v57, %v5614_v50  ;;  %v2895_v9 = vmul.f32 0.5, %v2847_v14  ;;  %3540 = vtanh.f32 %v2535_v36  ;;  %v5693_v33 = vmul.f32 %v2418_v20, %v6363_v7  ;;  %v6365_v50 = vld [vmem:[#allocation125_spill] sm:$0xff]  ;;  %v6373_v31 = vld [vmem:[#allocation64_spill] sm:$0xff] }
 0x38b   : > { %v2918_v58 = vmul.f32 0.5, %v2870_v6  ;;  %v2420_v52 = vadd.f32 %v5680_v51, %v5415_v54  ;;  %v2417_v47 = vadd.f32 %v6358_v23, %v6364_v5  ;;  %v3527_v22 = vpop.eup %3526  ;;  %3079 = vrot.lane.b32.xlu0 %v2956_v44, %s3704_s8  ;;  %v5702_v40 = vmul.f32 %v2411_v49, %v6365_v50 }
 0x38c   : > { %v2943_v19 = vmul.f32 %v2895_v9, %v5620_v10  ;;  %v2434_v55 = vadd.f32 %v6352_v62, %v6366_v11  ;;  %v2227_v63 = vadd.f32 %v6368_v24, %v6367_v39  ;;  %v2623_v34 = vadd.f32 1.0, %v3527_v22  ;;  %v6374_v22 = vld [vmem:[#allocation78_spill] sm:$0xff]  ;;  %v6375_v39 = vld [vmem:[#allocation108_spill] sm:$0xff] }
 0x38d   : > { %v3529_v59 = vpop.eup %3528  ;;  %3041 = vrot.lane.b32.xlu1 %v2937_v16, %s3704_s8  ;;  %v2966_v54 = vmul.f32 %v2918_v58, %v5624_v27  ;;  %v2514_v1 = vmul.f32 0.5, %v5693_v33  ;;  %v5712_v25 = vmul.f32 %v2420_v52, %v6369_v42  ;;  %v2507_v46 = vmul.f32 0.5, %v5702_v40 }
 0x38e   : > { %v2602_v10 = vadd.f32 1.0, %v3529_v59  ;;  %v5716_v44 = vmul.f32 %v2417_v47, %v6370_v41  ;;  %v5719_v12 = vmul.f32 %v2434_v55, %v6371_v4  ;;  %v2671_v13 = vmul.f32 0.5, %v2623_v34 }
 0x38f   : > { %v3531_v45 = vpop.eup %3530  ;;  %3542 = vtanh.f32 %v2514_v1  ;;  %v2516_v27 = vmul.f32 0.5, %v5712_v25  ;;  %v2419_v16 = vadd.f32 %v5680_v51, %v5412_v30  ;;  %3083 = vrot.lane.b32.xlu0 %v2958_v2, %s3704_s8  ;;  %v6372_v2 = vld [vmem:[#allocation98_spill] sm:$0xff]  ;;  %v2436_v50 = vadd.f32 %v6352_v62, %v6374_v22 }
 0x390   : > { %v2861_v28 = vadd.f32 1.0, %v3531_v45  ;;  %v2650_v53 = vmul.f32 0.5, %v2602_v10  ;;  %3544 = vtanh.f32 %v2507_v46  ;;  %v2513_v57 = vmul.f32 0.5, %v5716_v44 }
 0x391   : > { %3049 = vrot.lane.b32.xlu1 %v2941_v3, %s3704_s8  ;;  %v5728_v14 = vmul.f32 %v2671_v13, %v5551_v29  ;;  %3546 = vtanh.f32 %v2516_v27  ;;  %v2530_v36 = vmul.f32 0.5, %v5719_v12  ;;  %v5731_v6 = vmul.f32 %v2419_v16, %v2227_v63  ;;  %v6376_v27 = vld [vmem:[#allocation103_spill] sm:$0xff]  ;;  %v6377_v16 = vld [vmem:[#allocation65_spill] sm:$0xff] }
 0x392   : > { %v3533_v20 = vpop.eup %3532  ;;  %v2909_v9 = vmul.f32 0.5, %v2861_v28  ;;  %v5734_v30 = vmul.f32 %v2650_v53, %v5557_v18  ;;  %3548 = vtanh.f32 %v2513_v57  ;;  %v2244_v49 = vadd.f32 %v6373_v31, %v6372_v2  ;;  %v6378_v2 = vld [vmem:[#allocation97_spill] sm:$0xff] }
 0x393   : > { %v3535_v58 = vpop.eup %3534  ;;  %v2767_v3 = vmul.f32 0.5, %v5728_v14  ;;  %v2625_v7 = vadd.f32 1.0, %v3533_v20  ;;  %3550 = vtanh.f32 %v2530_v36  ;;  %v2515_v29 = vmul.f32 0.5, %v5731_v6  ;;  %3087 = vrot.lane.b32.xlu0 %v2960_v32, %s3704_s8 }
 0x394   : > { %v3537_v52 = vpop.eup %3536  ;;  %v2957_v5 = vmul.f32 %v2909_v9, %v5639_v38  ;;  %v2746_v47 = vmul.f32 0.5, %v5734_v30  ;;  %v2604_v18 = vadd.f32 1.0, %v3535_v58  ;;  %v2229_v63 = vadd.f32 %v6368_v24, %v6375_v39  ;;  %v6379_v58 = vld [vmem:[#allocation77_spill] sm:$0xff] }
 0x395   : > { %3053 = vrot.lane.b32.xlu1 %v2943_v19, %s3704_s8  ;;  %3552 = vtanh.f32 %v2767_v3  ;;  %v2673_v11 = vmul.f32 0.5, %v2625_v7  ;;  %v2629_v55 = vadd.f32 1.0, %v3537_v52  ;;  %v5748_v32 = vmul.f32 %v2436_v50, %v2244_v49 }
 0x396   : > { %v3539_v59 = vpop.eup %3538  ;;  %3554 = vtanh.f32 %v2746_v47  ;;  %v2652_v34 = vmul.f32 0.5, %v2604_v18  ;;  %v2421_v38 = vadd.f32 %v5680_v51, %v5418_v0  ;;  %v2248_v28 = vadd.f32 %v6377_v16, %v6376_v27 }
 0x397   : > { %v3541_v1 = vpop.eup %3540  ;;  %v5753_v42 = vmul.f32 %v2673_v11, %v5651_v48  ;;  %v2677_v10 = vmul.f32 0.5, %v2629_v55  ;;  %v2608_v19 = vadd.f32 1.0, %v3539_v59  ;;  %3556 = vtanh.f32 %v2515_v29  ;;  %3099 = vrot.lane.b32.xlu0 %v2966_v54, %s3704_s8 }
 0x398   : > { %v5757_v46 = vmul.f32 %v2652_v34, %v5654_v61  ;;  %v2631_v41 = vadd.f32 1.0, %v3541_v1  ;;  %v2532_v4 = vmul.f32 0.5, %v5748_v32  ;;  %v5760_v45 = vmul.f32 %v2421_v38, %v2229_v63 }
 0x399   : > { %3081 = vrot.lane.b32.xlu1 %v2957_v5, %s3704_s8  ;;  %v2769_v0 = vmul.f32 0.5, %v5753_v42  ;;  %v5765_v48 = vmul.f32 %v2677_v10, %v5666_v56  ;;  %v2656_v13 = vmul.f32 0.5, %v2608_v19  ;;  %v2440_v56 = vadd.f32 %v6358_v23, %v5367_v21  ;;  %v6380_v19 = vld [vmem:[#allocation105_spill] sm:$0xff] }
 0x39a   : > { %v2748_v54 = vmul.f32 0.5, %v5757_v46  ;;  %v2679_v61 = vmul.f32 0.5, %v2631_v41  ;;  %3558 = vtanh.f32 %v2532_v4  ;;  %v2517_v53 = vmul.f32 0.5, %v5760_v45 }
 0x39b   : > { %3560 = vtanh.f32 %v2769_v0  ;;  %v2773_v57 = vmul.f32 0.5, %v5765_v48  ;;  %v5773_v36 = vmul.f32 %v2656_v13, %v5670_v60  ;;  %v2243_v49 = vadd.f32 %v6373_v31, %v6378_v2 }
 0x39c   : > { %v3543_v20 = vpop.eup %3542  ;;  %3562 = vtanh.f32 %v2748_v54  ;;  %v5778_v9 = vmul.f32 %v2679_v61, %v5673_v17  ;;  %v2435_v3 = vadd.f32 %v6352_v62, %v6379_v58  ;;  %v5785_v52 = vmul.f32 %v2440_v56, %v2248_v28 }
 0x39d   : > { %v3545_v7 = vpop.eup %3544  ;;  %3564 = vtanh.f32 %v2773_v57  ;;  %v2752_v29 = vmul.f32 0.5, %v5773_v36  ;;  %v2610_v60 = vadd.f32 1.0, %v3543_v20  ;;  %v2250_v41 = vadd.f32 %v6377_v16, %v6380_v19 }
 0x39e   : > { %v3547_v5 = vpop.eup %3546  ;;  %v2775_v21 = vmul.f32 0.5, %v5778_v9  ;;  %v2603_v47 = vadd.f32 1.0, %v3545_v7  ;;  %3566 = vtanh.f32 %v2517_v53  ;;  %v5788_v17 = vmul.f32 %v2435_v3, %v2243_v49 }
 0x39f   : > { %v3549_v18 = vpop.eup %3548  ;;  %3568 = vtanh.f32 %v2752_v29  ;;  %v2658_v31 = vmul.f32 0.5, %v2610_v60  ;;  %v2612_v22 = vadd.f32 1.0, %v3547_v5  ;;  %v2536_v62 = vmul.f32 0.5, %v5785_v52 }
 0x3a0   : > { %v3551_v50 = vpop.eup %3550  ;;  %3570 = vtanh.f32 %v2775_v21  ;;  %v2651_v11 = vmul.f32 0.5, %v2603_v47  ;;  %v2609_v55 = vadd.f32 1.0, %v3549_v18  ;;  %v2531_v39 = vmul.f32 0.5, %v5788_v17  ;;  %v6381_v18 = vld [vmem:[#allocation104_spill] sm:$0xff] }
 0x3a1   : > { %v5793_v63 = vmul.f32 %v2658_v31, %v5693_v33  ;;  %v2660_v59 = vmul.f32 0.5, %v2612_v22  ;;  %v2626_v34 = vadd.f32 1.0, %v3551_v50  ;;  %3572 = vtanh.f32 %v2536_v62  ;;  %v6382_v50 = vld [vmem:[#allocation82_spill] sm:$0xff] }
 0x3a2   : > { %v3553_v38 = vpop.eup %3552  ;;  %v5796_v1 = vmul.f32 %v2651_v11, %v5702_v40  ;;  %v2657_v10 = vmul.f32 0.5, %v2609_v55  ;;  %3574 = vtanh.f32 %v2531_v39  ;;  %v2442_v53 = vadd.f32 %v6358_v23, %v5373_v26 }
 0x3a3   : > { %v3555_v4 = vpop.eup %3554  ;;  %v2863_v0 = vadd.f32 1.0, %v3553_v38  ;;  %v2754_v13 = vmul.f32 0.5, %v5793_v63  ;;  %v5802_v27 = vmul.f32 %v2660_v59, %v5712_v25  ;;  %v2674_v33 = vmul.f32 0.5, %v2626_v34  ;;  %v6383_v34 = vld [vmem:[#allocation110_spill] sm:$0xff] }
 0x3a4   : > { %v3557_v28 = vpop.eup %3556  ;;  %v2842_v54 = vadd.f32 1.0, %v3555_v4  ;;  %v2747_v61 = vmul.f32 0.5, %v5796_v1  ;;  %v5806_v40 = vmul.f32 %v2657_v10, %v5716_v44  ;;  %v5817_v7 = vmul.f32 %v2442_v53, %v2250_v41 }
 0x3a5   : > { %v2911_v57 = vmul.f32 0.5, %v2863_v0  ;;  %3576 = vtanh.f32 %v2754_v13  ;;  %v2756_v56 = vmul.f32 0.5, %v5802_v27  ;;  %v5812_v20 = vmul.f32 %v2674_v33, %v5719_v12 }
 0x3a6   : > { %v2890_v25 = vmul.f32 0.5, %v2842_v54  ;;  %3578 = vtanh.f32 %v2747_v61  ;;  %v2753_v2 = vmul.f32 0.5, %v5806_v40  ;;  %v2611_v49 = vadd.f32 1.0, %v3557_v28 }
 0x3a7   : > { %v3559_v58 = vpop.eup %3558  ;;  %v2959_v3 = vmul.f32 %v2911_v57, %v5728_v14  ;;  %3580 = vtanh.f32 %v2756_v56  ;;  %v2770_v44 = vmul.f32 0.5, %v5812_v20  ;;  %v2538_v47 = vmul.f32 0.5, %v5817_v7 }
 0x3a8   : > { %v3561_v26 = vpop.eup %3560  ;;  %v2938_v29 = vmul.f32 %v2890_v25, %v5734_v30  ;;  %3582 = vtanh.f32 %v2753_v2  ;;  %v2659_v60 = vmul.f32 0.5, %v2611_v49  ;;  %v2628_v12 = vadd.f32 1.0, %v3559_v58 }
 0x3a9   : > { %v3563_v5 = vpop.eup %3562  ;;  %3085 = vrot.lane.b32.xlu1 %v2959_v3, %s3704_s8  ;;  %v2865_v21 = vadd.f32 1.0, %v3561_v26  ;;  %3584 = vtanh.f32 %v2770_v44  ;;  %v2249_v14 = vadd.f32 %v6377_v16, %v6381_v18  ;;  %v2441_v11 = vadd.f32 %v6358_v23, %v6382_v50 }
 0x3aa   : > { %v3565_v31 = vpop.eup %3564  ;;  %3043 = vrot.lane.b32.xlu0 %v2938_v29, %s3704_s8  ;;  %v2844_v22 = vadd.f32 1.0, %v3563_v5  ;;  %v5826_v62 = vmul.f32 %v2659_v60, %v5731_v6  ;;  %v2676_v30 = vmul.f32 0.5, %v2628_v12  ;;  %3586 = vtanh.f32 %v2538_v47  ;;  %v6384_v12 = vld [vmem:[#allocation109_spill] sm:$0xff] }
 0x3ab   : > { %v3567_v55 = vpop.eup %3566  ;;  %v2913_v39 = vmul.f32 0.5, %v2865_v21  ;;  %v2869_v59 = vadd.f32 1.0, %v3565_v31  ;;  %v2252_v38 = vadd.f32 %v6368_v24, %v6383_v34  ;;  %v5837_v33 = vmul.f32 %v2441_v11, %v2249_v14 }
 0x3ac   : > { %v3569_v10 = vpop.eup %3568  ;;  %v2892_v16 = vmul.f32 0.5, %v2844_v22  ;;  %v2755_v19 = vmul.f32 0.5, %v5826_v62  ;;  %v5834_v41 = vmul.f32 %v2676_v30, %v5748_v32  ;;  %v2613_v6 = vadd.f32 1.0, %v3567_v55  ;;  %v6385_v22 = vld [vmem:[#allocation112_spill] sm:$0xff] }
 0x3ad   : > { %v3571_v4 = vpop.eup %3570  ;;  %v2961_v0 = vmul.f32 %v2913_v39, %v5753_v42  ;;  %v2917_v13 = vmul.f32 0.5, %v2869_v59  ;;  %v2848_v23 = vadd.f32 1.0, %v3569_v10  ;;  %v2537_v58 = vmul.f32 0.5, %v5837_v33  ;;  %v6386_v30 = vld [vmem:[#allocation68_spill] sm:$0xff] }
 0x3ae   : > { %v3573_v28 = vpop.eup %3572  ;;  %v2940_v54 = vmul.f32 %v2892_v16, %v5757_v46  ;;  %v2871_v61 = vadd.f32 1.0, %v3571_v4  ;;  %3588 = vtanh.f32 %v2755_v19  ;;  %v2772_v53 = vmul.f32 0.5, %v5834_v41 }
 0x3af   : > { %v3575_v57 = vpop.eup %3574  ;;  %3089 = vrot.lane.b32.xlu1 %v2961_v0, %s3704_s8  ;;  %v2965_v32 = vmul.f32 %v2917_v13, %v5765_v48  ;;  %v2896_v56 = vmul.f32 0.5, %v2848_v23  ;;  %v2661_v25 = vmul.f32 0.5, %v2613_v6  ;;  %v2632_v2 = vadd.f32 1.0, %v3573_v28 }
 0x3b0   : > { %3047 = vrot.lane.b32.xlu0 %v2940_v54, %s3704_s8  ;;  %v2919_v42 = vmul.f32 0.5, %v2871_v61  ;;  %3590 = vtanh.f32 %v2772_v53  ;;  %v2627_v49 = vadd.f32 1.0, %v3575_v57  ;;  %v2444_v26 = vadd.f32 %v5680_v51, %v5424_v43  ;;  %v6387_v57 = vld [vmem:[#allocation111_spill] sm:$0xff] }
 0x3b1   : > { %v2944_v46 = vmul.f32 %v2896_v56, %v5773_v36  ;;  %v5847_v3 = vmul.f32 %v2661_v25, %v5760_v45  ;;  %v2680_v44 = vmul.f32 0.5, %v2632_v2  ;;  %3592 = vtanh.f32 %v2537_v58  ;;  %v6388_v2 = vld [vmem:[#allocation114_spill] sm:$0xff] }
 0x3b2   : > { %v3577_v48 = vpop.eup %3576  ;;  %v2967_v29 = vmul.f32 %v2919_v42, %v5778_v9  ;;  %v2675_v60 = vmul.f32 0.5, %v2627_v49  ;;  %v2251_v5 = vadd.f32 %v6368_v24, %v6384_v12  ;;  %v5859_v18 = vmul.f32 %v2444_v26, %v2252_v38 }
 0x3b3   : > { %v3579_v21 = vpop.eup %3578  ;;  %3097 = vrot.lane.b32.xlu1 %v2965_v32, %s3704_s8  ;;  %v2850_v47 = vadd.f32 1.0, %v3577_v48  ;;  %v2757_v36 = vmul.f32 0.5, %v5847_v3  ;;  %v5857_v45 = vmul.f32 %v2680_v44, %v5785_v52  ;;  %v2443_v31 = vadd.f32 %v5680_v51, %v5421_v8  ;;  %v6390_v44 = vld [vmem:[#allocation113_spill] sm:$0xff] }
 0x3b4   : > { %v3581_v43 = vpop.eup %3580  ;;  %3055 = vrot.lane.b32.xlu0 %v2944_v46, %s3704_s8  ;;  %v2843_v9 = vadd.f32 1.0, %v3579_v21  ;;  %v5863_v14 = vmul.f32 %v2675_v60, %v5788_v17  ;;  %v2230_v50 = vadd.f32 %v6386_v30, %v6385_v22  ;;  %v2540_v17 = vmul.f32 0.5, %v5859_v18 }
 0x3b5   : > { %v3583_v11 = vpop.eup %3582  ;;  %v2898_v55 = vmul.f32 0.5, %v2850_v47  ;;  %v2852_v39 = vadd.f32 1.0, %v3581_v43  ;;  %3594 = vtanh.f32 %v2757_v36  ;;  %v2776_v52 = vmul.f32 0.5, %v5857_v45  ;;  %v6392_v47 = vld [vmem:[#allocation94_spill] sm:$0xff]  ;;  %v6393_v43 = vld [vmem:[#allocation67_spill] sm:$0xff] }
 0x3b6   : > { %v3585_v59 = vpop.eup %3584  ;;  %v2891_v34 = vmul.f32 0.5, %v2843_v9  ;;  %v2849_v38 = vadd.f32 1.0, %v3583_v11  ;;  %v2771_v10 = vmul.f32 0.5, %v5863_v14  ;;  %v5875_v13 = vmul.f32 %v2443_v31, %v2251_v5 }
 0x3b7   : > { %3101 = vrot.lane.b32.xlu1 %v2967_v29, %s3704_s8  ;;  %v2946_v8 = vmul.f32 %v2898_v55, %v5793_v63  ;;  %v2900_v16 = vmul.f32 0.5, %v2852_v39  ;;  %v2866_v19 = vadd.f32 1.0, %v3585_v59  ;;  %3596 = vtanh.f32 %v2776_v52  ;;  %v3587_v6 = vpop.eup %3586 }
 0x3b8   : > { %v2939_v4 = vmul.f32 %v2891_v34, %v5796_v1  ;;  %v2897_v0 = vmul.f32 0.5, %v2849_v38  ;;  %3598 = vtanh.f32 %v2771_v10  ;;  %v2634_v54 = vadd.f32 1.0, %v3587_v6  ;;  %v6394_v38 = vld [vmem:[#allocation116_spill] sm:$0xff] }
 0x3b9   : > { %3059 = vrot.lane.b32.xlu0 %v2946_v8, %s3704_s8  ;;  %v2948_v23 = vmul.f32 %v2900_v16, %v5802_v27  ;;  %v2914_v28 = vmul.f32 0.5, %v2866_v19  ;;  %3600 = vtanh.f32 %v2540_v17  ;;  %v2539_v63 = vmul.f32 0.5, %v5875_v13  ;;  %v6395_v8 = vld [vmem:[#allocation117_spill] sm:$0xff] }
 0x3ba   : > { %v2945_v61 = vmul.f32 %v2897_v0, %v5806_v40  ;;  %v2422_v53 = vadd.f32 %v5432_v35, %v5396_v37  ;;  %v2253_v1 = vadd.f32 %v6368_v24, %v6387_v57  ;;  %v2682_v25 = vmul.f32 0.5, %v2634_v54  ;;  %v6389_v37 = vld [vmem:[#allocation83_spill] sm:$0xff]  ;;  %v6397_v0 = vld [vmem:[#allocation93_spill] sm:$0xff] }
 0x3bb   : > { %v3589_v32 = vpop.eup %3588  ;;  %3045 = vrot.lane.b32.xlu1 %v2939_v4, %s3704_s8  ;;  %v2962_v56 = vmul.f32 %v2914_v28, %v5812_v20  ;;  %v2445_v27 = vadd.f32 %v5680_v51, %v5427_v15  ;;  %v2232_v40 = vadd.f32 %v6386_v30, %v6388_v2  ;;  %3602 = vtanh.f32 %v2539_v63  ;;  %v6391_v51 = vld [vmem:[#allocation115_spill] sm:$0xff] }
 0x3bc   : > { %v2851_v42 = vadd.f32 1.0, %v3589_v32  ;;  %v5891_v49 = vmul.f32 %v2422_v53, %v2230_v50  ;;  %v2424_v58 = vadd.f32 %v5432_v35, %v6389_v37  ;;  %v5897_v46 = vmul.f32 %v2682_v25, %v5817_v7 }
 0x3bd   : > { %v3591_v24 = vpop.eup %3590  ;;  %3063 = vrot.lane.b32.xlu0 %v2948_v23, %s3704_s8  ;;  %v5899_v20 = vmul.f32 %v2445_v27, %v2253_v1  ;;  %v2231_v15 = vadd.f32 %v6386_v30, %v6390_v44  ;;  %v2254_v26 = vadd.f32 %v6386_v30, %v6391_v51  ;;  %v2446_v9 = vadd.f32 %v5432_v35, %v6393_v43 }
 0x3be   : > { %v2899_v48 = vmul.f32 0.5, %v2851_v42  ;;  %v2868_v29 = vadd.f32 1.0, %v3591_v24  ;;  %v2518_v60 = vmul.f32 0.5, %v5891_v49  ;;  %v5906_v12 = vmul.f32 %v2424_v58, %v2232_v40  ;;  %v3593_v5 = vpop.eup %3592 }
 0x3bf   : > { %3057 = vrot.lane.b32.xlu1 %v2945_v61, %s3704_s8  ;;  %v2778_v7 = vmul.f32 0.5, %v5897_v46  ;;  %v2541_v21 = vmul.f32 0.5, %v5899_v20  ;;  %v5912_v36 = vmul.f32 %v6392_v47, %v2231_v15  ;;  %v2633_v50 = vadd.f32 1.0, %v3593_v5 }
 0x3c0   : > { %v2947_v31 = vmul.f32 %v2899_v48, %v5826_v62  ;;  %v2916_v22 = vmul.f32 0.5, %v2868_v29  ;;  %3604 = vtanh.f32 %v2518_v60  ;;  %v2520_v11 = vmul.f32 0.5, %v5906_v12 }
 0x3c1   : > { %3091 = vrot.lane.b32.xlu0 %v2962_v56, %s3704_s8  ;;  %3606 = vtanh.f32 %v2778_v7  ;;  %v2519_v55 = vmul.f32 0.5, %v5912_v36  ;;  %v5920_v39 = vmul.f32 %v2446_v9, %v2254_v26  ;;  %v2681_v34 = vmul.f32 0.5, %v2633_v50 }
 0x3c2   : > { %v3595_v52 = vpop.eup %3594  ;;  %v2964_v59 = vmul.f32 %v2916_v22, %v5834_v41  ;;  %3608 = vtanh.f32 %v2541_v21  ;;  %v2255_v62 = vadd.f32 %v6386_v30, %v6394_v38  ;;  %v2256_v16 = vadd.f32 %v6386_v30, %v6395_v8  ;;  %v6396_v41 = vld [vmem:[#allocation84_spill] sm:$0xff] }
 0x3c3   : > { %3061 = vrot.lane.b32.xlu1 %v2947_v31, %s3704_s8  ;;  %v2853_v10 = vadd.f32 1.0, %v3595_v52  ;;  %3610 = vtanh.f32 %v2520_v11  ;;  %v2542_v17 = vmul.f32 0.5, %v5920_v39  ;;  %v5930_v6 = vmul.f32 %v2681_v34, %v5837_v33 }
 0x3c4   : > { %v3597_v19 = vpop.eup %3596  ;;  %3612 = vtanh.f32 %v2519_v55  ;;  %v5933_v4 = vmul.f32 %v6396_v41, %v2255_v62  ;;  %v2448_v23 = vadd.f32 %v5432_v35, %v6397_v0 }
 0x3c5   : > { %v3599_v28 = vpop.eup %3598  ;;  %3095 = vrot.lane.b32.xlu0 %v2964_v59, %s3704_s8  ;;  %v2901_v54 = vmul.f32 0.5, %v2853_v10  ;;  %v2872_v61 = vadd.f32 1.0, %v3597_v19  ;;  %3614 = vtanh.f32 %v2542_v17  ;;  %v2777_v30 = vmul.f32 0.5, %v5930_v6 }
 0x3c6   : > { %v3601_v63 = vpop.eup %3600  ;;  %v2867_v53 = vadd.f32 1.0, %v3599_v28  ;;  %v2543_v33 = vmul.f32 0.5, %v5933_v4  ;;  %v5940_v57 = vmul.f32 %v2448_v23, %v2256_v16 }
 0x3c7   : > { %v2949_v1 = vmul.f32 %v2901_v54, %v5847_v3  ;;  %v2920_v32 = vmul.f32 0.5, %v2872_v61  ;;  %v2636_v56 = vadd.f32 1.0, %v3601_v63  ;;  %3616 = vtanh.f32 %v2777_v30 }
 0x3c8   : > { %v2915_v25 = vmul.f32 0.5, %v2867_v53  ;;  %v2544_v35 = vmul.f32 0.5, %v5940_v57  ;;  %v3603_v27 = vpop.eup %3602  ;;  %3618 = vtanh.f32 %v2543_v33 }
 0x3c9   : > { %3065 = vrot.lane.b32.xlu1 %v2949_v1, %s3704_s8  ;;  %v2968_v2 = vmul.f32 %v2920_v32, %v5857_v45  ;;  %v2684_v40 = vmul.f32 0.5, %v2636_v56  ;;  %v2635_v42 = vadd.f32 1.0, %v3603_v27 }
 0x3ca   : > { %3620 = vtanh.f32 %v2544_v35  ;;  %v2963_v37 = vmul.f32 %v2915_v25, %v5863_v14 }
 0x3cb   : > { %3103 = vrot.lane.b32.xlu0 %v2968_v2, %s3704_s8  ;;  %v5949_v3 = vmul.f32 %v2684_v40, %v5859_v18  ;;  %v2683_v58 = vmul.f32 0.5, %v2635_v42 }
 0x3cd   : > { %v3605_v24 = vpop.eup %3604  ;;  %3093 = vrot.lane.b32.xlu1 %v2963_v37, %s3704_s8  ;;  %v2780_v44 = vmul.f32 0.5, %v5949_v3  ;;  %v5954_v45 = vmul.f32 %v2683_v58, %v5875_v13 }
 0x3ce   : > { %v3607_v15 = vpop.eup %3606  ;;  %v2614_v51 = vadd.f32 1.0, %v3605_v24 }
 0x3cf   : > { %v3609_v26 = vpop.eup %3608  ;;  %v2874_v48 = vadd.f32 1.0, %v3607_v15  ;;  %3622 = vtanh.f32 %v2780_v44  ;;  %v2779_v14 = vmul.f32 0.5, %v5954_v45 }
 0x3d0   : > { %v3611_v29 = vpop.eup %3610  ;;  %v2662_v60 = vmul.f32 0.5, %v2614_v51  ;;  %v2637_v18 = vadd.f32 1.0, %v3609_v26 }
 0x3d1   : > { %v3613_v5 = vpop.eup %3612  ;;  %v2922_v7 = vmul.f32 0.5, %v2874_v48  ;;  %v2616_v21 = vadd.f32 1.0, %v3611_v29  ;;  %3624 = vtanh.f32 %v2779_v14 }
 0x3d2   : > { %v3615_v47 = vpop.eup %3614  ;;  %v5958_v43 = vmul.f32 %v2662_v60, %v5891_v49  ;;  %v2685_v9 = vmul.f32 0.5, %v2637_v18  ;;  %v2615_v13 = vadd.f32 1.0, %v3613_v5 }
 0x3d3   : > { %v2970_v31 = vmul.f32 %v2922_v7, %v5897_v46  ;;  %v2664_v22 = vmul.f32 0.5, %v2616_v21  ;;  %v2638_v50 = vadd.f32 1.0, %v3615_v47 }
 0x3d4   : > { %v2758_v11 = vmul.f32 0.5, %v5958_v43  ;;  %v5963_v55 = vmul.f32 %v2685_v9, %v5899_v20  ;;  %v2663_v52 = vmul.f32 0.5, %v2615_v13  ;;  %v3617_v59 = vpop.eup %3616 }
 0x3d5   : > { %3107 = vrot.lane.b32.xlu0 %v2970_v31, %s3704_s8  ;;  %v5967_v34 = vmul.f32 %v2664_v22, %v5906_v12  ;;  %v2686_v49 = vmul.f32 0.5, %v2638_v50  ;;  %v3619_v38 = vpop.eup %3618  ;;  %v2873_v62 = vadd.f32 1.0, %v3617_v59 }
 0x3d6   : > { %3626 = vtanh.f32 %v2758_v11  ;;  %v2781_v46 = vmul.f32 0.5, %v5963_v55  ;;  %v5971_v10 = vmul.f32 %v2663_v52, %v5912_v36  ;;  %v2639_v16 = vadd.f32 1.0, %v3619_v38 }
 0x3d7   : > { %v3621_v17 = vpop.eup %3620  ;;  %v2760_v20 = vmul.f32 0.5, %v5967_v34  ;;  %v5975_v8 = vmul.f32 %v2686_v49, %v5920_v39  ;;  %v2921_v19 = vmul.f32 0.5, %v2873_v62 }
 0x3d8   : > { %3628 = vtanh.f32 %v2781_v46  ;;  %v2759_v12 = vmul.f32 0.5, %v5971_v10  ;;  %v2640_v41 = vadd.f32 1.0, %v3621_v17  ;;  %v2687_v23 = vmul.f32 0.5, %v2639_v16 }
 0x3d9   : > { %3630 = vtanh.f32 %v2760_v20  ;;  %v2782_v0 = vmul.f32 0.5, %v5975_v8  ;;  %v2969_v28 = vmul.f32 %v2921_v19, %v5930_v6 }
 0x3da   : > { %3632 = vtanh.f32 %v2759_v12  ;;  %v2688_v36 = vmul.f32 0.5, %v2640_v41  ;;  %v5981_v54 = vmul.f32 %v2687_v23, %v5933_v4 }
 0x3db   : > { %3634 = vtanh.f32 %v2782_v0  ;;  %3105 = vrot.lane.b32.xlu1 %v2969_v28, %s3704_s8 }
 0x3dc   : > { %v3623_v39 = vpop.eup %3622  ;;  %v5985_v61 = vmul.f32 %v2688_v36, %v5940_v57  ;;  %v2783_v53 = vmul.f32 0.5, %v5981_v54 }
 0x3dd   : > { %v2876_v63 = vadd.f32 1.0, %v3623_v39 }
 0x3de   : > { %v2784_v30 = vmul.f32 0.5, %v5985_v61  ;;  %v3625_v33 = vpop.eup %3624  ;;  %3636 = vtanh.f32 %v2783_v53 }
 0x3df   : > { %v2924_v1 = vmul.f32 0.5, %v2876_v63  ;;  %v2875_v6 = vadd.f32 1.0, %v3625_v33 }
 0x3e0   : > { %3638 = vtanh.f32 %v2784_v30 }
 0x3e1   : > { %v2972_v4 = vmul.f32 %v2924_v1, %v5949_v3  ;;  %v3028_v32 = vpop.permute.xlu0 %3027  ;;  %v2923_v56 = vmul.f32 0.5, %v2875_v6 }
 0x3e2   : > { %3172 = vst.msk [vmem:[#allocation8 + $0x7] sm:$0xff] %vm3171_vm4, %v3028_v32 }
 0x3e3   : > { %v3627_v57 = vpop.eup %3626  ;;  %3111 = vrot.lane.b32.xlu0 %v2972_v4, %s3704_s8  ;;  %v3026_v25 = vpop.permute.xlu1 %3025  ;;  %v2971_v35 = vmul.f32 %v2923_v56, %v5954_v45 }
 0x3e4   : > { %v2854_v27 = vadd.f32 1.0, %v3627_v57  ;;  %3170 = vst.msk [vmem:[#allocation8 - $0x1] sm:$0xfe] %vm3169_vm5, %v3026_v25 }
 0x3e5   : > { %v3629_v2 = vpop.eup %3628  ;;  %3109 = vrot.lane.b32.xlu1 %v2971_v35, %s3704_s8 }
 0x3e6   : > { %v3631_v40 = vpop.eup %3630  ;;  %v2902_v42 = vmul.f32 0.5, %v2854_v27  ;;  %v2877_v37 = vadd.f32 1.0, %v3629_v2 }
 0x3e7   : > { %v3633_v3 = vpop.eup %3632  ;;  %v2856_v58 = vadd.f32 1.0, %v3631_v40  ;;  %v3076_v24 = vpop.permute.xlu0 %3075 }
 0x3e8   : > { %v3635_v44 = vpop.eup %3634  ;;  %v2950_v15 = vmul.f32 %v2902_v42, %v5958_v43  ;;  %v2925_v51 = vmul.f32 0.5, %v2877_v37  ;;  %v2855_v26 = vadd.f32 1.0, %v3633_v3  ;;  %3197 = vst.msk [vmem:[#allocation8 + $0x87] sm:$0xff] %vm3171_vm4, %v3076_v24 }
 0x3e9   : > { %v2904_v45 = vmul.f32 0.5, %v2856_v58  ;;  %v2878_v48 = vadd.f32 1.0, %v3635_v44 }
 0x3ea   : > { %3067 = vrot.lane.b32.xlu0 %v2950_v15, %s3704_s8  ;;  %v2973_v29 = vmul.f32 %v2925_v51, %v5963_v55  ;;  %v2903_v14 = vmul.f32 0.5, %v2855_v26 }
 0x3eb   : > { %v3030_v60 = vpop.permute.xlu1 %3029  ;;  %v3637_v18 = vpop.eup %3636  ;;  %v2952_v5 = vmul.f32 %v2904_v45, %v5967_v34  ;;  %v2926_v7 = vmul.f32 0.5, %v2878_v48 }
 0x3ec   : > { %3113 = vrot.lane.b32.xlu1 %v2973_v29, %s3704_s8  ;;  %3174 = vst.msk [vmem:[#allocation8 + $0xf] sm:$0x1] %vm3173_vm6, %v3030_v60  ;;  %v2879_v47 = vadd.f32 1.0, %v3637_v18  ;;  %v2951_v43 = vmul.f32 %v2903_v14, %v5971_v10 }
 0x3ed   : > { %v3639_v21 = vpop.eup %3638  ;;  %v3032_v13 = vpop.permute.xlu0 %3031  ;;  %v2974_v50 = vmul.f32 %v2926_v7, %v5975_v8 }
 0x3ee   : > { %3071 = vrot.lane.b32.xlu0 %v2952_v5, %s3704_s8  ;;  %v2880_v9 = vadd.f32 1.0, %v3639_v21  ;;  %v2927_v31 = vmul.f32 0.5, %v2879_v47  ;;  %3175 = vst.msk [vmem:[#allocation8 + $0xf] sm:$0xfe] %vm3169_vm5, %v3032_v13 }
 0x3ef   : > { %v3074_v22 = vpop.permute.xlu1 %3073 }
 0x3f0   : > { %3069 = vrot.lane.b32.xlu1 %v2951_v43, %s3704_s8  ;;  %v2928_v11 = vmul.f32 0.5, %v2880_v9  ;;  %3196 = vst.msk [vmem:[#allocation8 + $0x7f] sm:$0xfe] %vm3169_vm5, %v3074_v22  ;;  %v2975_v55 = vmul.f32 %v2927_v31, %v5981_v54 }
 0x3f1   : > { %v3036_v52 = vpop.permute.xlu0 %3035 }
 0x3f2   : > { %3115 = vrot.lane.b32.xlu0 %v2974_v50, %s3704_s8  ;;  %3177 = vst.msk [vmem:[#allocation8 + $0x1f] sm:$0x1] %vm3173_vm6, %v3036_v52  ;;  %v2976_v34 = vmul.f32 %v2928_v11, %v5985_v61 }
 0x3f3   : > { %v3078_v59 = vpop.permute.xlu1 %3077 }
 0x3f4   : > { %3117 = vrot.lane.b32.xlu1 %v2975_v55, %s3704_s8  ;;  %3198 = vst.msk [vmem:[#allocation8 + $0x8f] sm:$0x1] %vm3173_vm6, %v3078_v59 }
 0x3f5   : > { %v3040_v49 = vpop.permute.xlu0 %3039 }
 0x3f6   : > { %3119 = vrot.lane.b32.xlu0 %v2976_v34, %s3704_s8  ;;  %3179 = vst.msk [vmem:[#allocation8 + $0x27] sm:$0xff] %vm3171_vm4, %v3040_v49 }
 0x3f7   : > { %v3034_v38 = vpop.permute.xlu1 %3033 }
 0x3f8   : > { %3176 = vst.msk [vmem:[#allocation8 + $0x17] sm:$0xff] %vm3171_vm4, %v3034_v38 }
 0x3f9   : > { %v3052_v62 = vpop.permute.xlu0 %3051 }
 0x3fa   : > { %3185 = vst.msk [vmem:[#allocation8 + $0x47] sm:$0xff] %vm3171_vm4, %v3052_v62 }
 0x3fb   : > { %v3038_v46 = vpop.permute.xlu1 %3037 }
 0x3fc   : > { %3178 = vst.msk [vmem:[#allocation8 + $0x1f] sm:$0xfe] %vm3169_vm5, %v3038_v46 }
 0x3fd   : > { %v3080_v10 = vpop.permute.xlu0 %3079 }
 0x3fe   : > { %3199 = vst.msk [vmem:[#allocation8 + $0x8f] sm:$0xfe] %vm3169_vm5, %v3080_v10 }
 0x3ff   : > { %v3042_v17 = vpop.permute.xlu1 %3041 }
 0x400   : > { %3180 = vst.msk [vmem:[#allocation8 + $0x2f] sm:$0x1] %vm3173_vm6, %v3042_v17 }
 0x401   : > { %v3084_v20 = vpop.permute.xlu0 %3083 }
 0x402   : > { %3201 = vst.msk [vmem:[#allocation8 + $0x9f] sm:$0x1] %vm3173_vm6, %v3084_v20 }
 0x403   : > { %v3050_v8 = vpop.permute.xlu1 %3049 }
 0x404   : > { %3184 = vst.msk [vmem:[#allocation8 + $0x3f] sm:$0xfe] %vm3169_vm5, %v3050_v8 }
 0x405   : > { %v3088_v16 = vpop.permute.xlu0 %3087 }
 0x406   : > { %3203 = vst.msk [vmem:[#allocation8 + $0xa7] sm:$0xff] %vm3171_vm4, %v3088_v16 }
 0x407   : > { %v3054_v19 = vpop.permute.xlu1 %3053 }
 0x408   : > { %3186 = vst.msk [vmem:[#allocation8 + $0x4f] sm:$0x1] %vm3173_vm6, %v3054_v19 }
 0x409   : > { %v3100_v12 = vpop.permute.xlu0 %3099 }
 0x40a   : > { %3209 = vst.msk [vmem:[#allocation8 + $0xc7] sm:$0xff] %vm3171_vm4, %v3100_v12 }
 0x40b   : > { %v3082_v41 = vpop.permute.xlu1 %3081 }
 0x40c   : > { %3200 = vst.msk [vmem:[#allocation8 + $0x97] sm:$0xff] %vm3171_vm4, %v3082_v41 }
 0x41b   : > { %v3086_v0 = vpop.permute.xlu1 %3085 }
 0x41c   : > { %3202 = vst.msk [vmem:[#allocation8 + $0x9f] sm:$0xfe] %vm3169_vm5, %v3086_v0  ;;  %v3044_v23 = vpop.permute.xlu0 %3043 }
 0x41d   : > { %3181 = vst.msk [vmem:[#allocation8 + $0x2f] sm:$0xfe] %vm3169_vm5, %v3044_v23 }
 0x421   : > { %v3090_v28 = vpop.permute.xlu1 %3089 }
 0x422   : > { %3204 = vst.msk [vmem:[#allocation8 + $0xaf] sm:$0x1] %vm3173_vm6, %v3090_v28  ;;  %v3048_v36 = vpop.permute.xlu0 %3047 }
 0x423   : > { %3183 = vst.msk [vmem:[#allocation8 + $0x3f] sm:$0x1] %vm3173_vm6, %v3048_v36 }
 0x425   : > { %v3098_v54 = vpop.permute.xlu1 %3097 }
 0x426   : > { %3208 = vst.msk [vmem:[#allocation8 + $0xbf] sm:$0xfe] %vm3169_vm5, %v3098_v54  ;;  %v3056_v39 = vpop.permute.xlu0 %3055 }
 0x427   : > { %3187 = vst.msk [vmem:[#allocation8 + $0x4f] sm:$0xfe] %vm3169_vm5, %v3056_v39 }
 0x429   : > { %v3102_v61 = vpop.permute.xlu1 %3101 }
 0x42a   : > { %3210 = vst.msk [vmem:[#allocation8 + $0xcf] sm:$0x1] %vm3173_vm6, %v3102_v61 }
 0x42b   : > { %v3060_v63 = vpop.permute.xlu0 %3059 }
 0x42c   : > { %3189 = vst.msk [vmem:[#allocation8 + $0x5f] sm:$0x1] %vm3173_vm6, %v3060_v63 }
 0x42d   : > { %v3046_v53 = vpop.permute.xlu1 %3045 }
 0x42e   : > { %3182 = vst.msk [vmem:[#allocation8 + $0x37] sm:$0xff] %vm3171_vm4, %v3046_v53 }
 0x42f   : > { %v3064_v30 = vpop.permute.xlu0 %3063 }
 0x430   : > { %3191 = vst.msk [vmem:[#allocation8 + $0x67] sm:$0xff] %vm3171_vm4, %v3064_v30 }
 0x431   : > { %v3058_v33 = vpop.permute.xlu1 %3057 }
 0x432   : > { %3188 = vst.msk [vmem:[#allocation8 + $0x57] sm:$0xff] %vm3171_vm4, %v3058_v33 }
 0x433   : > { %v3092_v1 = vpop.permute.xlu0 %3091 }
 0x434   : > { %3205 = vst.msk [vmem:[#allocation8 + $0xaf] sm:$0xfe] %vm3169_vm5, %v3092_v1 }
 0x435   : > { %v3062_v6 = vpop.permute.xlu1 %3061 }
 0x436   : > { %3190 = vst.msk [vmem:[#allocation8 + $0x5f] sm:$0xfe] %vm3169_vm5, %v3062_v6 }
 0x437   : > { %v3096_v4 = vpop.permute.xlu0 %3095 }
 0x438   : > { %3207 = vst.msk [vmem:[#allocation8 + $0xbf] sm:$0x1] %vm3173_vm6, %v3096_v4 }
 0x43b   : > { %v3066_v32 = vpop.permute.xlu1 %3065 }
 0x43c   : > { %3192 = vst.msk [vmem:[#allocation8 + $0x6f] sm:$0x1] %vm3173_vm6, %v3066_v32 }
 0x43d   : > { %v3104_v56 = vpop.permute.xlu0 %3103 }
 0x43e   : > { %3211 = vst.msk [vmem:[#allocation8 + $0xcf] sm:$0xfe] %vm3169_vm5, %v3104_v56 }
 0x43f   : > { %v3094_v57 = vpop.permute.xlu1 %3093 }
 0x440   : > { %3206 = vst.msk [vmem:[#allocation8 + $0xb7] sm:$0xff] %vm3171_vm4, %v3094_v57 }
 0x447   : > { %v3108_v25 = vpop.permute.xlu0 %3107 }
 0x448   : > { %3213 = vst.msk [vmem:[#allocation8 + $0xdf] sm:$0x1] %vm3173_vm6, %v3108_v25 }
 0x44d   : > { %v3106_v35 = vpop.permute.xlu1 %3105 }
 0x44e   : > { %3212 = vst.msk [vmem:[#allocation8 + $0xd7] sm:$0xff] %vm3171_vm4, %v3106_v35 }
 0x455   : > { %v3112_v27 = vpop.permute.xlu0 %3111 }
 0x456   : > { %3215 = vst.msk [vmem:[#allocation8 + $0xe7] sm:$0xff] %vm3171_vm4, %v3112_v27 }
 0x457   : > { %v3110_v2 = vpop.permute.xlu1 %3109 }
 0x458   : > { %3214 = vst.msk [vmem:[#allocation8 + $0xdf] sm:$0xfe] %vm3169_vm5, %v3110_v2 }
 0x45c   : > { %v3068_v40 = vpop.permute.xlu0 %3067 }
 0x45d   : > { %3193 = vst.msk [vmem:[#allocation8 + $0x6f] sm:$0xfe] %vm3169_vm5, %v3068_v40 }
 0x45e   : > { %v3114_v42 = vpop.permute.xlu1 %3113 }
 0x45f   : > { %3216 = vst.msk [vmem:[#allocation8 + $0xef] sm:$0x1] %vm3173_vm6, %v3114_v42 }
 0x460   : > { %v3072_v37 = vpop.permute.xlu0 %3071 }
 0x461   : > { %3195 = vst.msk [vmem:[#allocation8 + $0x7f] sm:$0x1] %vm3173_vm6, %v3072_v37 }
 0x462   : > { %v3070_v3 = vpop.permute.xlu1 %3069 }
 0x463   : > { %3194 = vst.msk [vmem:[#allocation8 + $0x77] sm:$0xff] %vm3171_vm4, %v3070_v3 }
 0x464   : > { %v3116_v58 = vpop.permute.xlu0 %3115 }
 0x465   : > { %3217 = vst.msk [vmem:[#allocation8 + $0xef] sm:$0xfe] %vm3169_vm5, %v3116_v58 }
 0x466   : > { %v3118_v24 = vpop.permute.xlu1 %3117 }
 0x467   : > { %3218 = vst.msk [vmem:[#allocation8 + $0xf7] sm:$0xff] %vm3171_vm4, %v3118_v24 }
 0x468   : > { %v3120_v44 = vpop.permute.xlu0 %3119 }
 0x469   : > { %3219 = vst.msk [vmem:[#allocation8 + $0xff] sm:$0x1] %vm3173_vm6, %v3120_v44 }
 0x46a PF: > { %p6057_p6 = scmp.eq.s32.totalorder %s3322_s15, 1  ;;  %s3705_s10 = smov [#allocation8]  }
 0x46b   : > { %s3236_s11 = sshll.u32 %s3705_s10, 4  ;;  %s3237_s11 = int_to_ptr.vmem [resolvable:$true] %s3236_s11 }
 0x46c   : > { %s3640_s18 = scalar_lea.vmem %s3237_s11, 4096  ;;  %s3646_s19 = scalar_lea.vmem %s3237_s11, 8192 }
 0x46d   : > { %p3641_p7 = scmp.ne.s32.totalorder %s3237_s11, %s3640_s18  ;;  %p3647_p10 = scmp.lt.s32.totalorder %s3237_s11, %s3237_s11 }
 0x46e   : > { %p3648_p11 = scmp.lt.s32.totalorder %s3646_s19, %s3640_s18 }
 0x46f   : > { %p3642_p8 = pnand %p3641_p7, %p6057_p6 }
 0x470   : > { %p3649_p12 = por %p3648_p11, %p3647_p10 }
 0x471   : > { %p3643_p9 = pneg %p3642_p8 }
 0x473   : > { %p3650_p13 = pnand %p3649_p12, %p3643_p9 }
 0x475   : > { %3653 = shalt.err (!%p3650_p13)
}
 0x476   : > { %s3706_s20 = smov 128   ;;  %s3707_s15 = smov 8  }
 0x477   : > { %3336 = dma.vmem_to_hbm [thread:$0]  (%p6057_p6), %s3237_s11, 4096, %s6083_s3, [#allocation9], %s3706_s20, %s3706_s20, %s3707_s15  }
 0x478 PF: > { %p3344_p0 = scmp.ge.s32.totalorder %s3690_s14, 2  ;;  %p3345_p1 = scmp.eq.s32.totalorder %s3323_s16, 1 }
 0x47a   : > { %p3340_p2 = pnand %p3345_p1, %p3344_p0 }
 0x47c   : > { %p3341_p3 = pneg %p3340_p2 }
 0x47e   : > { %3677 = dma.done.wait (%p3341_p3), [#allocation9], 4096  }
 0x47f   : > { %3679 = vsyncadd (%p3341_p3), [#allocation9], 4294963200  ;;  %s16_s14 = sadd.s32 1, %s3690_s14   ;;  %s6399_s12 = smov %s3686_s13 }
 0x480   : > { %p13_p4 = scmp.ge.s32.totalorder %s16_s14, 4   ;;  %s6400_s13 = smov %s6402_s17 }
 0x482   :  { %15 = sbr.rel (!%p13_p4) target bundleno = 3 (0x3), region = 88 }
 0x487   :  { %3257 = vsyncpa [#allocation9], 1 }
 0x488   :  { %3259 = vsyncpa [#allocation9 + $0x1], 1 }

</bundles_post_ra>
